<compile_context>
chip_gen: v7x
topology: tpu7x:2x2x1
jax: 0.10.0
libtpu: 0.0.40
codegen_flags: <defaults>
</compile_context>

<pallas_src>
import functools
import math

import jax
import jax.numpy as jnp
from jax import lax
from jax.experimental import pallas as pl
from jax.experimental.pallas import tpu as pltpu  # noqa: F401  (TPU backend assumed)

# ---- model configuration (small, consistent with the module) ---------------
S = 8          # sequence length
B = 2          # batch
D = 32         # d_model
H = 4          # attention heads
DH = D // H    # head dim (== 8 == f32 sublane tile)
F = 64         # dim_feedforward
NUM_LAYERS = 3 # must be odd -> num_block = 1
LN_EPS = 1e-5
NEG_BIG = -1e9  # finite mask value (avoids -inf -> NaN in softmax)


# ------------------------------ fused kernel --------------------------------
def _fused_kernel(x_ref, rowid_ref, colid_ref,
                  wq_ref, bq_ref, wk_ref, bk_ref, wvo_ref, bo_ref,
                  w1_ref, b1_ref, w2_ref, b2_ref,
                  g1_ref, be1_ref, g2_ref, be2_ref,
                  skw1_ref, skw2_ref, skb_ref,
                  o_ref, *, eps):
    """Whole SkipEncodeTransformer forward on VMEM-resident data.

    x_ref      : (M, D)            flattened activations, M = S*B
    rowid_ref  : (M, 1)  f32       batch id of each query row
    colid_ref  : (1, M)  f32       batch id of each key (or -1 if padded key)
    wq/bq      : (L,H,D,DH)/(L,H,1,DH)  per-head Q proj (1/sqrt(dh) folded in)
    wk/bk      : (L,D,D)/(L,1,D)        K proj
    wvo        : (L,H,D,D)              fused per-head V-proj @ out-proj
    bo         : (L,1,D)                out-proj bias (+ folded V bias)
    w1/b1      : (L,D,F)/(L,1,F)        FFN first linear
    w2/b2      : (L,F,D)/(L,1,D)        FFN second linear
    g1/be1     : (L,1,D)                LayerNorm1 gamma/beta
    g2/be2     : (L,1,D)                LayerNorm2 gamma/beta
    skw1/skw2  : (NB,D,D)               skip linear, pre-split halves of (2D,D)
    skb        : (NB,1,D)               skip linear bias
    o_ref      : (M, D)
    """
    num_layers = wk_ref.shape[0]
    num_block = (num_layers - 1) // 2
    num_heads = wq_ref.shape[1]
    dh = wq_ref.shape[3]

    x = x_ref[...].astype(jnp.float32)

    # Additive attention bias rebuilt in-kernel from O(M) vectors (no dense
    # (M,M) HBM input): allowed <=> same batch element AND key not padded.
    bias = jnp.where(rowid_ref[...] == colid_ref[...], 0.0, NEG_BIG)   # (M, M)

    def layer_norm(y, g, b):
        mu = jnp.mean(y, axis=-1, keepdims=True)
        var = jnp.mean(jnp.square(y - mu), axis=-1, keepdims=True)
        return (y - mu) * lax.rsqrt(var + eps) * g + b

    def encoder_layer(xin, l):
        # ---- self attention (post-norm TransformerEncoderLayer) ----
        # K for all heads, transposed ONCE per layer: per-head slices of kT
        # are sublane-aligned (free) and already the (K, N) matmul RHS.
        k = jnp.dot(xin, wk_ref[l], preferred_element_type=jnp.float32) + bk_ref[l]
        kT = jnp.transpose(k)                                     # (D, M)

        acc = None
        for h in range(num_heads):                                # static unroll
            # per-head Q straight from its own pre-split weight: no lane-offset
            # slicing of a computed value (scale already folded into wq/bq).
            q_h = (jnp.dot(xin, wq_ref[l, h], preferred_element_type=jnp.float32)
                   + bq_ref[l, h])                                # (M, dh)
            s = jnp.dot(q_h, kT[h * dh:(h + 1) * dh, :],
                        preferred_element_type=jnp.float32) + bias  # (M, M)
            s = s - jnp.max(s, axis=-1, keepdims=True)
            p = jnp.exp(s)
            denom = jnp.sum(p, axis=-1, keepdims=True)            # (M, 1)
            # V-proj and out-proj fused offline into one (D, D) weight.
            vo_h = jnp.dot(xin, wvo_ref[l, h],
                           preferred_element_type=jnp.float32)    # (M, D)
            head = jnp.dot(p, vo_h, preferred_element_type=jnp.float32)
            # deferred softmax normalization: EUP reciprocal overlaps the matmul
            head = head * pl.reciprocal(denom, approx=True)
            acc = head if acc is None else acc + head
        attn = acc + bo_ref[l]

        y = layer_norm(xin + attn, g1_ref[l], be1_ref[l])

        # ---- feed forward (ReLU) ----
        hdn = jnp.maximum(
            jnp.dot(y, w1_ref[l], preferred_element_type=jnp.float32) + b1_ref[l],
            0.0)
        ff = jnp.dot(hdn, w2_ref[l], preferred_element_type=jnp.float32) + b2_ref[l]
        return layer_norm(y + ff, g2_ref[l], be2_ref[l])

    # ---- U-structure: input blocks -> middle -> (skip linear + output) ----
    skips = []
    for l in range(num_block):
        x = encoder_layer(x, l)
        skips.append(x)
    x = encoder_layer(x, num_block)
    for i in range(num_block):
        l = num_block + 1 + i
        skip = skips.pop()
        # cat([x, skip], -1) @ W + b == x @ W_top + skip @ W_bot + b (pre-split)
        x = (jnp.dot(x, skw1_ref[i], preferred_element_type=jnp.float32)
             + jnp.dot(skip, skw2_ref[i], preferred_element_type=jnp.float32)
             + skb_ref[i])
        x = encoder_layer(x, l)

    o_ref[...] = x.astype(o_ref.dtype)


def _vmem_spec(shape):
    """Full-extent block (whole array resident in VMEM), gridless call."""
    zeros = (0,) * len(shape)
    return pl.BlockSpec(shape, lambda zeros=zeros: zeros)


# --------------------------- model forward (wrapper) -------------------------
def skip_encode_transformer(src, params, src_key_padding_mask=None):
    """src: (S, B, D); src_key_padding_mask: (B, S) bool, True = pad."""
    s, b, d = src.shape
    m = s * b
    x2 = src.reshape(m, d)

    # O(M) mask descriptors (dense (M,M) bias is built inside the kernel).
    batch_ids = jnp.tile(jnp.arange(b, dtype=jnp.float32), s)       # (M,)
    row_ids = batch_ids.reshape(m, 1)
    if src_key_padding_mask is None:
        col_ids = batch_ids.reshape(1, m)
    else:
        key_pad = jnp.transpose(src_key_padding_mask).reshape(m)    # True = pad
        col_ids = jnp.where(key_pad, -1.0, batch_ids).reshape(1, m)

    inputs = [x2, row_ids, col_ids,
              params["wq"], params["bq"], params["wk"], params["bk"],
              params["wvo"], params["bo"],
              params["w1"], params["b1"], params["w2"], params["b2"],
              params["g1"], params["be1"], params["g2"], params["be2"],
              params["skw1"], params["skw2"], params["skb"]]

    kern = functools.partial(_fused_kernel, eps=LN_EPS)
    out = pl.pallas_call(
        kern,
        out_shape=jax.ShapeDtypeStruct((m, d), src.dtype),
        in_specs=[_vmem_spec(a.shape) for a in inputs],
        out_specs=_vmem_spec((m, d)),
        # single gridless invocation: everything fits comfortably in VMEM
    )(*inputs)
    # self.norm is None in this configuration
    return out.reshape(s, b, d)


# ------------------------------ parameter init -------------------------------
def _xavier(key, shape):
    fan_in, fan_out = shape
    a = math.sqrt(6.0 / (fan_in + fan_out))
    return jax.random.uniform(key, shape, jnp.float32, -a, a)


def _init_encoder_layer(key):
    ks = jax.random.split(key, 6)
    scale = 1.0 / math.sqrt(DH)

    wqkv = _xavier(ks[0], (D, 3 * D))            # packed in-proj, x @ W layout
    bqkv = jnp.zeros((3 * D,), jnp.float32)      # PyTorch in_proj_bias = 0
    wq, wk, wv = wqkv[:, :D], wqkv[:, D:2 * D], wqkv[:, 2 * D:]
    bq, bk, bv = bqkv[:D], bqkv[D:2 * D], bqkv[2 * D:]

    wo = _xavier(ks[1], (D, D))
    bo = jnp.zeros((D,), jnp.float32)

    # fold 1/sqrt(dh) into Q and pre-split per head (no lane slicing in-kernel)
    wq_h = (wq * scale).reshape(D, H, DH).transpose(1, 0, 2)      # (H, D, DH)
    bq_h = (bq * scale).reshape(H, 1, DH)                         # (H, 1, DH)
    # fuse V-projection and out-projection offline: wvo_h = Wv_h @ Wo_h
    wv_h = wv.reshape(D, H, DH).transpose(1, 0, 2)                # (H, D, DH)
    wo_h = wo.reshape(H, DH, D)                                   # (H, DH, D)
    wvo = jnp.einsum("hik,hkj->hij", wv_h, wo_h)                  # (H, D, D)
    bo_eff = (bo + bv @ wo).reshape(1, D)                         # V bias folded

    return dict(
        wq=wq_h, bq=bq_h,
        wk=wk, bk=bk.reshape(1, D),
        wvo=wvo, bo=bo_eff,
        w1=_xavier(ks[2], (D, F)),
        b1=jax.random.uniform(ks[3], (1, F), jnp.float32,
                              -1.0 / math.sqrt(D), 1.0 / math.sqrt(D)),
        w2=_xavier(ks[4], (F, D)),
        b2=jax.random.uniform(ks[5], (1, D), jnp.float32,
                              -1.0 / math.sqrt(F), 1.0 / math.sqrt(F)),
        g1=jnp.ones((1, D), jnp.float32), be1=jnp.zeros((1, D), jnp.float32),
        g2=jnp.ones((1, D), jnp.float32), be2=jnp.zeros((1, D), jnp.float32),
    )


def init_params(key, num_layers=NUM_LAYERS):
    assert num_layers % 2 == 1
    num_block = (num_layers - 1) // 2
    keys = jax.random.split(key, num_layers + num_block)
    # layer order: input blocks, middle block, output blocks
    layers = [_init_encoder_layer(keys[i]) for i in range(num_layers)]

    def stack(name):
        return jnp.stack([lp[name] for lp in layers], axis=0)

    skw1, skw2, skb = [], [], []
    for i in range(num_block):
        kw, kb = jax.random.split(keys[num_layers + i])
        skw = _xavier(kw, (2 * D, D))
        skw1.append(skw[:D])        # multiplies x
        skw2.append(skw[D:])        # multiplies the skip activation
        skb.append(jax.random.uniform(kb, (1, D), jnp.float32,
                                      -1.0 / math.sqrt(2 * D),
                                      1.0 / math.sqrt(2 * D)))

    params = {name: stack(name) for name in layers[0]}
    params.update(skw1=jnp.stack(skw1, axis=0),
                  skw2=jnp.stack(skw2, axis=0),
                  skb=jnp.stack(skb, axis=0))
    return params


# ----------------------------------- main ------------------------------------
if __name__ == "__main__":
    root = jax.random.PRNGKey(0)
    k_src, k_par = jax.random.split(root)

    src = jax.random.normal(k_src, (S, B, D), jnp.float32)          # (S,B,D)
    # key-padding mask: True = padded; pad last 2 keys of batch element 1
    key_padding_mask = jnp.zeros((B, S), dtype=bool).at[1, S - 2:].set(True)

    params = init_params(k_par)

    fwd = jax.jit(skip_encode_transformer)
    out = fwd(src, params, key_padding_mask)
    out = jax.block_until_ready(out)
    assert out.shape == (S, B, D)
    assert bool(jnp.all(jnp.isfinite(out)))
    print("KERNEL_OK")
</pallas_src>

<mosaic_0001>
module attributes {stable_mosaic.version = 11 : i64} {
  func.func @_fused_kernel(%arg0: memref<16x32xf32, #tpu.memory_space<vmem>>, %arg1: memref<16x1xf32, #tpu.memory_space<vmem>>, %arg2: memref<1x16xf32, #tpu.memory_space<vmem>>, %arg3: memref<3x4x32x8xf32, #tpu.memory_space<vmem>>, %arg4: memref<3x4x1x8xf32, #tpu.memory_space<vmem>>, %arg5: memref<3x32x32xf32, #tpu.memory_space<vmem>>, %arg6: memref<3x1x32xf32, #tpu.memory_space<vmem>>, %arg7: memref<3x4x32x32xf32, #tpu.memory_space<vmem>>, %arg8: memref<3x1x32xf32, #tpu.memory_space<vmem>>, %arg9: memref<3x32x64xf32, #tpu.memory_space<vmem>>, %arg10: memref<3x1x64xf32, #tpu.memory_space<vmem>>, %arg11: memref<3x64x32xf32, #tpu.memory_space<vmem>>, %arg12: memref<3x1x32xf32, #tpu.memory_space<vmem>>, %arg13: memref<3x1x32xf32, #tpu.memory_space<vmem>>, %arg14: memref<3x1x32xf32, #tpu.memory_space<vmem>>, %arg15: memref<3x1x32xf32, #tpu.memory_space<vmem>>, %arg16: memref<3x1x32xf32, #tpu.memory_space<vmem>>, %arg17: memref<1x32x32xf32, #tpu.memory_space<vmem>>, %arg18: memref<1x32x32xf32, #tpu.memory_space<vmem>>, %arg19: memref<1x1x32xf32, #tpu.memory_space<vmem>>, %arg20: memref<16x32xf32, #tpu.memory_space<vmem>>) attributes {dimension_semantics = [], scalar_prefetch = 0 : i64, scratch_operands = 0 : i64, tpu.core_type = #tpu.core_type<tc>} {
    %c0 = arith.constant 0 : index
    %c0_0 = arith.constant 0 : index
    %0 = vector.load %arg0[%c0, %c0_0] : memref<16x32xf32, #tpu.memory_space<vmem>>, vector<16x32xf32>
    %c0_1 = arith.constant 0 : index
    %c0_2 = arith.constant 0 : index
    %1 = vector.load %arg1[%c0_1, %c0_2] : memref<16x1xf32, #tpu.memory_space<vmem>>, vector<16x1xf32>
    %c0_3 = arith.constant 0 : index
    %c0_4 = arith.constant 0 : index
    %2 = vector.load %arg2[%c0_3, %c0_4] : memref<1x16xf32, #tpu.memory_space<vmem>>, vector<1x16xf32>
    %3 = vector.broadcast %1 : vector<16x1xf32> to vector<16x16xf32>
    %4 = vector.broadcast %2 : vector<1x16xf32> to vector<16x16xf32>
    %5 = arith.cmpf oeq, %3, %4 : vector<16x16xf32>
    %cst = arith.constant 0.000000e+00 : f32
    %cst_5 = arith.constant -1.000000e+09 : f32
    %6 = vector.broadcast %cst : f32 to vector<16x16xf32>
    %7 = vector.broadcast %cst_5 : f32 to vector<16x16xf32>
    %8 = arith.select %5, %6, %7 : vector<16x16xi1>, vector<16x16xf32>
    %c0_6 = arith.constant 0 : index
    %c0_7 = arith.constant 0 : index
    %c0_8 = arith.constant 0 : index
    %9 = vector.load %arg5[%c0_6, %c0_7, %c0_8] : memref<3x32x32xf32, #tpu.memory_space<vmem>>, vector<1x32x32xf32>
    %10 = vector.shape_cast %9 : vector<1x32x32xf32> to vector<32x32xf32>
    %cst_9 = arith.constant dense<0.000000e+00> : vector<16x32xf32>
    %11 = tpu.matmul %0, %10, %cst_9 {dimension_numbers = #tpu.dot_dimension_numbers<[1], [0], [0], [1], [0, 0, 1, 1], [], []>} : vector<16x32xf32>, vector<32x32xf32>, vector<16x32xf32> -> vector<16x32xf32>
    %c0_10 = arith.constant 0 : index
    %c0_11 = arith.constant 0 : index
    %c0_12 = arith.constant 0 : index
    %12 = vector.load %arg6[%c0_10, %c0_11, %c0_12] : memref<3x1x32xf32, #tpu.memory_space<vmem>>, vector<1x1x32xf32>
    %13 = vector.shape_cast %12 : vector<1x1x32xf32> to vector<1x32xf32>
    %14 = vector.broadcast %13 : vector<1x32xf32> to vector<16x32xf32>
    %15 = arith.addf %11, %14 : vector<16x32xf32>
    %16 = tpu.transpose %15, [1, 0] : vector<16x32xf32> -> vector<32x16xf32>
    %c0_13 = arith.constant 0 : index
    %c0_14 = arith.constant 0 : index
    %c0_15 = arith.constant 0 : index
    %c0_16 = arith.constant 0 : index
    %17 = vector.load %arg3[%c0_13, %c0_14, %c0_15, %c0_16] : memref<3x4x32x8xf32, #tpu.memory_space<vmem>>, vector<1x1x32x8xf32>
    %18 = vector.shape_cast %17 : vector<1x1x32x8xf32> to vector<32x8xf32>
    %cst_17 = arith.constant dense<0.000000e+00> : vector<16x8xf32>
    %19 = tpu.matmul %0, %18, %cst_17 {dimension_numbers = #tpu.dot_dimension_numbers<[1], [0], [0], [1], [0, 0, 1, 1], [], []>} : vector<16x32xf32>, vector<32x8xf32>, vector<16x8xf32> -> vector<16x8xf32>
    %c0_18 = arith.constant 0 : index
    %c0_19 = arith.constant 0 : index
    %c0_20 = arith.constant 0 : index
    %c0_21 = arith.constant 0 : index
    %20 = vector.load %arg4[%c0_18, %c0_19, %c0_20, %c0_21] : memref<3x4x1x8xf32, #tpu.memory_space<vmem>>, vector<1x1x1x8xf32>
    %21 = vector.shape_cast %20 : vector<1x1x1x8xf32> to vector<1x8xf32>
    %22 = vector.broadcast %21 : vector<1x8xf32> to vector<16x8xf32>
    %23 = arith.addf %19, %22 : vector<16x8xf32>
    %24 = vector.extract_strided_slice %16 {offsets = [0, 0], sizes = [8, 16], strides = [1, 1]} : vector<32x16xf32> to vector<8x16xf32>
    %cst_22 = arith.constant dense<0.000000e+00> : vector<16x16xf32>
    %25 = tpu.matmul %23, %24, %cst_22 {dimension_numbers = #tpu.dot_dimension_numbers<[1], [0], [0], [1], [0, 0, 1, 1], [], []>} : vector<16x8xf32>, vector<8x16xf32>, vector<16x16xf32> -> vector<16x16xf32>
    %26 = arith.addf %25, %8 : vector<16x16xf32>
    %cst_23 = arith.constant dense<0xFF800000> : vector<16xf32>
    %27 = vector.multi_reduction <maximumf>, %26, %cst_23 [1] : vector<16x16xf32> to vector<16xf32>
    %28 = vector.shape_cast %27 : vector<16xf32> to vector<16x1xf32>
    %29 = vector.broadcast %28 : vector<16x1xf32> to vector<16x16xf32>
    %30 = arith.subf %26, %29 : vector<16x16xf32>
    %31 = math.exp %30 : vector<16x16xf32>
    %cst_24 = arith.constant dense<0.000000e+00> : vector<16xf32>
    %32 = vector.multi_reduction <add>, %31, %cst_24 [1] : vector<16x16xf32> to vector<16xf32>
    %33 = vector.shape_cast %32 : vector<16xf32> to vector<16x1xf32>
    %c0_25 = arith.constant 0 : index
    %c0_26 = arith.constant 0 : index
    %c0_27 = arith.constant 0 : index
    %c0_28 = arith.constant 0 : index
    %34 = vector.load %arg7[%c0_25, %c0_26, %c0_27, %c0_28] : memref<3x4x32x32xf32, #tpu.memory_space<vmem>>, vector<1x1x32x32xf32>
    %35 = vector.shape_cast %34 : vector<1x1x32x32xf32> to vector<32x32xf32>
    %cst_29 = arith.constant dense<0.000000e+00> : vector<16x32xf32>
    %36 = tpu.matmul %0, %35, %cst_29 {dimension_numbers = #tpu.dot_dimension_numbers<[1], [0], [0], [1], [0, 0, 1, 1], [], []>} : vector<16x32xf32>, vector<32x32xf32>, vector<16x32xf32> -> vector<16x32xf32>
    %cst_30 = arith.constant dense<0.000000e+00> : vector<16x32xf32>
    %37 = tpu.matmul %31, %36, %cst_30 {dimension_numbers = #tpu.dot_dimension_numbers<[1], [0], [0], [1], [0, 0, 1, 1], [], []>} : vector<16x16xf32>, vector<16x32xf32>, vector<16x32xf32> -> vector<16x32xf32>
    %38 = tpu.reciprocal %33 {approx = true} : vector<16x1xf32> -> vector<16x1xf32>
    %39 = vector.broadcast %38 : vector<16x1xf32> to vector<16x32xf32>
    %40 = arith.mulf %37, %39 : vector<16x32xf32>
    %c0_31 = arith.constant 0 : index
    %c1 = arith.constant 1 : index
    %c0_32 = arith.constant 0 : index
    %c0_33 = arith.constant 0 : index
    %41 = vector.load %arg3[%c0_31, %c1, %c0_32, %c0_33] : memref<3x4x32x8xf32, #tpu.memory_space<vmem>>, vector<1x1x32x8xf32>
    %42 = vector.shape_cast %41 : vector<1x1x32x8xf32> to vector<32x8xf32>
    %cst_34 = arith.constant dense<0.000000e+00> : vector<16x8xf32>
    %43 = tpu.matmul %0, %42, %cst_34 {dimension_numbers = #tpu.dot_dimension_numbers<[1], [0], [0], [1], [0, 0, 1, 1], [], []>} : vector<16x32xf32>, vector<32x8xf32>, vector<16x8xf32> -> vector<16x8xf32>
    %c0_35 = arith.constant 0 : index
    %c1_36 = arith.constant 1 : index
    %c0_37 = arith.constant 0 : index
    %c0_38 = arith.constant 0 : index
    %44 = vector.load %arg4[%c0_35, %c1_36, %c0_37, %c0_38] : memref<3x4x1x8xf32, #tpu.memory_space<vmem>>, vector<1x1x1x8xf32>
    %45 = vector.shape_cast %44 : vector<1x1x1x8xf32> to vector<1x8xf32>
    %46 = vector.broadcast %45 : vector<1x8xf32> to vector<16x8xf32>
    %47 = arith.addf %43, %46 : vector<16x8xf32>
    %48 = vector.extract_strided_slice %16 {offsets = [8, 0], sizes = [8, 16], strides = [1, 1]} : vector<32x16xf32> to vector<8x16xf32>
    %cst_39 = arith.constant dense<0.000000e+00> : vector<16x16xf32>
    %49 = tpu.matmul %47, %48, %cst_39 {dimension_numbers = #tpu.dot_dimension_numbers<[1], [0], [0], [1], [0, 0, 1, 1], [], []>} : vector<16x8xf32>, vector<8x16xf32>, vector<16x16xf32> -> vector<16x16xf32>
    %50 = arith.addf %49, %8 : vector<16x16xf32>
    %cst_40 = arith.constant dense<0xFF800000> : vector<16xf32>
    %51 = vector.multi_reduction <maximumf>, %50, %cst_40 [1] : vector<16x16xf32> to vector<16xf32>
    %52 = vector.shape_cast %51 : vector<16xf32> to vector<16x1xf32>
    %53 = vector.broadcast %52 : vector<16x1xf32> to vector<16x16xf32>
    %54 = arith.subf %50, %53 : vector<16x16xf32>
    %55 = math.exp %54 : vector<16x16xf32>
    %cst_41 = arith.constant dense<0.000000e+00> : vector<16xf32>
    %56 = vector.multi_reduction <add>, %55, %cst_41 [1] : vector<16x16xf32> to vector<16xf32>
    %57 = vector.shape_cast %56 : vector<16xf32> to vector<16x1xf32>
    %c0_42 = arith.constant 0 : index
    %c1_43 = arith.constant 1 : index
    %c0_44 = arith.constant 0 : index
    %c0_45 = arith.constant 0 : index
    %58 = vector.load %arg7[%c0_42, %c1_43, %c0_44, %c0_45] : memref<3x4x32x32xf32, #tpu.memory_space<vmem>>, vector<1x1x32x32xf32>
    %59 = vector.shape_cast %58 : vector<1x1x32x32xf32> to vector<32x32xf32>
    %cst_46 = arith.constant dense<0.000000e+00> : vector<16x32xf32>
    %60 = tpu.matmul %0, %59, %cst_46 {dimension_numbers = #tpu.dot_dimension_numbers<[1], [0], [0], [1], [0, 0, 1, 1], [], []>} : vector<16x32xf32>, vector<32x32xf32>, vector<16x32xf32> -> vector<16x32xf32>
    %cst_47 = arith.constant dense<0.000000e+00> : vector<16x32xf32>
    %61 = tpu.matmul %55, %60, %cst_47 {dimension_numbers = #tpu.dot_dimension_numbers<[1], [0], [0], [1], [0, 0, 1, 1], [], []>} : vector<16x16xf32>, vector<16x32xf32>, vector<16x32xf32> -> vector<16x32xf32>
    %62 = tpu.reciprocal %57 {approx = true} : vector<16x1xf32> -> vector<16x1xf32>
    %63 = vector.broadcast %62 : vector<16x1xf32> to vector<16x32xf32>
    %64 = arith.mulf %61, %63 : vector<16x32xf32>
    %65 = arith.addf %40, %64 : vector<16x32xf32>
    %c0_48 = arith.constant 0 : index
    %c2 = arith.constant 2 : index
    %c0_49 = arith.constant 0 : index
    %c0_50 = arith.constant 0 : index
    %66 = vector.load %arg3[%c0_48, %c2, %c0_49, %c0_50] : memref<3x4x32x8xf32, #tpu.memory_space<vmem>>, vector<1x1x32x8xf32>
    %67 = vector.shape_cast %66 : vector<1x1x32x8xf32> to vector<32x8xf32>
    %cst_51 = arith.constant dense<0.000000e+00> : vector<16x8xf32>
    %68 = tpu.matmul %0, %67, %cst_51 {dimension_numbers = #tpu.dot_dimension_numbers<[1], [0], [0], [1], [0, 0, 1, 1], [], []>} : vector<16x32xf32>, vector<32x8xf32>, vector<16x8xf32> -> vector<16x8xf32>
    %c0_52 = arith.constant 0 : index
    %c2_53 = arith.constant 2 : index
    %c0_54 = arith.constant 0 : index
    %c0_55 = arith.constant 0 : index
    %69 = vector.load %arg4[%c0_52, %c2_53, %c0_54, %c0_55] : memref<3x4x1x8xf32, #tpu.memory_space<vmem>>, vector<1x1x1x8xf32>
    %70 = vector.shape_cast %69 : vector<1x1x1x8xf32> to vector<1x8xf32>
    %71 = vector.broadcast %70 : vector<1x8xf32> to vector<16x8xf32>
    %72 = arith.addf %68, %71 : vector<16x8xf32>
    %73 = vector.extract_strided_slice %16 {offsets = [16, 0], sizes = [8, 16], strides = [1, 1]} : vector<32x16xf32> to vector<8x16xf32>
    %cst_56 = arith.constant dense<0.000000e+00> : vector<16x16xf32>
    %74 = tpu.matmul %72, %73, %cst_56 {dimension_numbers = #tpu.dot_dimension_numbers<[1], [0], [0], [1], [0, 0, 1, 1], [], []>} : vector<16x8xf32>, vector<8x16xf32>, vector<16x16xf32> -> vector<16x16xf32>
    %75 = arith.addf %74, %8 : vector<16x16xf32>
    %cst_57 = arith.constant dense<0xFF800000> : vector<16xf32>
    %76 = vector.multi_reduction <maximumf>, %75, %cst_57 [1] : vector<16x16xf32> to vector<16xf32>
    %77 = vector.shape_cast %76 : vector<16xf32> to vector<16x1xf32>
    %78 = vector.broadcast %77 : vector<16x1xf32> to vector<16x16xf32>
    %79 = arith.subf %75, %78 : vector<16x16xf32>
    %80 = math.exp %79 : vector<16x16xf32>
    %cst_58 = arith.constant dense<0.000000e+00> : vector<16xf32>
    %81 = vector.multi_reduction <add>, %80, %cst_58 [1] : vector<16x16xf32> to vector<16xf32>
    %82 = vector.shape_cast %81 : vector<16xf32> to vector<16x1xf32>
    %c0_59 = arith.constant 0 : index
    %c2_60 = arith.constant 2 : index
    %c0_61 = arith.constant 0 : index
    %c0_62 = arith.constant 0 : index
    %83 = vector.load %arg7[%c0_59, %c2_60, %c0_61, %c0_62] : memref<3x4x32x32xf32, #tpu.memory_space<vmem>>, vector<1x1x32x32xf32>
    %84 = vector.shape_cast %83 : vector<1x1x32x32xf32> to vector<32x32xf32>
    %cst_63 = arith.constant dense<0.000000e+00> : vector<16x32xf32>
    %85 = tpu.matmul %0, %84, %cst_63 {dimension_numbers = #tpu.dot_dimension_numbers<[1], [0], [0], [1], [0, 0, 1, 1], [], []>} : vector<16x32xf32>, vector<32x32xf32>, vector<16x32xf32> -> vector<16x32xf32>
    %cst_64 = arith.constant dense<0.000000e+00> : vector<16x32xf32>
    %86 = tpu.matmul %80, %85, %cst_64 {dimension_numbers = #tpu.dot_dimension_numbers<[1], [0], [0], [1], [0, 0, 1, 1], [], []>} : vector<16x16xf32>, vector<16x32xf32>, vector<16x32xf32> -> vector<16x32xf32>
    %87 = tpu.reciprocal %82 {approx = true} : vector<16x1xf32> -> vector<16x1xf32>
    %88 = vector.broadcast %87 : vector<16x1xf32> to vector<16x32xf32>
    %89 = arith.mulf %86, %88 : vector<16x32xf32>
    %90 = arith.addf %65, %89 : vector<16x32xf32>
    %c0_65 = arith.constant 0 : index
    %c3 = arith.constant 3 : index
    %c0_66 = arith.constant 0 : index
    %c0_67 = arith.constant 0 : index
    %91 = vector.load %arg3[%c0_65, %c3, %c0_66, %c0_67] : memref<3x4x32x8xf32, #tpu.memory_space<vmem>>, vector<1x1x32x8xf32>
    %92 = vector.shape_cast %91 : vector<1x1x32x8xf32> to vector<32x8xf32>
    %cst_68 = arith.constant dense<0.000000e+00> : vector<16x8xf32>
    %93 = tpu.matmul %0, %92, %cst_68 {dimension_numbers = #tpu.dot_dimension_numbers<[1], [0], [0], [1], [0, 0, 1, 1], [], []>} : vector<16x32xf32>, vector<32x8xf32>, vector<16x8xf32> -> vector<16x8xf32>
    %c0_69 = arith.constant 0 : index
    %c3_70 = arith.constant 3 : index
    %c0_71 = arith.constant 0 : index
    %c0_72 = arith.constant 0 : index
    %94 = vector.load %arg4[%c0_69, %c3_70, %c0_71, %c0_72] : memref<3x4x1x8xf32, #tpu.memory_space<vmem>>, vector<1x1x1x8xf32>
    %95 = vector.shape_cast %94 : vector<1x1x1x8xf32> to vector<1x8xf32>
    %96 = vector.broadcast %95 : vector<1x8xf32> to vector<16x8xf32>
    %97 = arith.addf %93, %96 : vector<16x8xf32>
    %98 = vector.extract_strided_slice %16 {offsets = [24, 0], sizes = [8, 16], strides = [1, 1]} : vector<32x16xf32> to vector<8x16xf32>
    %cst_73 = arith.constant dense<0.000000e+00> : vector<16x16xf32>
    %99 = tpu.matmul %97, %98, %cst_73 {dimension_numbers = #tpu.dot_dimension_numbers<[1], [0], [0], [1], [0, 0, 1, 1], [], []>} : vector<16x8xf32>, vector<8x16xf32>, vector<16x16xf32> -> vector<16x16xf32>
    %100 = arith.addf %99, %8 : vector<16x16xf32>
    %cst_74 = arith.constant dense<0xFF800000> : vector<16xf32>
    %101 = vector.multi_reduction <maximumf>, %100, %cst_74 [1] : vector<16x16xf32> to vector<16xf32>
    %102 = vector.shape_cast %101 : vector<16xf32> to vector<16x1xf32>
    %103 = vector.broadcast %102 : vector<16x1xf32> to vector<16x16xf32>
    %104 = arith.subf %100, %103 : vector<16x16xf32>
    %105 = math.exp %104 : vector<16x16xf32>
    %cst_75 = arith.constant dense<0.000000e+00> : vector<16xf32>
    %106 = vector.multi_reduction <add>, %105, %cst_75 [1] : vector<16x16xf32> to vector<16xf32>
    %107 = vector.shape_cast %106 : vector<16xf32> to vector<16x1xf32>
    %c0_76 = arith.constant 0 : index
    %c3_77 = arith.constant 3 : index
    %c0_78 = arith.constant 0 : index
    %c0_79 = arith.constant 0 : index
    %108 = vector.load %arg7[%c0_76, %c3_77, %c0_78, %c0_79] : memref<3x4x32x32xf32, #tpu.memory_space<vmem>>, vector<1x1x32x32xf32>
    %109 = vector.shape_cast %108 : vector<1x1x32x32xf32> to vector<32x32xf32>
    %cst_80 = arith.constant dense<0.000000e+00> : vector<16x32xf32>
    %110 = tpu.matmul %0, %109, %cst_80 {dimension_numbers = #tpu.dot_dimension_numbers<[1], [0], [0], [1], [0, 0, 1, 1], [], []>} : vector<16x32xf32>, vector<32x32xf32>, vector<16x32xf32> -> vector<16x32xf32>
    %cst_81 = arith.constant dense<0.000000e+00> : vector<16x32xf32>
    %111 = tpu.matmul %105, %110, %cst_81 {dimension_numbers = #tpu.dot_dimension_numbers<[1], [0], [0], [1], [0, 0, 1, 1], [], []>} : vector<16x16xf32>, vector<16x32xf32>, vector<16x32xf32> -> vector<16x32xf32>
    %112 = tpu.reciprocal %107 {approx = true} : vector<16x1xf32> -> vector<16x1xf32>
    %113 = vector.broadcast %112 : vector<16x1xf32> to vector<16x32xf32>
    %114 = arith.mulf %111, %113 : vector<16x32xf32>
    %115 = arith.addf %90, %114 : vector<16x32xf32>
    %c0_82 = arith.constant 0 : index
    %c0_83 = arith.constant 0 : index
    %c0_84 = arith.constant 0 : index
    %116 = vector.load %arg8[%c0_82, %c0_83, %c0_84] : memref<3x1x32xf32, #tpu.memory_space<vmem>>, vector<1x1x32xf32>
    %117 = vector.shape_cast %116 : vector<1x1x32xf32> to vector<1x32xf32>
    %118 = vector.broadcast %117 : vector<1x32xf32> to vector<16x32xf32>
    %119 = arith.addf %115, %118 : vector<16x32xf32>
    %120 = arith.addf %0, %119 : vector<16x32xf32>
    %c0_85 = arith.constant 0 : index
    %c0_86 = arith.constant 0 : index
    %c0_87 = arith.constant 0 : index
    %121 = vector.load %arg13[%c0_85, %c0_86, %c0_87] : memref<3x1x32xf32, #tpu.memory_space<vmem>>, vector<1x1x32xf32>
    %122 = vector.shape_cast %121 : vector<1x1x32xf32> to vector<1x32xf32>
    %c0_88 = arith.constant 0 : index
    %c0_89 = arith.constant 0 : index
    %c0_90 = arith.constant 0 : index
    %123 = vector.load %arg14[%c0_88, %c0_89, %c0_90] : memref<3x1x32xf32, #tpu.memory_space<vmem>>, vector<1x1x32xf32>
    %124 = vector.shape_cast %123 : vector<1x1x32xf32> to vector<1x32xf32>
    %cst_91 = arith.constant dense<0.000000e+00> : vector<16xf32>
    %125 = vector.multi_reduction <add>, %120, %cst_91 [1] : vector<16x32xf32> to vector<16xf32>
    %126 = vector.shape_cast %125 : vector<16xf32> to vector<16x1xf32>
    %cst_92 = arith.constant 3.200000e+01 : f32
    %127 = vector.broadcast %cst_92 : f32 to vector<16x1xf32>
    %128 = arith.divf %126, %127 : vector<16x1xf32>
    %129 = vector.broadcast %128 : vector<16x1xf32> to vector<16x32xf32>
    %130 = arith.subf %120, %129 : vector<16x32xf32>
    %131 = arith.mulf %130, %130 : vector<16x32xf32>
    %cst_93 = arith.constant dense<0.000000e+00> : vector<16xf32>
    %132 = vector.multi_reduction <add>, %131, %cst_93 [1] : vector<16x32xf32> to vector<16xf32>
    %133 = vector.shape_cast %132 : vector<16xf32> to vector<16x1xf32>
    %cst_94 = arith.constant 3.200000e+01 : f32
    %134 = vector.broadcast %cst_94 : f32 to vector<16x1xf32>
    %135 = arith.divf %133, %134 : vector<16x1xf32>
    %136 = vector.broadcast %128 : vector<16x1xf32> to vector<16x32xf32>
    %137 = arith.subf %120, %136 : vector<16x32xf32>
    %cst_95 = arith.constant 9.99999974E-6 : f32
    %138 = vector.broadcast %cst_95 : f32 to vector<16x1xf32>
    %139 = arith.addf %135, %138 : vector<16x1xf32>
    %140 = math.rsqrt %139 : vector<16x1xf32>
    %141 = vector.broadcast %140 : vector<16x1xf32> to vector<16x32xf32>
    %142 = arith.mulf %137, %141 : vector<16x32xf32>
    %143 = vector.broadcast %122 : vector<1x32xf32> to vector<16x32xf32>
    %144 = arith.mulf %142, %143 : vector<16x32xf32>
    %145 = vector.broadcast %124 : vector<1x32xf32> to vector<16x32xf32>
    %146 = arith.addf %144, %145 : vector<16x32xf32>
    %c0_96 = arith.constant 0 : index
    %c0_97 = arith.constant 0 : index
    %c0_98 = arith.constant 0 : index
    %147 = vector.load %arg9[%c0_96, %c0_97, %c0_98] : memref<3x32x64xf32, #tpu.memory_space<vmem>>, vector<1x32x64xf32>
    %148 = vector.shape_cast %147 : vector<1x32x64xf32> to vector<32x64xf32>
    %cst_99 = arith.constant dense<0.000000e+00> : vector<16x64xf32>
    %149 = tpu.matmul %146, %148, %cst_99 {dimension_numbers = #tpu.dot_dimension_numbers<[1], [0], [0], [1], [0, 0, 1, 1], [], []>} : vector<16x32xf32>, vector<32x64xf32>, vector<16x64xf32> -> vector<16x64xf32>
    %c0_100 = arith.constant 0 : index
    %c0_101 = arith.constant 0 : index
    %c0_102 = arith.constant 0 : index
    %150 = vector.load %arg10[%c0_100, %c0_101, %c0_102] : memref<3x1x64xf32, #tpu.memory_space<vmem>>, vector<1x1x64xf32>
    %151 = vector.shape_cast %150 : vector<1x1x64xf32> to vector<1x64xf32>
    %152 = vector.broadcast %151 : vector<1x64xf32> to vector<16x64xf32>
    %153 = arith.addf %149, %152 : vector<16x64xf32>
    %cst_103 = arith.constant 0.000000e+00 : f32
    %154 = vector.broadcast %cst_103 : f32 to vector<16x64xf32>
    %155 = arith.maximumf %153, %154 : vector<16x64xf32>
    %c0_104 = arith.constant 0 : index
    %c0_105 = arith.constant 0 : index
    %c0_106 = arith.constant 0 : index
    %156 = vector.load %arg11[%c0_104, %c0_105, %c0_106] : memref<3x64x32xf32, #tpu.memory_space<vmem>>, vector<1x64x32xf32>
    %157 = vector.shape_cast %156 : vector<1x64x32xf32> to vector<64x32xf32>
    %cst_107 = arith.constant dense<0.000000e+00> : vector<16x32xf32>
    %158 = tpu.matmul %155, %157, %cst_107 {dimension_numbers = #tpu.dot_dimension_numbers<[1], [0], [0], [1], [0, 0, 1, 1], [], []>} : vector<16x64xf32>, vector<64x32xf32>, vector<16x32xf32> -> vector<16x32xf32>
    %c0_108 = arith.constant 0 : index
    %c0_109 = arith.constant 0 : index
    %c0_110 = arith.constant 0 : index
    %159 = vector.load %arg12[%c0_108, %c0_109, %c0_110] : memref<3x1x32xf32, #tpu.memory_space<vmem>>, vector<1x1x32xf32>
    %160 = vector.shape_cast %159 : vector<1x1x32xf32> to vector<1x32xf32>
    %161 = vector.broadcast %160 : vector<1x32xf32> to vector<16x32xf32>
    %162 = arith.addf %158, %161 : vector<16x32xf32>
    %163 = arith.addf %146, %162 : vector<16x32xf32>
    %c0_111 = arith.constant 0 : index
    %c0_112 = arith.constant 0 : index
    %c0_113 = arith.constant 0 : index
    %164 = vector.load %arg15[%c0_111, %c0_112, %c0_113] : memref<3x1x32xf32, #tpu.memory_space<vmem>>, vector<1x1x32xf32>
    %165 = vector.shape_cast %164 : vector<1x1x32xf32> to vector<1x32xf32>
    %c0_114 = arith.constant 0 : index
    %c0_115 = arith.constant 0 : index
    %c0_116 = arith.constant 0 : index
    %166 = vector.load %arg16[%c0_114, %c0_115, %c0_116] : memref<3x1x32xf32, #tpu.memory_space<vmem>>, vector<1x1x32xf32>
    %167 = vector.shape_cast %166 : vector<1x1x32xf32> to vector<1x32xf32>
    %cst_117 = arith.constant dense<0.000000e+00> : vector<16xf32>
    %168 = vector.multi_reduction <add>, %163, %cst_117 [1] : vector<16x32xf32> to vector<16xf32>
    %169 = vector.shape_cast %168 : vector<16xf32> to vector<16x1xf32>
    %cst_118 = arith.constant 3.200000e+01 : f32
    %170 = vector.broadcast %cst_118 : f32 to vector<16x1xf32>
    %171 = arith.divf %169, %170 : vector<16x1xf32>
    %172 = vector.broadcast %171 : vector<16x1xf32> to vector<16x32xf32>
    %173 = arith.subf %163, %172 : vector<16x32xf32>
    %174 = arith.mulf %173, %173 : vector<16x32xf32>
    %cst_119 = arith.constant dense<0.000000e+00> : vector<16xf32>
    %175 = vector.multi_reduction <add>, %174, %cst_119 [1] : vector<16x32xf32> to vector<16xf32>
    %176 = vector.shape_cast %175 : vector<16xf32> to vector<16x1xf32>
    %cst_120 = arith.constant 3.200000e+01 : f32
    %177 = vector.broadcast %cst_120 : f32 to vector<16x1xf32>
    %178 = arith.divf %176, %177 : vector<16x1xf32>
    %179 = vector.broadcast %171 : vector<16x1xf32> to vector<16x32xf32>
    %180 = arith.subf %163, %179 : vector<16x32xf32>
    %cst_121 = arith.constant 9.99999974E-6 : f32
    %181 = vector.broadcast %cst_121 : f32 to vector<16x1xf32>
    %182 = arith.addf %178, %181 : vector<16x1xf32>
    %183 = math.rsqrt %182 : vector<16x1xf32>
    %184 = vector.broadcast %183 : vector<16x1xf32> to vector<16x32xf32>
    %185 = arith.mulf %180, %184 : vector<16x32xf32>
    %186 = vector.broadcast %165 : vector<1x32xf32> to vector<16x32xf32>
    %187 = arith.mulf %185, %186 : vector<16x32xf32>
    %188 = vector.broadcast %167 : vector<1x32xf32> to vector<16x32xf32>
    %189 = arith.addf %187, %188 : vector<16x32xf32>
    %c1_122 = arith.constant 1 : index
    %c0_123 = arith.constant 0 : index
    %c0_124 = arith.constant 0 : index
    %190 = vector.load %arg5[%c1_122, %c0_123, %c0_124] : memref<3x32x32xf32, #tpu.memory_space<vmem>>, vector<1x32x32xf32>
    %191 = vector.shape_cast %190 : vector<1x32x32xf32> to vector<32x32xf32>
    %cst_125 = arith.constant dense<0.000000e+00> : vector<16x32xf32>
    %192 = tpu.matmul %189, %191, %cst_125 {dimension_numbers = #tpu.dot_dimension_numbers<[1], [0], [0], [1], [0, 0, 1, 1], [], []>} : vector<16x32xf32>, vector<32x32xf32>, vector<16x32xf32> -> vector<16x32xf32>
    %c1_126 = arith.constant 1 : index
    %c0_127 = arith.constant 0 : index
    %c0_128 = arith.constant 0 : index
    %193 = vector.load %arg6[%c1_126, %c0_127, %c0_128] : memref<3x1x32xf32, #tpu.memory_space<vmem>>, vector<1x1x32xf32>
    %194 = vector.shape_cast %193 : vector<1x1x32xf32> to vector<1x32xf32>
    %195 = vector.broadcast %194 : vector<1x32xf32> to vector<16x32xf32>
    %196 = arith.addf %192, %195 : vector<16x32xf32>
    %197 = tpu.transpose %196, [1, 0] : vector<16x32xf32> -> vector<32x16xf32>
    %c1_129 = arith.constant 1 : index
    %c0_130 = arith.constant 0 : index
    %c0_131 = arith.constant 0 : index
    %c0_132 = arith.constant 0 : index
    %198 = vector.load %arg3[%c1_129, %c0_130, %c0_131, %c0_132] : memref<3x4x32x8xf32, #tpu.memory_space<vmem>>, vector<1x1x32x8xf32>
    %199 = vector.shape_cast %198 : vector<1x1x32x8xf32> to vector<32x8xf32>
    %cst_133 = arith.constant dense<0.000000e+00> : vector<16x8xf32>
    %200 = tpu.matmul %189, %199, %cst_133 {dimension_numbers = #tpu.dot_dimension_numbers<[1], [0], [0], [1], [0, 0, 1, 1], [], []>} : vector<16x32xf32>, vector<32x8xf32>, vector<16x8xf32> -> vector<16x8xf32>
    %c1_134 = arith.constant 1 : index
    %c0_135 = arith.constant 0 : index
    %c0_136 = arith.constant 0 : index
    %c0_137 = arith.constant 0 : index
    %201 = vector.load %arg4[%c1_134, %c0_135, %c0_136, %c0_137] : memref<3x4x1x8xf32, #tpu.memory_space<vmem>>, vector<1x1x1x8xf32>
    %202 = vector.shape_cast %201 : vector<1x1x1x8xf32> to vector<1x8xf32>
    %203 = vector.broadcast %202 : vector<1x8xf32> to vector<16x8xf32>
    %204 = arith.addf %200, %203 : vector<16x8xf32>
    %205 = vector.extract_strided_slice %197 {offsets = [0, 0], sizes = [8, 16], strides = [1, 1]} : vector<32x16xf32> to vector<8x16xf32>
    %cst_138 = arith.constant dense<0.000000e+00> : vector<16x16xf32>
    %206 = tpu.matmul %204, %205, %cst_138 {dimension_numbers = #tpu.dot_dimension_numbers<[1], [0], [0], [1], [0, 0, 1, 1], [], []>} : vector<16x8xf32>, vector<8x16xf32>, vector<16x16xf32> -> vector<16x16xf32>
    %207 = arith.addf %206, %8 : vector<16x16xf32>
    %cst_139 = arith.constant dense<0xFF800000> : vector<16xf32>
    %208 = vector.multi_reduction <maximumf>, %207, %cst_139 [1] : vector<16x16xf32> to vector<16xf32>
    %209 = vector.shape_cast %208 : vector<16xf32> to vector<16x1xf32>
    %210 = vector.broadcast %209 : vector<16x1xf32> to vector<16x16xf32>
    %211 = arith.subf %207, %210 : vector<16x16xf32>
    %212 = math.exp %211 : vector<16x16xf32>
    %cst_140 = arith.constant dense<0.000000e+00> : vector<16xf32>
    %213 = vector.multi_reduction <add>, %212, %cst_140 [1] : vector<16x16xf32> to vector<16xf32>
    %214 = vector.shape_cast %213 : vector<16xf32> to vector<16x1xf32>
    %c1_141 = arith.constant 1 : index
    %c0_142 = arith.constant 0 : index
    %c0_143 = arith.constant 0 : index
    %c0_144 = arith.constant 0 : index
    %215 = vector.load %arg7[%c1_141, %c0_142, %c0_143, %c0_144] : memref<3x4x32x32xf32, #tpu.memory_space<vmem>>, vector<1x1x32x32xf32>
    %216 = vector.shape_cast %215 : vector<1x1x32x32xf32> to vector<32x32xf32>
    %cst_145 = arith.constant dense<0.000000e+00> : vector<16x32xf32>
    %217 = tpu.matmul %189, %216, %cst_145 {dimension_numbers = #tpu.dot_dimension_numbers<[1], [0], [0], [1], [0, 0, 1, 1], [], []>} : vector<16x32xf32>, vector<32x32xf32>, vector<16x32xf32> -> vector<16x32xf32>
    %cst_146 = arith.constant dense<0.000000e+00> : vector<16x32xf32>
    %218 = tpu.matmul %212, %217, %cst_146 {dimension_numbers = #tpu.dot_dimension_numbers<[1], [0], [0], [1], [0, 0, 1, 1], [], []>} : vector<16x16xf32>, vector<16x32xf32>, vector<16x32xf32> -> vector<16x32xf32>
    %219 = tpu.reciprocal %214 {approx = true} : vector<16x1xf32> -> vector<16x1xf32>
    %220 = vector.broadcast %219 : vector<16x1xf32> to vector<16x32xf32>
    %221 = arith.mulf %218, %220 : vector<16x32xf32>
    %c1_147 = arith.constant 1 : index
    %c1_148 = arith.constant 1 : index
    %c0_149 = arith.constant 0 : index
    %c0_150 = arith.constant 0 : index
    %222 = vector.load %arg3[%c1_147, %c1_148, %c0_149, %c0_150] : memref<3x4x32x8xf32, #tpu.memory_space<vmem>>, vector<1x1x32x8xf32>
    %223 = vector.shape_cast %222 : vector<1x1x32x8xf32> to vector<32x8xf32>
    %cst_151 = arith.constant dense<0.000000e+00> : vector<16x8xf32>
    %224 = tpu.matmul %189, %223, %cst_151 {dimension_numbers = #tpu.dot_dimension_numbers<[1], [0], [0], [1], [0, 0, 1, 1], [], []>} : vector<16x32xf32>, vector<32x8xf32>, vector<16x8xf32> -> vector<16x8xf32>
    %c1_152 = arith.constant 1 : index
    %c1_153 = arith.constant 1 : index
    %c0_154 = arith.constant 0 : index
    %c0_155 = arith.constant 0 : index
    %225 = vector.load %arg4[%c1_152, %c1_153, %c0_154, %c0_155] : memref<3x4x1x8xf32, #tpu.memory_space<vmem>>, vector<1x1x1x8xf32>
    %226 = vector.shape_cast %225 : vector<1x1x1x8xf32> to vector<1x8xf32>
    %227 = vector.broadcast %226 : vector<1x8xf32> to vector<16x8xf32>
    %228 = arith.addf %224, %227 : vector<16x8xf32>
    %229 = vector.extract_strided_slice %197 {offsets = [8, 0], sizes = [8, 16], strides = [1, 1]} : vector<32x16xf32> to vector<8x16xf32>
    %cst_156 = arith.constant dense<0.000000e+00> : vector<16x16xf32>
    %230 = tpu.matmul %228, %229, %cst_156 {dimension_numbers = #tpu.dot_dimension_numbers<[1], [0], [0], [1], [0, 0, 1, 1], [], []>} : vector<16x8xf32>, vector<8x16xf32>, vector<16x16xf32> -> vector<16x16xf32>
    %231 = arith.addf %230, %8 : vector<16x16xf32>
    %cst_157 = arith.constant dense<0xFF800000> : vector<16xf32>
    %232 = vector.multi_reduction <maximumf>, %231, %cst_157 [1] : vector<16x16xf32> to vector<16xf32>
    %233 = vector.shape_cast %232 : vector<16xf32> to vector<16x1xf32>
    %234 = vector.broadcast %233 : vector<16x1xf32> to vector<16x16xf32>
    %235 = arith.subf %231, %234 : vector<16x16xf32>
    %236 = math.exp %235 : vector<16x16xf32>
    %cst_158 = arith.constant dense<0.000000e+00> : vector<16xf32>
    %237 = vector.multi_reduction <add>, %236, %cst_158 [1] : vector<16x16xf32> to vector<16xf32>
    %238 = vector.shape_cast %237 : vector<16xf32> to vector<16x1xf32>
    %c1_159 = arith.constant 1 : index
    %c1_160 = arith.constant 1 : index
    %c0_161 = arith.constant 0 : index
    %c0_162 = arith.constant 0 : index
    %239 = vector.load %arg7[%c1_159, %c1_160, %c0_161, %c0_162] : memref<3x4x32x32xf32, #tpu.memory_space<vmem>>, vector<1x1x32x32xf32>
    %240 = vector.shape_cast %239 : vector<1x1x32x32xf32> to vector<32x32xf32>
    %cst_163 = arith.constant dense<0.000000e+00> : vector<16x32xf32>
    %241 = tpu.matmul %189, %240, %cst_163 {dimension_numbers = #tpu.dot_dimension_numbers<[1], [0], [0], [1], [0, 0, 1, 1], [], []>} : vector<16x32xf32>, vector<32x32xf32>, vector<16x32xf32> -> vector<16x32xf32>
    %cst_164 = arith.constant dense<0.000000e+00> : vector<16x32xf32>
    %242 = tpu.matmul %236, %241, %cst_164 {dimension_numbers = #tpu.dot_dimension_numbers<[1], [0], [0], [1], [0, 0, 1, 1], [], []>} : vector<16x16xf32>, vector<16x32xf32>, vector<16x32xf32> -> vector<16x32xf32>
    %243 = tpu.reciprocal %238 {approx = true} : vector<16x1xf32> -> vector<16x1xf32>
    %244 = vector.broadcast %243 : vector<16x1xf32> to vector<16x32xf32>
    %245 = arith.mulf %242, %244 : vector<16x32xf32>
    %246 = arith.addf %221, %245 : vector<16x32xf32>
    %c1_165 = arith.constant 1 : index
    %c2_166 = arith.constant 2 : index
    %c0_167 = arith.constant 0 : index
    %c0_168 = arith.constant 0 : index
    %247 = vector.load %arg3[%c1_165, %c2_166, %c0_167, %c0_168] : memref<3x4x32x8xf32, #tpu.memory_space<vmem>>, vector<1x1x32x8xf32>
    %248 = vector.shape_cast %247 : vector<1x1x32x8xf32> to vector<32x8xf32>
    %cst_169 = arith.constant dense<0.000000e+00> : vector<16x8xf32>
    %249 = tpu.matmul %189, %248, %cst_169 {dimension_numbers = #tpu.dot_dimension_numbers<[1], [0], [0], [1], [0, 0, 1, 1], [], []>} : vector<16x32xf32>, vector<32x8xf32>, vector<16x8xf32> -> vector<16x8xf32>
    %c1_170 = arith.constant 1 : index
    %c2_171 = arith.constant 2 : index
    %c0_172 = arith.constant 0 : index
    %c0_173 = arith.constant 0 : index
    %250 = vector.load %arg4[%c1_170, %c2_171, %c0_172, %c0_173] : memref<3x4x1x8xf32, #tpu.memory_space<vmem>>, vector<1x1x1x8xf32>
    %251 = vector.shape_cast %250 : vector<1x1x1x8xf32> to vector<1x8xf32>
    %252 = vector.broadcast %251 : vector<1x8xf32> to vector<16x8xf32>
    %253 = arith.addf %249, %252 : vector<16x8xf32>
    %254 = vector.extract_strided_slice %197 {offsets = [16, 0], sizes = [8, 16], strides = [1, 1]} : vector<32x16xf32> to vector<8x16xf32>
    %cst_174 = arith.constant dense<0.000000e+00> : vector<16x16xf32>
    %255 = tpu.matmul %253, %254, %cst_174 {dimension_numbers = #tpu.dot_dimension_numbers<[1], [0], [0], [1], [0, 0, 1, 1], [], []>} : vector<16x8xf32>, vector<8x16xf32>, vector<16x16xf32> -> vector<16x16xf32>
    %256 = arith.addf %255, %8 : vector<16x16xf32>
    %cst_175 = arith.constant dense<0xFF800000> : vector<16xf32>
    %257 = vector.multi_reduction <maximumf>, %256, %cst_175 [1] : vector<16x16xf32> to vector<16xf32>
    %258 = vector.shape_cast %257 : vector<16xf32> to vector<16x1xf32>
    %259 = vector.broadcast %258 : vector<16x1xf32> to vector<16x16xf32>
    %260 = arith.subf %256, %259 : vector<16x16xf32>
    %261 = math.exp %260 : vector<16x16xf32>
    %cst_176 = arith.constant dense<0.000000e+00> : vector<16xf32>
    %262 = vector.multi_reduction <add>, %261, %cst_176 [1] : vector<16x16xf32> to vector<16xf32>
    %263 = vector.shape_cast %262 : vector<16xf32> to vector<16x1xf32>
    %c1_177 = arith.constant 1 : index
    %c2_178 = arith.constant 2 : index
    %c0_179 = arith.constant 0 : index
    %c0_180 = arith.constant 0 : index
    %264 = vector.load %arg7[%c1_177, %c2_178, %c0_179, %c0_180] : memref<3x4x32x32xf32, #tpu.memory_space<vmem>>, vector<1x1x32x32xf32>
    %265 = vector.shape_cast %264 : vector<1x1x32x32xf32> to vector<32x32xf32>
    %cst_181 = arith.constant dense<0.000000e+00> : vector<16x32xf32>
    %266 = tpu.matmul %189, %265, %cst_181 {dimension_numbers = #tpu.dot_dimension_numbers<[1], [0], [0], [1], [0, 0, 1, 1], [], []>} : vector<16x32xf32>, vector<32x32xf32>, vector<16x32xf32> -> vector<16x32xf32>
    %cst_182 = arith.constant dense<0.000000e+00> : vector<16x32xf32>
    %267 = tpu.matmul %261, %266, %cst_182 {dimension_numbers = #tpu.dot_dimension_numbers<[1], [0], [0], [1], [0, 0, 1, 1], [], []>} : vector<16x16xf32>, vector<16x32xf32>, vector<16x32xf32> -> vector<16x32xf32>
    %268 = tpu.reciprocal %263 {approx = true} : vector<16x1xf32> -> vector<16x1xf32>
    %269 = vector.broadcast %268 : vector<16x1xf32> to vector<16x32xf32>
    %270 = arith.mulf %267, %269 : vector<16x32xf32>
    %271 = arith.addf %246, %270 : vector<16x32xf32>
    %c1_183 = arith.constant 1 : index
    %c3_184 = arith.constant 3 : index
    %c0_185 = arith.constant 0 : index
    %c0_186 = arith.constant 0 : index
    %272 = vector.load %arg3[%c1_183, %c3_184, %c0_185, %c0_186] : memref<3x4x32x8xf32, #tpu.memory_space<vmem>>, vector<1x1x32x8xf32>
    %273 = vector.shape_cast %272 : vector<1x1x32x8xf32> to vector<32x8xf32>
    %cst_187 = arith.constant dense<0.000000e+00> : vector<16x8xf32>
    %274 = tpu.matmul %189, %273, %cst_187 {dimension_numbers = #tpu.dot_dimension_numbers<[1], [0], [0], [1], [0, 0, 1, 1], [], []>} : vector<16x32xf32>, vector<32x8xf32>, vector<16x8xf32> -> vector<16x8xf32>
    %c1_188 = arith.constant 1 : index
    %c3_189 = arith.constant 3 : index
    %c0_190 = arith.constant 0 : index
    %c0_191 = arith.constant 0 : index
    %275 = vector.load %arg4[%c1_188, %c3_189, %c0_190, %c0_191] : memref<3x4x1x8xf32, #tpu.memory_space<vmem>>, vector<1x1x1x8xf32>
    %276 = vector.shape_cast %275 : vector<1x1x1x8xf32> to vector<1x8xf32>
    %277 = vector.broadcast %276 : vector<1x8xf32> to vector<16x8xf32>
    %278 = arith.addf %274, %277 : vector<16x8xf32>
    %279 = vector.extract_strided_slice %197 {offsets = [24, 0], sizes = [8, 16], strides = [1, 1]} : vector<32x16xf32> to vector<8x16xf32>
    %cst_192 = arith.constant dense<0.000000e+00> : vector<16x16xf32>
    %280 = tpu.matmul %278, %279, %cst_192 {dimension_numbers = #tpu.dot_dimension_numbers<[1], [0], [0], [1], [0, 0, 1, 1], [], []>} : vector<16x8xf32>, vector<8x16xf32>, vector<16x16xf32> -> vector<16x16xf32>
    %281 = arith.addf %280, %8 : vector<16x16xf32>
    %cst_193 = arith.constant dense<0xFF800000> : vector<16xf32>
    %282 = vector.multi_reduction <maximumf>, %281, %cst_193 [1] : vector<16x16xf32> to vector<16xf32>
    %283 = vector.shape_cast %282 : vector<16xf32> to vector<16x1xf32>
    %284 = vector.broadcast %283 : vector<16x1xf32> to vector<16x16xf32>
    %285 = arith.subf %281, %284 : vector<16x16xf32>
    %286 = math.exp %285 : vector<16x16xf32>
    %cst_194 = arith.constant dense<0.000000e+00> : vector<16xf32>
    %287 = vector.multi_reduction <add>, %286, %cst_194 [1] : vector<16x16xf32> to vector<16xf32>
    %288 = vector.shape_cast %287 : vector<16xf32> to vector<16x1xf32>
    %c1_195 = arith.constant 1 : index
    %c3_196 = arith.constant 3 : index
    %c0_197 = arith.constant 0 : index
    %c0_198 = arith.constant 0 : index
    %289 = vector.load %arg7[%c1_195, %c3_196, %c0_197, %c0_198] : memref<3x4x32x32xf32, #tpu.memory_space<vmem>>, vector<1x1x32x32xf32>
    %290 = vector.shape_cast %289 : vector<1x1x32x32xf32> to vector<32x32xf32>
    %cst_199 = arith.constant dense<0.000000e+00> : vector<16x32xf32>
    %291 = tpu.matmul %189, %290, %cst_199 {dimension_numbers = #tpu.dot_dimension_numbers<[1], [0], [0], [1], [0, 0, 1, 1], [], []>} : vector<16x32xf32>, vector<32x32xf32>, vector<16x32xf32> -> vector<16x32xf32>
    %cst_200 = arith.constant dense<0.000000e+00> : vector<16x32xf32>
    %292 = tpu.matmul %286, %291, %cst_200 {dimension_numbers = #tpu.dot_dimension_numbers<[1], [0], [0], [1], [0, 0, 1, 1], [], []>} : vector<16x16xf32>, vector<16x32xf32>, vector<16x32xf32> -> vector<16x32xf32>
    %293 = tpu.reciprocal %288 {approx = true} : vector<16x1xf32> -> vector<16x1xf32>
    %294 = vector.broadcast %293 : vector<16x1xf32> to vector<16x32xf32>
    %295 = arith.mulf %292, %294 : vector<16x32xf32>
    %296 = arith.addf %271, %295 : vector<16x32xf32>
    %c1_201 = arith.constant 1 : index
    %c0_202 = arith.constant 0 : index
    %c0_203 = arith.constant 0 : index
    %297 = vector.load %arg8[%c1_201, %c0_202, %c0_203] : memref<3x1x32xf32, #tpu.memory_space<vmem>>, vector<1x1x32xf32>
    %298 = vector.shape_cast %297 : vector<1x1x32xf32> to vector<1x32xf32>
    %299 = vector.broadcast %298 : vector<1x32xf32> to vector<16x32xf32>
    %300 = arith.addf %296, %299 : vector<16x32xf32>
    %301 = arith.addf %189, %300 : vector<16x32xf32>
    %c1_204 = arith.constant 1 : index
    %c0_205 = arith.constant 0 : index
    %c0_206 = arith.constant 0 : index
    %302 = vector.load %arg13[%c1_204, %c0_205, %c0_206] : memref<3x1x32xf32, #tpu.memory_space<vmem>>, vector<1x1x32xf32>
    %303 = vector.shape_cast %302 : vector<1x1x32xf32> to vector<1x32xf32>
    %c1_207 = arith.constant 1 : index
    %c0_208 = arith.constant 0 : index
    %c0_209 = arith.constant 0 : index
    %304 = vector.load %arg14[%c1_207, %c0_208, %c0_209] : memref<3x1x32xf32, #tpu.memory_space<vmem>>, vector<1x1x32xf32>
    %305 = vector.shape_cast %304 : vector<1x1x32xf32> to vector<1x32xf32>
    %cst_210 = arith.constant dense<0.000000e+00> : vector<16xf32>
    %306 = vector.multi_reduction <add>, %301, %cst_210 [1] : vector<16x32xf32> to vector<16xf32>
    %307 = vector.shape_cast %306 : vector<16xf32> to vector<16x1xf32>
    %cst_211 = arith.constant 3.200000e+01 : f32
    %308 = vector.broadcast %cst_211 : f32 to vector<16x1xf32>
    %309 = arith.divf %307, %308 : vector<16x1xf32>
    %310 = vector.broadcast %309 : vector<16x1xf32> to vector<16x32xf32>
    %311 = arith.subf %301, %310 : vector<16x32xf32>
    %312 = arith.mulf %311, %311 : vector<16x32xf32>
    %cst_212 = arith.constant dense<0.000000e+00> : vector<16xf32>
    %313 = vector.multi_reduction <add>, %312, %cst_212 [1] : vector<16x32xf32> to vector<16xf32>
    %314 = vector.shape_cast %313 : vector<16xf32> to vector<16x1xf32>
    %cst_213 = arith.constant 3.200000e+01 : f32
    %315 = vector.broadcast %cst_213 : f32 to vector<16x1xf32>
    %316 = arith.divf %314, %315 : vector<16x1xf32>
    %317 = vector.broadcast %309 : vector<16x1xf32> to vector<16x32xf32>
    %318 = arith.subf %301, %317 : vector<16x32xf32>
    %cst_214 = arith.constant 9.99999974E-6 : f32
    %319 = vector.broadcast %cst_214 : f32 to vector<16x1xf32>
    %320 = arith.addf %316, %319 : vector<16x1xf32>
    %321 = math.rsqrt %320 : vector<16x1xf32>
    %322 = vector.broadcast %321 : vector<16x1xf32> to vector<16x32xf32>
    %323 = arith.mulf %318, %322 : vector<16x32xf32>
    %324 = vector.broadcast %303 : vector<1x32xf32> to vector<16x32xf32>
    %325 = arith.mulf %323, %324 : vector<16x32xf32>
    %326 = vector.broadcast %305 : vector<1x32xf32> to vector<16x32xf32>
    %327 = arith.addf %325, %326 : vector<16x32xf32>
    %c1_215 = arith.constant 1 : index
    %c0_216 = arith.constant 0 : index
    %c0_217 = arith.constant 0 : index
    %328 = vector.load %arg9[%c1_215, %c0_216, %c0_217] : memref<3x32x64xf32, #tpu.memory_space<vmem>>, vector<1x32x64xf32>
    %329 = vector.shape_cast %328 : vector<1x32x64xf32> to vector<32x64xf32>
    %cst_218 = arith.constant dense<0.000000e+00> : vector<16x64xf32>
    %330 = tpu.matmul %327, %329, %cst_218 {dimension_numbers = #tpu.dot_dimension_numbers<[1], [0], [0], [1], [0, 0, 1, 1], [], []>} : vector<16x32xf32>, vector<32x64xf32>, vector<16x64xf32> -> vector<16x64xf32>
    %c1_219 = arith.constant 1 : index
    %c0_220 = arith.constant 0 : index
    %c0_221 = arith.constant 0 : index
    %331 = vector.load %arg10[%c1_219, %c0_220, %c0_221] : memref<3x1x64xf32, #tpu.memory_space<vmem>>, vector<1x1x64xf32>
    %332 = vector.shape_cast %331 : vector<1x1x64xf32> to vector<1x64xf32>
    %333 = vector.broadcast %332 : vector<1x64xf32> to vector<16x64xf32>
    %334 = arith.addf %330, %333 : vector<16x64xf32>
    %cst_222 = arith.constant 0.000000e+00 : f32
    %335 = vector.broadcast %cst_222 : f32 to vector<16x64xf32>
    %336 = arith.maximumf %334, %335 : vector<16x64xf32>
    %c1_223 = arith.constant 1 : index
    %c0_224 = arith.constant 0 : index
    %c0_225 = arith.constant 0 : index
    %337 = vector.load %arg11[%c1_223, %c0_224, %c0_225] : memref<3x64x32xf32, #tpu.memory_space<vmem>>, vector<1x64x32xf32>
    %338 = vector.shape_cast %337 : vector<1x64x32xf32> to vector<64x32xf32>
    %cst_226 = arith.constant dense<0.000000e+00> : vector<16x32xf32>
    %339 = tpu.matmul %336, %338, %cst_226 {dimension_numbers = #tpu.dot_dimension_numbers<[1], [0], [0], [1], [0, 0, 1, 1], [], []>} : vector<16x64xf32>, vector<64x32xf32>, vector<16x32xf32> -> vector<16x32xf32>
    %c1_227 = arith.constant 1 : index
    %c0_228 = arith.constant 0 : index
    %c0_229 = arith.constant 0 : index
    %340 = vector.load %arg12[%c1_227, %c0_228, %c0_229] : memref<3x1x32xf32, #tpu.memory_space<vmem>>, vector<1x1x32xf32>
    %341 = vector.shape_cast %340 : vector<1x1x32xf32> to vector<1x32xf32>
    %342 = vector.broadcast %341 : vector<1x32xf32> to vector<16x32xf32>
    %343 = arith.addf %339, %342 : vector<16x32xf32>
    %344 = arith.addf %327, %343 : vector<16x32xf32>
    %c1_230 = arith.constant 1 : index
    %c0_231 = arith.constant 0 : index
    %c0_232 = arith.constant 0 : index
    %345 = vector.load %arg15[%c1_230, %c0_231, %c0_232] : memref<3x1x32xf32, #tpu.memory_space<vmem>>, vector<1x1x32xf32>
    %346 = vector.shape_cast %345 : vector<1x1x32xf32> to vector<1x32xf32>
    %c1_233 = arith.constant 1 : index
    %c0_234 = arith.constant 0 : index
    %c0_235 = arith.constant 0 : index
    %347 = vector.load %arg16[%c1_233, %c0_234, %c0_235] : memref<3x1x32xf32, #tpu.memory_space<vmem>>, vector<1x1x32xf32>
    %348 = vector.shape_cast %347 : vector<1x1x32xf32> to vector<1x32xf32>
    %cst_236 = arith.constant dense<0.000000e+00> : vector<16xf32>
    %349 = vector.multi_reduction <add>, %344, %cst_236 [1] : vector<16x32xf32> to vector<16xf32>
    %350 = vector.shape_cast %349 : vector<16xf32> to vector<16x1xf32>
    %cst_237 = arith.constant 3.200000e+01 : f32
    %351 = vector.broadcast %cst_237 : f32 to vector<16x1xf32>
    %352 = arith.divf %350, %351 : vector<16x1xf32>
    %353 = vector.broadcast %352 : vector<16x1xf32> to vector<16x32xf32>
    %354 = arith.subf %344, %353 : vector<16x32xf32>
    %355 = arith.mulf %354, %354 : vector<16x32xf32>
    %cst_238 = arith.constant dense<0.000000e+00> : vector<16xf32>
    %356 = vector.multi_reduction <add>, %355, %cst_238 [1] : vector<16x32xf32> to vector<16xf32>
    %357 = vector.shape_cast %356 : vector<16xf32> to vector<16x1xf32>
    %cst_239 = arith.constant 3.200000e+01 : f32
    %358 = vector.broadcast %cst_239 : f32 to vector<16x1xf32>
    %359 = arith.divf %357, %358 : vector<16x1xf32>
    %360 = vector.broadcast %352 : vector<16x1xf32> to vector<16x32xf32>
    %361 = arith.subf %344, %360 : vector<16x32xf32>
    %cst_240 = arith.constant 9.99999974E-6 : f32
    %362 = vector.broadcast %cst_240 : f32 to vector<16x1xf32>
    %363 = arith.addf %359, %362 : vector<16x1xf32>
    %364 = math.rsqrt %363 : vector<16x1xf32>
    %365 = vector.broadcast %364 : vector<16x1xf32> to vector<16x32xf32>
    %366 = arith.mulf %361, %365 : vector<16x32xf32>
    %367 = vector.broadcast %346 : vector<1x32xf32> to vector<16x32xf32>
    %368 = arith.mulf %366, %367 : vector<16x32xf32>
    %369 = vector.broadcast %348 : vector<1x32xf32> to vector<16x32xf32>
    %370 = arith.addf %368, %369 : vector<16x32xf32>
    %c0_241 = arith.constant 0 : index
    %c0_242 = arith.constant 0 : index
    %c0_243 = arith.constant 0 : index
    %371 = vector.load %arg17[%c0_241, %c0_242, %c0_243] : memref<1x32x32xf32, #tpu.memory_space<vmem>>, vector<1x32x32xf32>
    %372 = vector.shape_cast %371 : vector<1x32x32xf32> to vector<32x32xf32>
    %cst_244 = arith.constant dense<0.000000e+00> : vector<16x32xf32>
    %373 = tpu.matmul %370, %372, %cst_244 {dimension_numbers = #tpu.dot_dimension_numbers<[1], [0], [0], [1], [0, 0, 1, 1], [], []>} : vector<16x32xf32>, vector<32x32xf32>, vector<16x32xf32> -> vector<16x32xf32>
    %c0_245 = arith.constant 0 : index
    %c0_246 = arith.constant 0 : index
    %c0_247 = arith.constant 0 : index
    %374 = vector.load %arg18[%c0_245, %c0_246, %c0_247] : memref<1x32x32xf32, #tpu.memory_space<vmem>>, vector<1x32x32xf32>
    %375 = vector.shape_cast %374 : vector<1x32x32xf32> to vector<32x32xf32>
    %cst_248 = arith.constant dense<0.000000e+00> : vector<16x32xf32>
    %376 = tpu.matmul %189, %375, %cst_248 {dimension_numbers = #tpu.dot_dimension_numbers<[1], [0], [0], [1], [0, 0, 1, 1], [], []>} : vector<16x32xf32>, vector<32x32xf32>, vector<16x32xf32> -> vector<16x32xf32>
    %377 = arith.addf %373, %376 : vector<16x32xf32>
    %c0_249 = arith.constant 0 : index
    %c0_250 = arith.constant 0 : index
    %c0_251 = arith.constant 0 : index
    %378 = vector.load %arg19[%c0_249, %c0_250, %c0_251] : memref<1x1x32xf32, #tpu.memory_space<vmem>>, vector<1x1x32xf32>
    %379 = vector.shape_cast %378 : vector<1x1x32xf32> to vector<1x32xf32>
    %380 = vector.broadcast %379 : vector<1x32xf32> to vector<16x32xf32>
    %381 = arith.addf %377, %380 : vector<16x32xf32>
    %c2_252 = arith.constant 2 : index
    %c0_253 = arith.constant 0 : index
    %c0_254 = arith.constant 0 : index
    %382 = vector.load %arg5[%c2_252, %c0_253, %c0_254] : memref<3x32x32xf32, #tpu.memory_space<vmem>>, vector<1x32x32xf32>
    %383 = vector.shape_cast %382 : vector<1x32x32xf32> to vector<32x32xf32>
    %cst_255 = arith.constant dense<0.000000e+00> : vector<16x32xf32>
    %384 = tpu.matmul %381, %383, %cst_255 {dimension_numbers = #tpu.dot_dimension_numbers<[1], [0], [0], [1], [0, 0, 1, 1], [], []>} : vector<16x32xf32>, vector<32x32xf32>, vector<16x32xf32> -> vector<16x32xf32>
    %c2_256 = arith.constant 2 : index
    %c0_257 = arith.constant 0 : index
    %c0_258 = arith.constant 0 : index
    %385 = vector.load %arg6[%c2_256, %c0_257, %c0_258] : memref<3x1x32xf32, #tpu.memory_space<vmem>>, vector<1x1x32xf32>
    %386 = vector.shape_cast %385 : vector<1x1x32xf32> to vector<1x32xf32>
    %387 = vector.broadcast %386 : vector<1x32xf32> to vector<16x32xf32>
    %388 = arith.addf %384, %387 : vector<16x32xf32>
    %389 = tpu.transpose %388, [1, 0] : vector<16x32xf32> -> vector<32x16xf32>
    %c2_259 = arith.constant 2 : index
    %c0_260 = arith.constant 0 : index
    %c0_261 = arith.constant 0 : index
    %c0_262 = arith.constant 0 : index
    %390 = vector.load %arg3[%c2_259, %c0_260, %c0_261, %c0_262] : memref<3x4x32x8xf32, #tpu.memory_space<vmem>>, vector<1x1x32x8xf32>
    %391 = vector.shape_cast %390 : vector<1x1x32x8xf32> to vector<32x8xf32>
    %cst_263 = arith.constant dense<0.000000e+00> : vector<16x8xf32>
    %392 = tpu.matmul %381, %391, %cst_263 {dimension_numbers = #tpu.dot_dimension_numbers<[1], [0], [0], [1], [0, 0, 1, 1], [], []>} : vector<16x32xf32>, vector<32x8xf32>, vector<16x8xf32> -> vector<16x8xf32>
    %c2_264 = arith.constant 2 : index
    %c0_265 = arith.constant 0 : index
    %c0_266 = arith.constant 0 : index
    %c0_267 = arith.constant 0 : index
    %393 = vector.load %arg4[%c2_264, %c0_265, %c0_266, %c0_267] : memref<3x4x1x8xf32, #tpu.memory_space<vmem>>, vector<1x1x1x8xf32>
    %394 = vector.shape_cast %393 : vector<1x1x1x8xf32> to vector<1x8xf32>
    %395 = vector.broadcast %394 : vector<1x8xf32> to vector<16x8xf32>
    %396 = arith.addf %392, %395 : vector<16x8xf32>
    %397 = vector.extract_strided_slice %389 {offsets = [0, 0], sizes = [8, 16], strides = [1, 1]} : vector<32x16xf32> to vector<8x16xf32>
    %cst_268 = arith.constant dense<0.000000e+00> : vector<16x16xf32>
    %398 = tpu.matmul %396, %397, %cst_268 {dimension_numbers = #tpu.dot_dimension_numbers<[1], [0], [0], [1], [0, 0, 1, 1], [], []>} : vector<16x8xf32>, vector<8x16xf32>, vector<16x16xf32> -> vector<16x16xf32>
    %399 = arith.addf %398, %8 : vector<16x16xf32>
    %cst_269 = arith.constant dense<0xFF800000> : vector<16xf32>
    %400 = vector.multi_reduction <maximumf>, %399, %cst_269 [1] : vector<16x16xf32> to vector<16xf32>
    %401 = vector.shape_cast %400 : vector<16xf32> to vector<16x1xf32>
    %402 = vector.broadcast %401 : vector<16x1xf32> to vector<16x16xf32>
    %403 = arith.subf %399, %402 : vector<16x16xf32>
    %404 = math.exp %403 : vector<16x16xf32>
    %cst_270 = arith.constant dense<0.000000e+00> : vector<16xf32>
    %405 = vector.multi_reduction <add>, %404, %cst_270 [1] : vector<16x16xf32> to vector<16xf32>
    %406 = vector.shape_cast %405 : vector<16xf32> to vector<16x1xf32>
    %c2_271 = arith.constant 2 : index
    %c0_272 = arith.constant 0 : index
    %c0_273 = arith.constant 0 : index
    %c0_274 = arith.constant 0 : index
    %407 = vector.load %arg7[%c2_271, %c0_272, %c0_273, %c0_274] : memref<3x4x32x32xf32, #tpu.memory_space<vmem>>, vector<1x1x32x32xf32>
    %408 = vector.shape_cast %407 : vector<1x1x32x32xf32> to vector<32x32xf32>
    %cst_275 = arith.constant dense<0.000000e+00> : vector<16x32xf32>
    %409 = tpu.matmul %381, %408, %cst_275 {dimension_numbers = #tpu.dot_dimension_numbers<[1], [0], [0], [1], [0, 0, 1, 1], [], []>} : vector<16x32xf32>, vector<32x32xf32>, vector<16x32xf32> -> vector<16x32xf32>
    %cst_276 = arith.constant dense<0.000000e+00> : vector<16x32xf32>
    %410 = tpu.matmul %404, %409, %cst_276 {dimension_numbers = #tpu.dot_dimension_numbers<[1], [0], [0], [1], [0, 0, 1, 1], [], []>} : vector<16x16xf32>, vector<16x32xf32>, vector<16x32xf32> -> vector<16x32xf32>
    %411 = tpu.reciprocal %406 {approx = true} : vector<16x1xf32> -> vector<16x1xf32>
    %412 = vector.broadcast %411 : vector<16x1xf32> to vector<16x32xf32>
    %413 = arith.mulf %410, %412 : vector<16x32xf32>
    %c2_277 = arith.constant 2 : index
    %c1_278 = arith.constant 1 : index
    %c0_279 = arith.constant 0 : index
    %c0_280 = arith.constant 0 : index
    %414 = vector.load %arg3[%c2_277, %c1_278, %c0_279, %c0_280] : memref<3x4x32x8xf32, #tpu.memory_space<vmem>>, vector<1x1x32x8xf32>
    %415 = vector.shape_cast %414 : vector<1x1x32x8xf32> to vector<32x8xf32>
    %cst_281 = arith.constant dense<0.000000e+00> : vector<16x8xf32>
    %416 = tpu.matmul %381, %415, %cst_281 {dimension_numbers = #tpu.dot_dimension_numbers<[1], [0], [0], [1], [0, 0, 1, 1], [], []>} : vector<16x32xf32>, vector<32x8xf32>, vector<16x8xf32> -> vector<16x8xf32>
    %c2_282 = arith.constant 2 : index
    %c1_283 = arith.constant 1 : index
    %c0_284 = arith.constant 0 : index
    %c0_285 = arith.constant 0 : index
    %417 = vector.load %arg4[%c2_282, %c1_283, %c0_284, %c0_285] : memref<3x4x1x8xf32, #tpu.memory_space<vmem>>, vector<1x1x1x8xf32>
    %418 = vector.shape_cast %417 : vector<1x1x1x8xf32> to vector<1x8xf32>
    %419 = vector.broadcast %418 : vector<1x8xf32> to vector<16x8xf32>
    %420 = arith.addf %416, %419 : vector<16x8xf32>
    %421 = vector.extract_strided_slice %389 {offsets = [8, 0], sizes = [8, 16], strides = [1, 1]} : vector<32x16xf32> to vector<8x16xf32>
    %cst_286 = arith.constant dense<0.000000e+00> : vector<16x16xf32>
    %422 = tpu.matmul %420, %421, %cst_286 {dimension_numbers = #tpu.dot_dimension_numbers<[1], [0], [0], [1], [0, 0, 1, 1], [], []>} : vector<16x8xf32>, vector<8x16xf32>, vector<16x16xf32> -> vector<16x16xf32>
    %423 = arith.addf %422, %8 : vector<16x16xf32>
    %cst_287 = arith.constant dense<0xFF800000> : vector<16xf32>
    %424 = vector.multi_reduction <maximumf>, %423, %cst_287 [1] : vector<16x16xf32> to vector<16xf32>
    %425 = vector.shape_cast %424 : vector<16xf32> to vector<16x1xf32>
    %426 = vector.broadcast %425 : vector<16x1xf32> to vector<16x16xf32>
    %427 = arith.subf %423, %426 : vector<16x16xf32>
    %428 = math.exp %427 : vector<16x16xf32>
    %cst_288 = arith.constant dense<0.000000e+00> : vector<16xf32>
    %429 = vector.multi_reduction <add>, %428, %cst_288 [1] : vector<16x16xf32> to vector<16xf32>
    %430 = vector.shape_cast %429 : vector<16xf32> to vector<16x1xf32>
    %c2_289 = arith.constant 2 : index
    %c1_290 = arith.constant 1 : index
    %c0_291 = arith.constant 0 : index
    %c0_292 = arith.constant 0 : index
    %431 = vector.load %arg7[%c2_289, %c1_290, %c0_291, %c0_292] : memref<3x4x32x32xf32, #tpu.memory_space<vmem>>, vector<1x1x32x32xf32>
    %432 = vector.shape_cast %431 : vector<1x1x32x32xf32> to vector<32x32xf32>
    %cst_293 = arith.constant dense<0.000000e+00> : vector<16x32xf32>
    %433 = tpu.matmul %381, %432, %cst_293 {dimension_numbers = #tpu.dot_dimension_numbers<[1], [0], [0], [1], [0, 0, 1, 1], [], []>} : vector<16x32xf32>, vector<32x32xf32>, vector<16x32xf32> -> vector<16x32xf32>
    %cst_294 = arith.constant dense<0.000000e+00> : vector<16x32xf32>
    %434 = tpu.matmul %428, %433, %cst_294 {dimension_numbers = #tpu.dot_dimension_numbers<[1], [0], [0], [1], [0, 0, 1, 1], [], []>} : vector<16x16xf32>, vector<16x32xf32>, vector<16x32xf32> -> vector<16x32xf32>
    %435 = tpu.reciprocal %430 {approx = true} : vector<16x1xf32> -> vector<16x1xf32>
    %436 = vector.broadcast %435 : vector<16x1xf32> to vector<16x32xf32>
    %437 = arith.mulf %434, %436 : vector<16x32xf32>
    %438 = arith.addf %413, %437 : vector<16x32xf32>
    %c2_295 = arith.constant 2 : index
    %c2_296 = arith.constant 2 : index
    %c0_297 = arith.constant 0 : index
    %c0_298 = arith.constant 0 : index
    %439 = vector.load %arg3[%c2_295, %c2_296, %c0_297, %c0_298] : memref<3x4x32x8xf32, #tpu.memory_space<vmem>>, vector<1x1x32x8xf32>
    %440 = vector.shape_cast %439 : vector<1x1x32x8xf32> to vector<32x8xf32>
    %cst_299 = arith.constant dense<0.000000e+00> : vector<16x8xf32>
    %441 = tpu.matmul %381, %440, %cst_299 {dimension_numbers = #tpu.dot_dimension_numbers<[1], [0], [0], [1], [0, 0, 1, 1], [], []>} : vector<16x32xf32>, vector<32x8xf32>, vector<16x8xf32> -> vector<16x8xf32>
    %c2_300 = arith.constant 2 : index
    %c2_301 = arith.constant 2 : index
    %c0_302 = arith.constant 0 : index
    %c0_303 = arith.constant 0 : index
    %442 = vector.load %arg4[%c2_300, %c2_301, %c0_302, %c0_303] : memref<3x4x1x8xf32, #tpu.memory_space<vmem>>, vector<1x1x1x8xf32>
    %443 = vector.shape_cast %442 : vector<1x1x1x8xf32> to vector<1x8xf32>
    %444 = vector.broadcast %443 : vector<1x8xf32> to vector<16x8xf32>
    %445 = arith.addf %441, %444 : vector<16x8xf32>
    %446 = vector.extract_strided_slice %389 {offsets = [16, 0], sizes = [8, 16], strides = [1, 1]} : vector<32x16xf32> to vector<8x16xf32>
    %cst_304 = arith.constant dense<0.000000e+00> : vector<16x16xf32>
    %447 = tpu.matmul %445, %446, %cst_304 {dimension_numbers = #tpu.dot_dimension_numbers<[1], [0], [0], [1], [0, 0, 1, 1], [], []>} : vector<16x8xf32>, vector<8x16xf32>, vector<16x16xf32> -> vector<16x16xf32>
    %448 = arith.addf %447, %8 : vector<16x16xf32>
    %cst_305 = arith.constant dense<0xFF800000> : vector<16xf32>
    %449 = vector.multi_reduction <maximumf>, %448, %cst_305 [1] : vector<16x16xf32> to vector<16xf32>
    %450 = vector.shape_cast %449 : vector<16xf32> to vector<16x1xf32>
    %451 = vector.broadcast %450 : vector<16x1xf32> to vector<16x16xf32>
    %452 = arith.subf %448, %451 : vector<16x16xf32>
    %453 = math.exp %452 : vector<16x16xf32>
    %cst_306 = arith.constant dense<0.000000e+00> : vector<16xf32>
    %454 = vector.multi_reduction <add>, %453, %cst_306 [1] : vector<16x16xf32> to vector<16xf32>
    %455 = vector.shape_cast %454 : vector<16xf32> to vector<16x1xf32>
    %c2_307 = arith.constant 2 : index
    %c2_308 = arith.constant 2 : index
    %c0_309 = arith.constant 0 : index
    %c0_310 = arith.constant 0 : index
    %456 = vector.load %arg7[%c2_307, %c2_308, %c0_309, %c0_310] : memref<3x4x32x32xf32, #tpu.memory_space<vmem>>, vector<1x1x32x32xf32>
    %457 = vector.shape_cast %456 : vector<1x1x32x32xf32> to vector<32x32xf32>
    %cst_311 = arith.constant dense<0.000000e+00> : vector<16x32xf32>
    %458 = tpu.matmul %381, %457, %cst_311 {dimension_numbers = #tpu.dot_dimension_numbers<[1], [0], [0], [1], [0, 0, 1, 1], [], []>} : vector<16x32xf32>, vector<32x32xf32>, vector<16x32xf32> -> vector<16x32xf32>
    %cst_312 = arith.constant dense<0.000000e+00> : vector<16x32xf32>
    %459 = tpu.matmul %453, %458, %cst_312 {dimension_numbers = #tpu.dot_dimension_numbers<[1], [0], [0], [1], [0, 0, 1, 1], [], []>} : vector<16x16xf32>, vector<16x32xf32>, vector<16x32xf32> -> vector<16x32xf32>
    %460 = tpu.reciprocal %455 {approx = true} : vector<16x1xf32> -> vector<16x1xf32>
    %461 = vector.broadcast %460 : vector<16x1xf32> to vector<16x32xf32>
    %462 = arith.mulf %459, %461 : vector<16x32xf32>
    %463 = arith.addf %438, %462 : vector<16x32xf32>
    %c2_313 = arith.constant 2 : index
    %c3_314 = arith.constant 3 : index
    %c0_315 = arith.constant 0 : index
    %c0_316 = arith.constant 0 : index
    %464 = vector.load %arg3[%c2_313, %c3_314, %c0_315, %c0_316] : memref<3x4x32x8xf32, #tpu.memory_space<vmem>>, vector<1x1x32x8xf32>
    %465 = vector.shape_cast %464 : vector<1x1x32x8xf32> to vector<32x8xf32>
    %cst_317 = arith.constant dense<0.000000e+00> : vector<16x8xf32>
    %466 = tpu.matmul %381, %465, %cst_317 {dimension_numbers = #tpu.dot_dimension_numbers<[1], [0], [0], [1], [0, 0, 1, 1], [], []>} : vector<16x32xf32>, vector<32x8xf32>, vector<16x8xf32> -> vector<16x8xf32>
    %c2_318 = arith.constant 2 : index
    %c3_319 = arith.constant 3 : index
    %c0_320 = arith.constant 0 : index
    %c0_321 = arith.constant 0 : index
    %467 = vector.load %arg4[%c2_318, %c3_319, %c0_320, %c0_321] : memref<3x4x1x8xf32, #tpu.memory_space<vmem>>, vector<1x1x1x8xf32>
    %468 = vector.shape_cast %467 : vector<1x1x1x8xf32> to vector<1x8xf32>
    %469 = vector.broadcast %468 : vector<1x8xf32> to vector<16x8xf32>
    %470 = arith.addf %466, %469 : vector<16x8xf32>
    %471 = vector.extract_strided_slice %389 {offsets = [24, 0], sizes = [8, 16], strides = [1, 1]} : vector<32x16xf32> to vector<8x16xf32>
    %cst_322 = arith.constant dense<0.000000e+00> : vector<16x16xf32>
    %472 = tpu.matmul %470, %471, %cst_322 {dimension_numbers = #tpu.dot_dimension_numbers<[1], [0], [0], [1], [0, 0, 1, 1], [], []>} : vector<16x8xf32>, vector<8x16xf32>, vector<16x16xf32> -> vector<16x16xf32>
    %473 = arith.addf %472, %8 : vector<16x16xf32>
    %cst_323 = arith.constant dense<0xFF800000> : vector<16xf32>
    %474 = vector.multi_reduction <maximumf>, %473, %cst_323 [1] : vector<16x16xf32> to vector<16xf32>
    %475 = vector.shape_cast %474 : vector<16xf32> to vector<16x1xf32>
    %476 = vector.broadcast %475 : vector<16x1xf32> to vector<16x16xf32>
    %477 = arith.subf %473, %476 : vector<16x16xf32>
    %478 = math.exp %477 : vector<16x16xf32>
    %cst_324 = arith.constant dense<0.000000e+00> : vector<16xf32>
    %479 = vector.multi_reduction <add>, %478, %cst_324 [1] : vector<16x16xf32> to vector<16xf32>
    %480 = vector.shape_cast %479 : vector<16xf32> to vector<16x1xf32>
    %c2_325 = arith.constant 2 : index
    %c3_326 = arith.constant 3 : index
    %c0_327 = arith.constant 0 : index
    %c0_328 = arith.constant 0 : index
    %481 = vector.load %arg7[%c2_325, %c3_326, %c0_327, %c0_328] : memref<3x4x32x32xf32, #tpu.memory_space<vmem>>, vector<1x1x32x32xf32>
    %482 = vector.shape_cast %481 : vector<1x1x32x32xf32> to vector<32x32xf32>
    %cst_329 = arith.constant dense<0.000000e+00> : vector<16x32xf32>
    %483 = tpu.matmul %381, %482, %cst_329 {dimension_numbers = #tpu.dot_dimension_numbers<[1], [0], [0], [1], [0, 0, 1, 1], [], []>} : vector<16x32xf32>, vector<32x32xf32>, vector<16x32xf32> -> vector<16x32xf32>
    %cst_330 = arith.constant dense<0.000000e+00> : vector<16x32xf32>
    %484 = tpu.matmul %478, %483, %cst_330 {dimension_numbers = #tpu.dot_dimension_numbers<[1], [0], [0], [1], [0, 0, 1, 1], [], []>} : vector<16x16xf32>, vector<16x32xf32>, vector<16x32xf32> -> vector<16x32xf32>
    %485 = tpu.reciprocal %480 {approx = true} : vector<16x1xf32> -> vector<16x1xf32>
    %486 = vector.broadcast %485 : vector<16x1xf32> to vector<16x32xf32>
    %487 = arith.mulf %484, %486 : vector<16x32xf32>
    %488 = arith.addf %463, %487 : vector<16x32xf32>
    %c2_331 = arith.constant 2 : index
    %c0_332 = arith.constant 0 : index
    %c0_333 = arith.constant 0 : index
    %489 = vector.load %arg8[%c2_331, %c0_332, %c0_333] : memref<3x1x32xf32, #tpu.memory_space<vmem>>, vector<1x1x32xf32>
    %490 = vector.shape_cast %489 : vector<1x1x32xf32> to vector<1x32xf32>
    %491 = vector.broadcast %490 : vector<1x32xf32> to vector<16x32xf32>
    %492 = arith.addf %488, %491 : vector<16x32xf32>
    %493 = arith.addf %381, %492 : vector<16x32xf32>
    %c2_334 = arith.constant 2 : index
    %c0_335 = arith.constant 0 : index
    %c0_336 = arith.constant 0 : index
    %494 = vector.load %arg13[%c2_334, %c0_335, %c0_336] : memref<3x1x32xf32, #tpu.memory_space<vmem>>, vector<1x1x32xf32>
    %495 = vector.shape_cast %494 : vector<1x1x32xf32> to vector<1x32xf32>
    %c2_337 = arith.constant 2 : index
    %c0_338 = arith.constant 0 : index
    %c0_339 = arith.constant 0 : index
    %496 = vector.load %arg14[%c2_337, %c0_338, %c0_339] : memref<3x1x32xf32, #tpu.memory_space<vmem>>, vector<1x1x32xf32>
    %497 = vector.shape_cast %496 : vector<1x1x32xf32> to vector<1x32xf32>
    %cst_340 = arith.constant dense<0.000000e+00> : vector<16xf32>
    %498 = vector.multi_reduction <add>, %493, %cst_340 [1] : vector<16x32xf32> to vector<16xf32>
    %499 = vector.shape_cast %498 : vector<16xf32> to vector<16x1xf32>
    %cst_341 = arith.constant 3.200000e+01 : f32
    %500 = vector.broadcast %cst_341 : f32 to vector<16x1xf32>
    %501 = arith.divf %499, %500 : vector<16x1xf32>
    %502 = vector.broadcast %501 : vector<16x1xf32> to vector<16x32xf32>
    %503 = arith.subf %493, %502 : vector<16x32xf32>
    %504 = arith.mulf %503, %503 : vector<16x32xf32>
    %cst_342 = arith.constant dense<0.000000e+00> : vector<16xf32>
    %505 = vector.multi_reduction <add>, %504, %cst_342 [1] : vector<16x32xf32> to vector<16xf32>
    %506 = vector.shape_cast %505 : vector<16xf32> to vector<16x1xf32>
    %cst_343 = arith.constant 3.200000e+01 : f32
    %507 = vector.broadcast %cst_343 : f32 to vector<16x1xf32>
    %508 = arith.divf %506, %507 : vector<16x1xf32>
    %509 = vector.broadcast %501 : vector<16x1xf32> to vector<16x32xf32>
    %510 = arith.subf %493, %509 : vector<16x32xf32>
    %cst_344 = arith.constant 9.99999974E-6 : f32
    %511 = vector.broadcast %cst_344 : f32 to vector<16x1xf32>
    %512 = arith.addf %508, %511 : vector<16x1xf32>
    %513 = math.rsqrt %512 : vector<16x1xf32>
    %514 = vector.broadcast %513 : vector<16x1xf32> to vector<16x32xf32>
    %515 = arith.mulf %510, %514 : vector<16x32xf32>
    %516 = vector.broadcast %495 : vector<1x32xf32> to vector<16x32xf32>
    %517 = arith.mulf %515, %516 : vector<16x32xf32>
    %518 = vector.broadcast %497 : vector<1x32xf32> to vector<16x32xf32>
    %519 = arith.addf %517, %518 : vector<16x32xf32>
    %c2_345 = arith.constant 2 : index
    %c0_346 = arith.constant 0 : index
    %c0_347 = arith.constant 0 : index
    %520 = vector.load %arg9[%c2_345, %c0_346, %c0_347] : memref<3x32x64xf32, #tpu.memory_space<vmem>>, vector<1x32x64xf32>
    %521 = vector.shape_cast %520 : vector<1x32x64xf32> to vector<32x64xf32>
    %cst_348 = arith.constant dense<0.000000e+00> : vector<16x64xf32>
    %522 = tpu.matmul %519, %521, %cst_348 {dimension_numbers = #tpu.dot_dimension_numbers<[1], [0], [0], [1], [0, 0, 1, 1], [], []>} : vector<16x32xf32>, vector<32x64xf32>, vector<16x64xf32> -> vector<16x64xf32>
    %c2_349 = arith.constant 2 : index
    %c0_350 = arith.constant 0 : index
    %c0_351 = arith.constant 0 : index
    %523 = vector.load %arg10[%c2_349, %c0_350, %c0_351] : memref<3x1x64xf32, #tpu.memory_space<vmem>>, vector<1x1x64xf32>
    %524 = vector.shape_cast %523 : vector<1x1x64xf32> to vector<1x64xf32>
    %525 = vector.broadcast %524 : vector<1x64xf32> to vector<16x64xf32>
    %526 = arith.addf %522, %525 : vector<16x64xf32>
    %cst_352 = arith.constant 0.000000e+00 : f32
    %527 = vector.broadcast %cst_352 : f32 to vector<16x64xf32>
    %528 = arith.maximumf %526, %527 : vector<16x64xf32>
    %c2_353 = arith.constant 2 : index
    %c0_354 = arith.constant 0 : index
    %c0_355 = arith.constant 0 : index
    %529 = vector.load %arg11[%c2_353, %c0_354, %c0_355] : memref<3x64x32xf32, #tpu.memory_space<vmem>>, vector<1x64x32xf32>
    %530 = vector.shape_cast %529 : vector<1x64x32xf32> to vector<64x32xf32>
    %cst_356 = arith.constant dense<0.000000e+00> : vector<16x32xf32>
    %531 = tpu.matmul %528, %530, %cst_356 {dimension_numbers = #tpu.dot_dimension_numbers<[1], [0], [0], [1], [0, 0, 1, 1], [], []>} : vector<16x64xf32>, vector<64x32xf32>, vector<16x32xf32> -> vector<16x32xf32>
    %c2_357 = arith.constant 2 : index
    %c0_358 = arith.constant 0 : index
    %c0_359 = arith.constant 0 : index
    %532 = vector.load %arg12[%c2_357, %c0_358, %c0_359] : memref<3x1x32xf32, #tpu.memory_space<vmem>>, vector<1x1x32xf32>
    %533 = vector.shape_cast %532 : vector<1x1x32xf32> to vector<1x32xf32>
    %534 = vector.broadcast %533 : vector<1x32xf32> to vector<16x32xf32>
    %535 = arith.addf %531, %534 : vector<16x32xf32>
    %536 = arith.addf %519, %535 : vector<16x32xf32>
    %c2_360 = arith.constant 2 : index
    %c0_361 = arith.constant 0 : index
    %c0_362 = arith.constant 0 : index
    %537 = vector.load %arg15[%c2_360, %c0_361, %c0_362] : memref<3x1x32xf32, #tpu.memory_space<vmem>>, vector<1x1x32xf32>
    %538 = vector.shape_cast %537 : vector<1x1x32xf32> to vector<1x32xf32>
    %c2_363 = arith.constant 2 : index
    %c0_364 = arith.constant 0 : index
    %c0_365 = arith.constant 0 : index
    %539 = vector.load %arg16[%c2_363, %c0_364, %c0_365] : memref<3x1x32xf32, #tpu.memory_space<vmem>>, vector<1x1x32xf32>
    %540 = vector.shape_cast %539 : vector<1x1x32xf32> to vector<1x32xf32>
    %cst_366 = arith.constant dense<0.000000e+00> : vector<16xf32>
    %541 = vector.multi_reduction <add>, %536, %cst_366 [1] : vector<16x32xf32> to vector<16xf32>
    %542 = vector.shape_cast %541 : vector<16xf32> to vector<16x1xf32>
    %cst_367 = arith.constant 3.200000e+01 : f32
    %543 = vector.broadcast %cst_367 : f32 to vector<16x1xf32>
    %544 = arith.divf %542, %543 : vector<16x1xf32>
    %545 = vector.broadcast %544 : vector<16x1xf32> to vector<16x32xf32>
    %546 = arith.subf %536, %545 : vector<16x32xf32>
    %547 = arith.mulf %546, %546 : vector<16x32xf32>
    %cst_368 = arith.constant dense<0.000000e+00> : vector<16xf32>
    %548 = vector.multi_reduction <add>, %547, %cst_368 [1] : vector<16x32xf32> to vector<16xf32>
    %549 = vector.shape_cast %548 : vector<16xf32> to vector<16x1xf32>
    %cst_369 = arith.constant 3.200000e+01 : f32
    %550 = vector.broadcast %cst_369 : f32 to vector<16x1xf32>
    %551 = arith.divf %549, %550 : vector<16x1xf32>
    %552 = vector.broadcast %544 : vector<16x1xf32> to vector<16x32xf32>
    %553 = arith.subf %536, %552 : vector<16x32xf32>
    %cst_370 = arith.constant 9.99999974E-6 : f32
    %554 = vector.broadcast %cst_370 : f32 to vector<16x1xf32>
    %555 = arith.addf %551, %554 : vector<16x1xf32>
    %556 = math.rsqrt %555 : vector<16x1xf32>
    %557 = vector.broadcast %556 : vector<16x1xf32> to vector<16x32xf32>
    %558 = arith.mulf %553, %557 : vector<16x32xf32>
    %559 = vector.broadcast %538 : vector<1x32xf32> to vector<16x32xf32>
    %560 = arith.mulf %558, %559 : vector<16x32xf32>
    %561 = vector.broadcast %540 : vector<1x32xf32> to vector<16x32xf32>
    %562 = arith.addf %560, %561 : vector<16x32xf32>
    %c0_371 = arith.constant 0 : index
    %c0_372 = arith.constant 0 : index
    %563 = vector.load %arg20[%c0_371, %c0_372] : memref<16x32xf32, #tpu.memory_space<vmem>>, vector<16x32xf32>
    tpu.vector_store %arg20[%c0_371, %c0_372], %562 {strides = array<i32>} : memref<16x32xf32, #tpu.memory_space<vmem>>, vector<16x32xf32>,
    return
  }
}

</mosaic_0001>

<bundles_post_ra>
// kernel: tile.0
= control target key start
LH: loop header
LB: loop body
LE: loop exit
PB: predicated region body
PF: predicated region fallthrough
CT: control target
= control target key end

     0   :  { %vm3_vm0 = vcmask 7168   ;;  %s13_s9 = smov 127   ;;  %s33_s0 = inlined_call_operand.vmem [shape: f32[8,2], index: 0, kind: input, shape index: {}]   ;;  %s34_s1 = inlined_call_operand.vmem [shape: f32[16,1], index: 1, kind: output, shape index: {}]  }
   0x1   :  { %v2_v0 = vld [vmem:[%s33_s0] sm:$0xff]  }
   0x2   :  { %4 = vst.msk [vmem:[%s34_s1] ss:$2 sm:$0xff] %vm3_vm0, %v2_v0   ;;  %6 = vrot.lane.b32.xlu0 %v2_v0, %s13_s9 }
  0x74   :  { %v7_v1 = vpop.permute.xlu0 %6  }
  0x75   :  { %11 = vst.msk [vmem:[%s34_s1 + $0x1] ss:$2 sm:$0xff] %vm3_vm0, %v7_v1  }

// kernel: skip_encode_transformer.1
= control target key start
LH: loop header
LB: loop body
LE: loop exit
PB: predicated region body
PF: predicated region fallthrough
CT: control target
= control target key end

     0   :  { %s8814_s0 = inlined_call_operand.vmem [shape: f32[16,32], index: 0, kind: input, shape index: {}]   ;;  %s8815_s1 = inlined_call_operand.vmem [shape: f32[16,1], index: 1, kind: input, shape index: {}]   ;;  %s8816_s2 = inlined_call_operand.vmem [shape: f32[1,16], index: 2, kind: input, shape index: {}]   ;;  %s8817_s3 = inlined_call_operand.vmem [shape: f32[3,4,32,8], index: 3, kind: input, shape index: {}]   ;;  %s8818_s4 = inlined_call_operand.vmem [shape: f32[3,4,1,8], index: 4, kind: input, shape index: {}]   ;;  %s8819_s5 = inlined_call_operand.vmem [shape: f32[3,32,32], index: 5, kind: input, shape index: {}]   ;;  %s8820_s6 = inlined_call_operand.vmem [shape: f32[3,1,32], index: 6, kind: input, shape index: {}]   ;;  %s8821_s7 = inlined_call_operand.vmem [shape: f32[3,4,32,32], index: 7, kind: input, shape index: {}]   ;;  %s8822_s8 = inlined_call_operand.vmem [shape: f32[3,1,32], index: 8, kind: input, shape index: {}]   ;;  %s8823_s9 = inlined_call_operand.vmem [shape: f32[3,32,64], index: 9, kind: input, shape index: {}]   ;;  %s8824_s10 = inlined_call_operand.vmem [shape: f32[3,1,64], index: 10, kind: input, shape index: {}]   ;;  %s8825_s11 = inlined_call_operand.vmem [shape: f32[3,64,32], index: 11, kind: input, shape index: {}]   ;;  %s8826_s12 = inlined_call_operand.vmem [shape: f32[3,1,32], index: 12, kind: input, shape index: {}]   ;;  %s8827_s13 = inlined_call_operand.vmem [shape: f32[3,1,32], index: 13, kind: input, shape index: {}]   ;;  %s8828_s14 = inlined_call_operand.vmem [shape: f32[3,1,32], index: 14, kind: input, shape index: {}]   ;;  %s8829_s15 = inlined_call_operand.vmem [shape: f32[3,1,32], index: 15, kind: input, shape index: {}]   ;;  %s8830_s16 = inlined_call_operand.vmem [shape: f32[3,1,32], index: 16, kind: input, shape index: {}]   ;;  %s8831_s17 = inlined_call_operand.vmem [shape: f32[1,32,32], index: 17, kind: input, shape index: {}]   ;;  %s8832_s18 = inlined_call_operand.vmem [shape: f32[1,32,32], index: 18, kind: input, shape index: {}]   ;;  %s8833_s19 = inlined_call_operand.vmem [shape: f32[1,1,32], index: 19, kind: input, shape index: {}]   ;;  %s8834_s20 = inlined_call_operand.hbm [shape: f32[16,32], index: 20, kind: output, shape index: {}]  }
   0x1   :  { %8839 = sst [smem:[#allocation5_spill]] %s8814_s0 }
   0x2   :  { %8840 = sst [smem:[#allocation6_spill]] %s8815_s1 }
   0x3   :  { %8841 = sst [smem:[#allocation7_spill]] %s8816_s2 }
   0x4   :  { %8842 = sst [smem:[#allocation8_spill]] %s8817_s3 }
   0x5   :  { %8843 = sst [smem:[#allocation9_spill]] %s8818_s4 }
   0x6   :  { %v91_v0 = vld [vmem:[%s8819_s5] sm:$0xff]  ;;  %v92_v1 = vld [vmem:[%s8819_s5 + $0x8] sm:$0xff]  ;;  %v93_v2 = vld [vmem:[%s8819_s5 + $0x10] sm:$0xff]  ;;  %vm102_vm0 = vcmask 261120   ;;  %s8844_s4 = sld [smem:[#allocation5_spill]]  ;;  %v7633_v6 = vmov 0  }
   0x7   :  { %v7009_v3 = vpack.c.bf16 %v92_v1, %v91_v0  ;;  %v94_v4 = vld [vmem:[%s8819_s5 + $0x18] sm:$0xff]  ;;  %7443 = vset.pattern.permute.xlu0 %v7633_v6  ;;  %s8845_s0 = sld [smem:[#allocation8_spill]]  ;;  %v377_v14 = vld [vmem:[%s8821_s7] sm:$0xff]  ;;  %v378_v15 = vld [vmem:[%s8821_s7 + $0x8] sm:$0xff]  ;;  %s8846_s30 = sld [smem:[#allocation6_spill]] }
   0x8   :  { %v7013_v7 = vpack.c.bf16 %v94_v4, %v93_v2 }
   0x9   :  { %7010 = vmatprep.subr.bf16.mxu0 %v7009_v3 }
   0xa   :  { %7012 = vmatpush3.bf16.msra.mxu0 %v7009_v3 }
   0xb   :  { %7014 = vmatprep.subr.bf16.mxu0 %v7013_v7 }
   0xc   :  { %v7761_v5 = vld [vmem:[%s8844_s4] sm:$0xff] }
   0xd   :  { %6440 = vmatprep.mubr.msk.f32.mxu0 %vm102_vm0, %v7761_v5  ;;  %v184_v8 = vld [vmem:[%s8845_s0] sm:$0xff]  ;;  %v185_v9 = vld [vmem:[%s8845_s0 + $0x8] sm:$0xff]  ;;  %v186_v10 = vld [vmem:[%s8845_s0 + $0x10] sm:$0xff]  ;;  %6451 = vmatprep.mubr.msk.f32.mxu1 %vm102_vm0, %v7761_v5 }
   0xe   :  { %v7017_v11 = vpack.c.bf16 %v185_v9, %v184_v8  ;;  %v187_v12 = vld [vmem:[%s8845_s0 + $0x18] sm:$0xff]  ;;  %v68_v16 = vld [vmem:[%s8846_s30] sm:$0xff] }
   0xf   :  { %v7021_v13 = vpack.c.bf16 %v187_v12, %v186_v10 }
  0x10   :  { %7018 = vmatprep.subr.bf16.mxu1 %v7017_v11 }
  0x11   :  { %25 = vsyncpa [#allocation3], 0  ;;  %7020 = vmatpush3.bf16.msra.mxu1 %v7017_v11  ;;  %73 = vperm.xlu0 %7443, %v68_v16   ;;  %v7031_v17 = vpack.c.bf16 %v378_v15, %v377_v14  ;;  %v69_v18 = vld [vmem:[%s8846_s30 + $0x8] sm:$0xff]  ;;  %v379_v20 = vld [vmem:[%s8821_s7 + $0x10] sm:$0xff]  ;;  %vm270_vm1 = vcmask 64512   ;;  %s8847_s25 = sld [smem:[#allocation9_spill]] }
  0x12   :  { %7022 = vmatprep.subr.bf16.mxu1 %v7021_v13  ;;  %7016 = vmatpush3.bf16.msra.mxu0 %v7013_v7  ;;  %v7794_v19 = vld [vmem:[%s8844_s4 + $0x8] sm:$0xff]  ;;  %v380_v21 = vld [vmem:[%s8821_s7 + $0x18] sm:$0xff]  ;;  %v5802_v23 = vld [vmem:[%s8845_s0 + $0x20] sm:$0xff]  ;;  %s7634_s3 = smov 120   ;;  %s8850_s27 = sld [smem:[#allocation7_spill]]  ;;  %vm358_vm5 = vcmask 130048  }
  0x13   :  { %v7035_v22 = vpack.c.bf16 %v380_v21, %v379_v20  ;;  %v5803_v24 = vld [vmem:[%s8845_s0 + $0x28] sm:$0xff]  ;;  %v5804_v25 = vld [vmem:[%s8845_s0 + $0x30] sm:$0xff]  ;;  %v5788_v26 = vld [vmem:[%s8820_s6] ss:$0 sm:$0xff]  ;;  %v7635_v52 = vmov -1e+09  }
  0x14   :  { %v7043_v27 = vpack.c.bf16 %v5803_v24, %v5802_v23  ;;  %v5805_v28 = vld [vmem:[%s8845_s0 + $0x38] sm:$0xff]  ;;  %vm7832_vm2 = vmpackc.low %vm270_vm1, %vm270_vm1  ;;  %v5814_v63 = vld [vmem:[%s8821_s7 + $0x20] sm:$0xff]  ;;  %s7636_s26 = smov 112   ;;  %s7637_s21 = smov 104   ;;  %vm1792_vm6 = vcmask 523264  }
  0x15   :  { %7024 = vmatpush3.bf16.msra.mxu1 %v7021_v13  ;;  %78 = vperm.xlu0 %7443, %v69_v18   ;;  %v7047_v29 = vpack.c.bf16 %v5805_v28, %v5804_v25  ;;  %v5815_v0 = vld [vmem:[%s8821_s7 + $0x28] sm:$0xff]  ;;  %v5816_v1 = vld [vmem:[%s8821_s7 + $0x30] sm:$0xff]  ;;  %v5817_v3 = vld [vmem:[%s8821_s7 + $0x38] sm:$0xff]  ;;  %s7638_s30 = smov [#allocation2]  }
  0x16   :  { %6441 = vmatmul.mubr.msk.f32.vlgmr.msra.gmra.mrb[0].mxu0 %vm102_vm0, %v7794_v19  ;;  %7032 = vmatprep.subr.bf16.mxu1 %v7031_v17  ;;  %v7057_v2 = vpack.c.bf16 %v5815_v0, %v5814_v63  ;;  %v7061_v4 = vpack.c.bf16 %v5817_v3, %v5816_v1  ;;  %v5844_v0 = vld [vmem:[%s8845_s0 + $0x70] sm:$0xff]  ;;  %v5845_v1 = vld [vmem:[%s8845_s0 + $0x78] sm:$0xff]  ;;  %v6077_v36 = vld [vmem:[%s8821_s7 + $0x168] sm:$0xff] }
  0x17   :  { %v5791_v33 = vld [vmem:[%s8847_s25] ss:$0 sm:$0xff]  ;;  %v5807_v12 = vld [vmem:[%s8847_s25 + $0x1] ss:$0 sm:$0xff] }
  0x18   :  { %6452 = vmatmul.mubr.msk.f32.vlgmr.msra.gmra.mrb[0].mxu1 %vm102_vm0, %v7794_v19  ;;  %v5787_v51 = vld [vmem:[%s8850_s27] ss:$0 sm:$0xff] }
  0x19   :  { %7034 = vmatpush3.bf16.msra.mxu1 %v7031_v17  ;;  %6469 = vmatprep.mubr.msk.f32.mxu1 %vm102_vm0, %v7761_v5 }
  0x1a   :  { %7036 = vmatprep.subr.bf16.mxu1 %v7035_v22 }
  0x1d   :  { %7038 = vmatpush3.bf16.msra.mxu1 %v7035_v22 }
  0x1e   :  { %7044 = vmatprep.subr.bf16.mxu1 %v7043_v27 }
  0x20   :  { %6470 = vmatmul.mubr.msk.f32.vlgmr.msra.gmra.mrb[2].mxu1 %vm102_vm0, %v7794_v19 }
  0x21   :  { %6487 = vmatprep.mubr.msk.f32.mxu1 %vm102_vm0, %v7761_v5  ;;  %7046 = vmatpush3.bf16.msra.mxu1 %v7043_v27 }
  0x22   :  { %7048 = vmatprep.subr.bf16.mxu1 %v7047_v29 }
  0x25   :  { %7050 = vmatpush3.bf16.msra.mxu1 %v7047_v29  ;;  %v5822_v29 = vld [vmem:[%s8845_s0 + $0x40] sm:$0xff] }
  0x26   :  { %7058 = vmatprep.subr.bf16.mxu1 %v7057_v2 }
  0x28   :  { %6488 = vmatmul.mubr.msk.f32.vlgmr.msra.gmra.mrb[4].mxu1 %vm102_vm0, %v7794_v19 }
  0x29   :  { %6505 = vmatprep.mubr.msk.f32.mxu1 %vm102_vm0, %v7761_v5  ;;  %7060 = vmatpush3.bf16.msra.mxu1 %v7057_v2 }
  0x2a   :  { %7062 = vmatprep.subr.bf16.mxu1 %v7061_v4 }
  0x2d   :  { %7064 = vmatpush3.bf16.msra.mxu1 %v7061_v4 }
  0x30   :  { %6506 = vmatmul.mubr.msk.f32.vlgmr.msra.gmra.mrb[6].mxu1 %vm102_vm0, %v7794_v19 }
  0x90   :  { %v74_v45 = vpop.permute.xlu0 %73 }
  0x91   :  { %vm87_vm3 = vcmp.eq.f32.partialorder %v74_v45, %v5787_v51  ;;  %v5825_v45 = vld [vmem:[%s8845_s0 + $0x58] sm:$0xff] }
  0x92   :  { %v7855_v53 = vsel %vm87_vm3, 0.0, %v7635_v52 }
  0x94   :  { %v79_v46 = vpop.permute.xlu0 %78 }
  0x95   :  { %vm88_vm4 = vcmp.eq.f32.partialorder %v79_v46, %v5787_v51  ;;  %v5836_v51 = vld [vmem:[%s8821_s7 + $0x50] sm:$0xff] }
  0x96   :  { %v7857_v55 = vsel %vm88_vm4, 0.0, %v7635_v52 }
  0xe9   :  { %v6442_v30 = vpop.f32.mrb[0].mxu0 }
  0xea   :  { %v181_v31 = vadd.f32 %v6442_v30, %v5788_v26  ;;  %v175_v32 = vpop.f32.mrb[1].mxu0  ;;  %v5823_v30 = vld [vmem:[%s8845_s0 + $0x48] sm:$0xff] }
  0xeb   :  { %v176_v34 = vadd.f32 %v5788_v26, %v175_v32  ;;  %v6453_v35 = vpop.f32.mrb[0].mxu1 }
  0xec   :  { %v261_v37 = vpop.f32.mrb[1].mxu1  ;;  %v267_v43 = vadd.f32 %v6453_v35, %v5791_v33 }
  0xed   :  { %v7836_v38 = vpack.i.bf16 %v181_v31, %v176_v34  ;;  %v7025_v39 = vpack.c.bf16 %v181_v31, %v176_v34  ;;  %v262_v40 = vadd.f32 %v5791_v33, %v261_v37  ;;  %v7069_v31 = vpack.c.bf16 %v5823_v30, %v5822_v29 }
  0xef   :  { %7445 = vrot.lane.b32.xlu0 %v7836_v38, %s7634_s3  ;;  %7027 = vmatprep.subr.msk.bf16.mxu0 %vm7832_vm2, %v7025_v39 }
  0xf0   :  { %7030 = vmatpush3.bf16.xpose.msk.msra.mxu0 %vm7832_vm2, %v7025_v39  ;;  %6458 = vmatprep.mubr.msk.f32.mxu0 %vm270_vm1, %v262_v40 }
  0xf3   :  { %v6471_v41 = vpop.f32.mrb[2].mxu1 }
  0xf4   :  { %v447_v42 = vpop.f32.mrb[3].mxu1 }
  0xf5   :  { %v7039_v44 = vpack.c.bf16 %v6471_v41, %v447_v42 }
  0xf7   :  { %6459 = vmatmul.mubr.msk.f32.vlgmr.msra.gmra.mrb[2].mxu0 %vm270_vm1, %v267_v43  ;;  %7040 = vmatprep.subr.bf16.mxu0 %v7039_v44 }
  0xf8   :  { %7042 = vmatpush3.bf16.msra.mxu0 %v7039_v44  ;;  %v5824_v44 = vld [vmem:[%s8845_s0 + $0x50] sm:$0xff] }
  0xfb   :  { %v6489_v61 = vpop.f32.mrb[4].mxu1 }
  0xfc   :  { %v620_v62 = vpop.f32.mrb[5].mxu1  ;;  %v626_v16 = vadd.f32 %v6489_v61, %v5807_v12 }
  0xfd   :  { %v621_v14 = vadd.f32 %v5807_v12, %v620_v62  ;;  %v5827_v62 = vld [vmem:[%s8847_s25 + $0x2] ss:$0 sm:$0xff] }
 0x103   :  { %v6507_v26 = vpop.f32.mrb[6].mxu1 }
 0x104   :  { %v807_v27 = vpop.f32.mrb[7].mxu1 }
 0x105   :  { %v7065_v28 = vpack.c.bf16 %v6507_v26, %v807_v27  ;;  %v5857_v27 = vld [vmem:[%s8821_s7 + $0x78] sm:$0xff] }
 0x161   :  { %v7446_v47 = vpop.permute.xlu0 %7445 }
 0x162   :  { %v7448_v48 = vunpack.i.h.bf16 %v7446_v47  ;;  %v7447_v49 = vunpack.i.l.bf16 %v7446_v47  ;;  %v7073_v47 = vpack.c.bf16 %v5825_v45, %v5824_v44 }
 0x164   :  { %v7051_v50 = vpack.c.bf16 %v7448_v48, %v7447_v49  ;;  %v5834_v49 = vld [vmem:[%s8821_s7 + $0x40] sm:$0xff] }
 0x166   :  { %7053 = vmatprep.subr.msk.bf16.mxu0 %vm7832_vm2, %v7051_v50 }
 0x1ca   :  { %v6460_v54 = vpop.f32.mrb[2].mxu0 }
 0x1cb   :  { %v349_v56 = vpop.f32.mrb[3].mxu0  ;;  %v355_v58 = vadd.f32 %v6460_v54, %v7857_v55  ;;  %v5837_v54 = vld [vmem:[%s8821_s7 + $0x58] sm:$0xff] }
 0x1cc   :  { %v350_v57 = vadd.f32 %v349_v56, %v7855_v53  ;;  %v5842_v56 = vld [vmem:[%s8845_s0 + $0x60] sm:$0xff] }
 0x1cd   :  { %v362_v60 = vsel %vm358_vm5, %v355_v58, -inf }
 0x1ce   :  { %v359_v59 = vsel %vm358_vm5, %v350_v57, -inf }
 0x1cf   :  { %360 = vmax.xlane.f32.xlu1 %v359_v59 }
 0x1d3   :  { %363 = vmax.xlane.f32.xlu1 %v362_v60 }
 0x25c   :  { %v361_v6 = vpop.xlane.xlu1 %360 }
 0x25d   :  { %v365_v7 = vsub.f32 %v350_v57, %v361_v6  ;;  %v5843_v57 = vld [vmem:[%s8845_s0 + $0x68] sm:$0xff]  ;;  %v7099_v6 = vpack.c.bf16 %v5845_v1, %v5844_v0 }
 0x25e   :  { %v7095_v59 = vpack.c.bf16 %v5843_v57, %v5842_v56 }
 0x25f   :  { %v367_v8 = vmul.f32 1.442695, %v365_v7 }
 0x260   :  { %v364_v9 = vpop.xlane.xlu1 %363 }
 0x261   :  { %7489 = vpow2.f32 %v367_v8  ;;  %v366_v10 = vsub.f32 %v355_v58, %v364_v9  ;;  %v7087_v58 = vpack.c.bf16 %v5837_v54, %v5836_v51 }
 0x263   :  { %v369_v11 = vmul.f32 1.442695, %v366_v10 }
 0x265   :  { %7491 = vpow2.f32 %v369_v11 }
 0x26b   :  { %v7880_v13 = vpop.eup %7489 }
 0x26c   :  { %6476 = vmatprep.mubr.msk.f32.mxu0 %vm358_vm5, %v7880_v13  ;;  %v371_v57 = vsel %vm358_vm5, %v7880_v13, 0.0 }
 0x26f   :  { %v7884_v15 = vpop.eup %7491 }
 0x270   :  { %6477 = vmatmul.mubr.msk.f32.vlgmr.msra.gmra.mrb[4].mxu0 %vm358_vm5, %v7884_v15 }
 0x271   :  { %7056 = vmatpush3.bf16.xpose.msk.msra.mxu0 %vm7832_vm2, %v7051_v50  ;;  %6494 = vmatprep.mubr.msk.f32.mxu0 %vm270_vm1, %v621_v14  ;;  %v5835_v50 = vld [vmem:[%s8821_s7 + $0x48] sm:$0xff] }
 0x272   :  { %7066 = vmatprep.subr.bf16.mxu0 %v7065_v28  ;;  %v7083_v52 = vpack.c.bf16 %v5835_v50, %v5834_v49 }
 0x278   :  { %6495 = vmatmul.mubr.msk.f32.vlgmr.msra.gmra.mrb[6].mxu0 %vm270_vm1, %v626_v16 }
 0x279   :  { %7068 = vmatpush3.bf16.msra.mxu0 %v7065_v28 }
 0x27a   :  { %7070 = vmatprep.subr.bf16.mxu0 %v7069_v31 }
 0x343   :  { %v7892_v17 = vpop.f32.mrb[4].mxu0 }
 0x344   :  { %v7894_v18 = vpop.f32.mrb[5].mxu0 }
 0x34b   :  { %v6496_v20 = vpop.f32.mrb[6].mxu0 }
 0x34c   :  { %v715_v21 = vadd.f32 %v6496_v20, %v7857_v55  ;;  %v709_v22 = vpop.f32.mrb[7].mxu0 }
 0x34d   :  { %v710_v23 = vadd.f32 %v709_v22, %v7855_v53 }
 0x34e   :  { %v721_v24 = vsel %vm358_vm5, %v715_v21, -inf }
 0x34f   :  { %722 = vmax.xlane.f32.xlu0 %v721_v24  ;;  %v718_v25 = vsel %vm358_vm5, %v710_v23, -inf  ;;  %v5855_v24 = vld [vmem:[%s8821_s7 + $0x68] sm:$0xff] }
 0x350   :  { %719 = vmax.xlane.f32.xlu1 %v718_v25  ;;  %v5856_v25 = vld [vmem:[%s8821_s7 + $0x70] sm:$0xff] }
 0x361   :  { %7450 = vrot.lane.b32.xlu1 %v7836_v38, %s7636_s26 }
 0x3dc   :  { %v723_v32 = vpop.xlane.xlu0 %722 }
 0x3dd   :  { %v725_v33 = vsub.f32 %v715_v21, %v723_v32  ;;  %v720_v34 = vpop.xlane.xlu1 %719 }
 0x3de   :  { %v724_v35 = vsub.f32 %v710_v23, %v720_v34  ;;  %v5854_v23 = vld [vmem:[%s8821_s7 + $0x60] sm:$0xff] }
 0x3df   :  { %v728_v37 = vmul.f32 1.442695, %v725_v33  ;;  %v7109_v26 = vpack.c.bf16 %v5855_v24, %v5854_v23 }
 0x3e0   :  { %v726_v39 = vmul.f32 1.442695, %v724_v35 }
 0x3e1   :  { %v7451_v40 = vpop.permute.xlu1 %7450 }
 0x3e2   :  { %7493 = vpow2.f32 %v726_v39  ;;  %v7453_v41 = vunpack.i.h.bf16 %v7451_v40  ;;  %v7452_v42 = vunpack.i.l.bf16 %v7451_v40  ;;  %v5847_v40 = vld [vmem:[%s8847_s25 + $0x3] ss:$0 sm:$0xff] }
 0x3e3   :  { %7495 = vpow2.f32 %v728_v37 }
 0x3e4   :  { %v7077_v43 = vpack.c.bf16 %v7453_v41, %v7452_v42 }
 0x3e6   :  { %7079 = vmatprep.subr.msk.bf16.mxu1 %vm7832_vm2, %v7077_v43 }
 0x3e7   :  { %7082 = vmatpush3.bf16.xpose.msk.msra.mxu1 %vm7832_vm2, %v7077_v43 }
 0x3e8   :  { %7096 = vmatprep.subr.bf16.mxu1 %v7095_v59 }
 0x3ec   :  { %v7918_v46 = vpop.eup %7493 }
 0x3ed   :  { %v7920_v48 = vpop.eup %7495  ;;  %6512 = vmatprep.mubr.msk.f32.mxu0 %vm358_vm5, %v7918_v46 }
 0x3ee   :  { %6513 = vmatmul.mubr.msk.f32.vlgmr.msra.gmra.mrb[8].mxu0 %vm358_vm5, %v7920_v48 }
 0x3ef   :  { %7072 = vmatpush3.bf16.msra.mxu0 %v7069_v31  ;;  %6523 = vmatprep.mubr.msk.f32.mxu0 %vm102_vm0, %v7761_v5 }
 0x3f0   :  { %7074 = vmatprep.subr.bf16.mxu0 %v7073_v47 }
 0x3f3   :  { %7076 = vmatpush3.bf16.msra.mxu0 %v7073_v47 }
 0x3f4   :  { %7084 = vmatprep.subr.bf16.mxu0 %v7083_v52 }
 0x3f6   :  { %6524 = vmatmul.mubr.msk.f32.vlgmr.msra.gmra.mrb[10].mxu0 %vm102_vm0, %v7794_v19 }
 0x3f7   :  { %6541 = vmatprep.mubr.msk.f32.mxu0 %vm102_vm0, %v7761_v5  ;;  %7086 = vmatpush3.bf16.msra.mxu0 %v7083_v52 }
 0x3f8   :  { %7088 = vmatprep.subr.bf16.mxu0 %v7087_v58 }
 0x3fb   :  { %7090 = vmatpush3.bf16.msra.mxu0 %v7087_v58  ;;  %v730_v58 = vsel %vm358_vm5, %v7918_v46, 0.0 }
 0x3fe   :  { %6542 = vmatmul.mubr.msk.f32.vlgmr.msra.gmra.mrb[12].mxu0 %vm102_vm0, %v7794_v19 }
 0x4c1   :  { %v7952_v60 = vpop.f32.mrb[8].mxu0 }
 0x4c2   :  { %v7954_v61 = vpop.f32.mrb[9].mxu0 }
 0x4c9   :  { %v6525_v63 = vpop.f32.mrb[10].mxu0 }
 0x4ca   :  { %v982_v2 = vpop.f32.mrb[11].mxu0  ;;  %v988_v4 = vadd.f32 %v6525_v63, %v5827_v62 }
 0x4cb   :  { %v983_v3 = vadd.f32 %v5827_v62, %v982_v2  ;;  %v733_v62 = vsel %vm358_vm5, %v7920_v48, 0.0 }
 0x4cd   :  { %6530 = vmatprep.mubr.msk.f32.mxu1 %vm270_vm1, %v983_v3 }
 0x4ce   :  { %6531 = vmatmul.mubr.msk.f32.vlgmr.msra.gmra.mrb[8].mxu1 %vm270_vm1, %v988_v4 }
 0x4cf   :  { %7098 = vmatpush3.bf16.msra.mxu1 %v7095_v59  ;;  %6559 = vmatprep.mubr.msk.f32.mxu1 %vm102_vm0, %v7761_v5  ;;  %v374_v59 = vsel %vm358_vm5, %v7884_v15, 0.0 }
 0x4d0   :  { %7100 = vmatprep.subr.bf16.mxu1 %v7099_v6 }
 0x4d1   :  { %v6543_v14 = vpop.f32.mrb[12].mxu0 }
 0x4d2   :  { %v1169_v16 = vpop.f32.mrb[13].mxu0 }
 0x4d3   :  { %7102 = vmatpush3.bf16.msra.mxu1 %v7099_v6  ;;  %v7091_v20 = vpack.c.bf16 %v6543_v14, %v1169_v16 }
 0x4d4   :  { %7110 = vmatprep.subr.bf16.mxu1 %v7109_v26 }
 0x4d5   :  { %7092 = vmatprep.subr.bf16.mxu0 %v7091_v20 }
 0x4d6   :  { %6560 = vmatmul.mubr.msk.f32.vlgmr.msra.gmra.mrb[10].mxu1 %vm102_vm0, %v7794_v19  ;;  %7094 = vmatpush3.bf16.msra.mxu0 %v7091_v20 }
 0x4d7   :  { %6577 = vmatprep.mubr.msk.f32.mxu1 %vm102_vm0, %v7761_v5  ;;  %7112 = vmatpush3.bf16.msra.mxu1 %v7109_v26 }
 0x5a1   :  { %v6532_v7 = vpop.f32.mrb[8].mxu1 }
 0x5a2   :  { %v1077_v8 = vadd.f32 %v6532_v7, %v7857_v55  ;;  %v1071_v9 = vpop.f32.mrb[9].mxu1 }
 0x5a3   :  { %v1072_v10 = vadd.f32 %v1071_v9, %v7855_v53 }
 0x5a4   :  { %v1083_v11 = vsel %vm358_vm5, %v1077_v8, -inf }
 0x5a5   :  { %1084 = vmax.xlane.f32.xlu0 %v1083_v11  ;;  %v1080_v12 = vsel %vm358_vm5, %v1072_v10, -inf }
 0x5a6   :  { %1081 = vmax.xlane.f32.xlu1 %v1080_v12 }
 0x5a9   :  { %v6561_v21 = vpop.f32.mrb[10].mxu1 }
 0x5aa   :  { %v1344_v22 = vpop.f32.mrb[11].mxu1  ;;  %v1350_v44 = vadd.f32 %v6561_v21, %v5847_v40 }
 0x5ab   :  { %v1345_v41 = vadd.f32 %v5847_v40, %v1344_v22 }
 0x5bb   :  { %7455 = vrot.lane.b32.xlu0 %v7836_v38, %s7637_s21  ;;  %v7113_v38 = vpack.c.bf16 %v5857_v27, %v5856_v25 }
 0x5bd   :  { %7114 = vmatprep.subr.bf16.mxu1 %v7113_v38 }
 0x5be   :  { %7116 = vmatpush3.bf16.msra.mxu1 %v7113_v38 }
 0x5c1   :  { %6578 = vmatmul.mubr.msk.f32.vlgmr.msra.gmra.mrb[12].mxu1 %vm102_vm0, %v7794_v19 }
 0x632   :  { %v1085_v28 = vpop.xlane.xlu0 %1084 }
 0x633   :  { %v1087_v29 = vsub.f32 %v1077_v8, %v1085_v28  ;;  %v1082_v30 = vpop.xlane.xlu1 %1081 }
 0x634   :  { %v1086_v31 = vsub.f32 %v1072_v10, %v1082_v30 }
 0x635   :  { %v1090_v32 = vmul.f32 1.442695, %v1087_v29 }
 0x636   :  { %v1088_v33 = vmul.f32 1.442695, %v1086_v31  ;;  %v7456_v34 = vpop.permute.xlu0 %7455 }
 0x637   :  { %v7458_v35 = vunpack.i.h.bf16 %v7456_v34  ;;  %v7457_v37 = vunpack.i.l.bf16 %v7456_v34 }
 0x638   :  { %7497 = vpow2.f32 %v1088_v33 }
 0x639   :  { %7499 = vpow2.f32 %v1090_v32  ;;  %v7103_v39 = vpack.c.bf16 %v7458_v35, %v7457_v37 }
 0x63b   :  { %7105 = vmatprep.subr.msk.bf16.mxu0 %vm7832_vm2, %v7103_v39 }
 0x642   :  { %v7498_v42 = vpop.eup %7497 }
 0x643   :  { %v7500_v43 = vpop.eup %7499  ;;  %6548 = vmatprep.mubr.msk.f32.mxu0 %vm358_vm5, %v7498_v42  ;;  %v1092_v63 = vsel %vm358_vm5, %v7498_v42, 0.0 }
 0x644   :  { %6549 = vmatmul.mubr.msk.f32.vlgmr.msra.gmra.mrb[14].mxu0 %vm358_vm5, %v7500_v43  ;;  %v1095_v13 = vsel %vm358_vm5, %v7500_v43, 0.0 }
 0x645   :  { %7108 = vmatpush3.bf16.xpose.msk.msra.mxu0 %vm7832_vm2, %v7103_v39  ;;  %6566 = vmatprep.mubr.msk.f32.mxu0 %vm270_vm1, %v1345_v41 }
 0x64c   :  { %6567 = vmatmul.mubr.msk.f32.vlgmr.msra.gmra.mrb[16].mxu0 %vm270_vm1, %v1350_v44 }
 0x694   :  { %v6579_v0 = vpop.f32.mrb[12].mxu1 }
 0x695   :  { %v1531_v1 = vpop.f32.mrb[13].mxu1 }
 0x696   :  { %v7117_v2 = vpack.c.bf16 %v6579_v0, %v1531_v1 }
 0x698   :  { %7118 = vmatprep.subr.bf16.mxu0 %v7117_v2 }
 0x699   :  { %7120 = vmatpush3.bf16.msra.mxu0 %v7117_v2 }
 0x717   :  { %v8004_v45 = vpop.f32.mrb[14].mxu0 }
 0x718   :  { %v8006_v47 = vpop.f32.mrb[15].mxu0 }
 0x71f   :  { %v6568_v49 = vpop.f32.mrb[16].mxu0 }
 0x720   :  { %v1439_v50 = vadd.f32 %v6568_v49, %v7857_v55  ;;  %v1433_v51 = vpop.f32.mrb[17].mxu0 }
 0x721   :  { %v1434_v52 = vadd.f32 %v1433_v51, %v7855_v53 }
 0x722   :  { %v1445_v54 = vsel %vm358_vm5, %v1439_v50, -inf }
 0x723   :  { %1446 = vmax.xlane.f32.xlu0 %v1445_v54  ;;  %v1442_v56 = vsel %vm358_vm5, %v1434_v52, -inf }
 0x724   :  { %1443 = vmax.xlane.f32.xlu1 %v1442_v56 }
 0x728   :  { %372 = vadd.xlane.f32.xlu1 %v371_v57 }
 0x72c   :  { %731 = vadd.xlane.f32.xlu1 %v730_v58 }
 0x730   :  { %375 = vadd.xlane.f32.xlu1 %v374_v59 }
 0x734   :  { %734 = vadd.xlane.f32.xlu1 %v733_v62 }
 0x738   :  { %1093 = vadd.xlane.f32.xlu1 %v1092_v63 }
 0x73c   :  { %1096 = vadd.xlane.f32.xlu1 %v1095_v13  ;;  %v1684_v13 = vld [vmem:[%s8823_s9 + $0x8] sm:$0xff] }
 0x7b0   :  { %v1447_v46 = vpop.xlane.xlu0 %1446 }
 0x7b1   :  { %v1449_v3 = vsub.f32 %v1439_v50, %v1447_v46  ;;  %v1444_v4 = vpop.xlane.xlu1 %1443 }
 0x7b2   :  { %v1448_v15 = vsub.f32 %v1434_v52, %v1444_v4  ;;  %v1686_v4 = vld [vmem:[%s8823_s9 + $0x18] sm:$0xff] }
 0x7b3   :  { %v1452_v6 = vmul.f32 1.442695, %v1449_v3  ;;  %v1685_v3 = vld [vmem:[%s8823_s9 + $0x10] sm:$0xff] }
 0x7b4   :  { %v1450_v7 = vmul.f32 1.442695, %v1448_v15  ;;  %v7125_v15 = vpack.c.bf16 %v1686_v4, %v1685_v3  ;;  %v5876_v3 = vld [vmem:[%s8819_s5 + $0x38] sm:$0xff] }
 0x7b5   :  { %v373_v8 = vpop.xlane.xlu1 %372 }
 0x7b6   :  { %7501 = vpow2.f32 %v1450_v7  ;;  %v1778_v7 = vld [vmem:[%s8825_s11 + $0x8] sm:$0xff] }
 0x7b7   :  { %7503 = vpow2.f32 %v1452_v6  ;;  %v1777_v6 = vld [vmem:[%s8825_s11] sm:$0xff] }
 0x7b8   :  { %7505 = vrcp.f32 %v373_v8  ;;  %v1779_v8 = vld [vmem:[%s8825_s11 + $0x10] sm:$0xff] }
 0x7b9   :  { %v732_v48 = vpop.xlane.xlu1 %731 }
 0x7ba   :  { %7507 = vrcp.f32 %v732_v48  ;;  %v7129_v48 = vpack.c.bf16 %v1778_v7, %v1777_v6  ;;  %v5882_v6 = vld [vmem:[%s8845_s0 + $0x88] sm:$0xff] }
 0x7bc   :  { %7130 = vmatprep.subr.bf16.mxu1 %v7129_v48 }
 0x7bd   :  { %v376_v9 = vpop.xlane.xlu1 %375  ;;  %7132 = vmatpush3.bf16.msra.mxu1 %v7129_v48 }
 0x7be   :  { %7509 = vrcp.f32 %v376_v9  ;;  %v1780_v9 = vld [vmem:[%s8825_s11 + $0x18] sm:$0xff] }
 0x7c0   :  { %v7502_v10 = vpop.eup %7501 }
 0x7c1   :  { %v7504_v11 = vpop.eup %7503  ;;  %6584 = vmatprep.mubr.msk.f32.mxu0 %vm358_vm5, %v7502_v10  ;;  %v735_v12 = vpop.xlane.xlu1 %734  ;;  %v1454_v14 = vsel %vm358_vm5, %v7502_v10, 0.0  ;;  %v7133_v10 = vpack.c.bf16 %v1780_v9, %v1779_v8 }
 0x7c2   :  { %v7506_v16 = vpop.eup %7505  ;;  %7511 = vrcp.f32 %v735_v12  ;;  %6585 = vmatmul.mubr.msk.f32.vlgmr.msra.gmra.mrb[18].mxu0 %vm358_vm5, %v7504_v11  ;;  %1455 = vadd.xlane.f32.xlu1 %v1454_v14  ;;  %v1457_v22 = vsel %vm358_vm5, %v7504_v11, 0.0  ;;  %v1781_v11 = vld [vmem:[%s8825_s11 + $0x20] sm:$0xff]  ;;  %v1782_v12 = vld [vmem:[%s8825_s11 + $0x28] sm:$0xff] }
 0x7c3   :  { %v539_v23 = vmul.f32 %v7506_v16, %v7894_v18  ;;  %7134 = vmatprep.subr.bf16.mxu1 %v7133_v10  ;;  %v7137_v14 = vpack.c.bf16 %v1782_v12, %v1781_v11 }
 0x7c4   :  { %v7508_v20 = vpop.eup %7507  ;;  %7136 = vmatpush3.bf16.msra.mxu1 %v7133_v10 }
 0x7c5   :  { %v1094_v21 = vpop.xlane.xlu1 %1093  ;;  %v899_v24 = vmul.f32 %v7508_v20, %v7954_v61  ;;  %7138 = vmatprep.subr.bf16.mxu1 %v7137_v14 }
 0x7c6   :  { %7513 = vrcp.f32 %v1094_v21  ;;  %1458 = vadd.xlane.f32.xlu1 %v1457_v22 }
 0x7c7   :  { %v901_v25 = vadd.f32 %v899_v24, %v539_v23 }
 0x7c8   :  { %v7510_v27 = vpop.eup %7509  ;;  %7140 = vmatpush3.bf16.msra.mxu1 %v7137_v14 }
 0x7c9   :  { %v1097_v26 = vpop.xlane.xlu1 %1096  ;;  %v540_v28 = vmul.f32 %v7510_v27, %v7892_v17 }
 0x7ca   :  { %7515 = vrcp.f32 %v1097_v26  ;;  %v5863_v26 = vld [vmem:[%s8827_s13] ss:$0 sm:$0xff] }
 0x7cc   :  { %v7512_v38 = vpop.eup %7511 }
 0x7cd   :  { %v900_v29 = vmul.f32 %v7512_v38, %v7952_v60  ;;  %v5862_v60 = vld [vmem:[%s8822_s8] ss:$0 sm:$0xff] }
 0x7cf   :  { %v902_v30 = vadd.f32 %v900_v29, %v540_v28  ;;  %v5864_v29 = vld [vmem:[%s8828_s14] ss:$0 sm:$0xff] }
 0x7d0   :  { %v7514_v31 = vpop.eup %7513 }
 0x7d1   :  { %v1261_v32 = vmul.f32 %v7514_v31, %v8006_v47 }
 0x7d3   :  { %v1263_v33 = vadd.f32 %v1261_v32, %v901_v25 }
 0x7d4   :  { %v7516_v34 = vpop.eup %7515 }
 0x7d5   :  { %v1262_v18 = vmul.f32 %v7516_v34, %v8004_v45  ;;  %v1783_v34 = vld [vmem:[%s8825_s11 + $0x30] sm:$0xff] }
 0x7d7   :  { %v1264_v61 = vadd.f32 %v1262_v18, %v902_v30  ;;  %v1784_v18 = vld [vmem:[%s8825_s11 + $0x38] sm:$0xff] }
 0x84f   :  { %v1456_v35 = vpop.xlane.xlu1 %1455 }
 0x853   :  { %v1459_v37 = vpop.xlane.xlu1 %1458 }
 0x854   :  { %7517 = vrcp.f32 %v1459_v37 }
 0x855   :  { %7519 = vrcp.f32 %v1456_v35  ;;  %v5865_v35 = vld [vmem:[%s8824_s10] ss:$0 sm:$0xff] }
 0x85e   :  { %v7518_v39 = vpop.eup %7517 }
 0x85f   :  { %v7520_v41 = vpop.eup %7519 }
 0x895   :  { %v6586_v40 = vpop.f32.mrb[18].mxu0 }
 0x896   :  { %v1624_v42 = vmul.f32 %v7518_v39, %v6586_v40  ;;  %v1612_v17 = vpop.f32.mrb[19].mxu0 }
 0x897   :  { %v1623_v43 = vmul.f32 %v7520_v41, %v1612_v17 }
 0x898   :  { %v1626_v44 = vadd.f32 %v1624_v42, %v1264_v61  ;;  %v7141_v61 = vpack.c.bf16 %v1784_v18, %v1783_v34  ;;  %v5896_v34 = vld [vmem:[%s8821_s7 + $0x98] sm:$0xff] }
 0x899   :  { %v1625_v47 = vadd.f32 %v1623_v43, %v1263_v33  ;;  %v5868_v43 = vld [vmem:[%s8826_s12] ss:$0 sm:$0xff] }
 0x89a   :  { %v1635_v49 = vadd.f32 %v5862_v60, %v1626_v44  ;;  %7142 = vmatprep.subr.bf16.mxu1 %v7141_v61 }
 0x89b   :  { %v1634_v50 = vadd.f32 %v5862_v60, %v1625_v47  ;;  %7144 = vmatpush3.bf16.msra.mxu1 %v7141_v61  ;;  %v5878_v61 = vld [vmem:[%s8820_s6 + $0x1] ss:$0 sm:$0xff] }
 0x89c   :  { %v1637_v45 = vadd.f32 %v1635_v49, %v7794_v19 }
 0x89d   :  { %v1636_v51 = vadd.f32 %v1634_v50, %v7761_v5  ;;  %v1683_v5 = vld [vmem:[%s8823_s9] sm:$0xff] }
 0x89e   :  { %v1643_v52 = vsel %vm102_vm0, %v1637_v45, 0.0  ;;  %v7121_v46 = vpack.c.bf16 %v1684_v13, %v1683_v5  ;;  %v5874_v5 = vld [vmem:[%s8819_s5 + $0x28] sm:$0xff] }
 0x89f   :  { %1644 = vadd.xlane.f32.xlu1 %v1643_v52  ;;  %v1640_v54 = vsel %vm102_vm0, %v1636_v51, 0.0 }
 0x8a0   :  { %1641 = vadd.xlane.f32.xlu0 %v1640_v54  ;;  %7122 = vmatprep.subr.bf16.mxu0 %v7121_v46 }
 0x8a1   :  { %7124 = vmatpush3.bf16.msra.mxu0 %v7121_v46  ;;  %v5875_v46 = vld [vmem:[%s8819_s5 + $0x30] sm:$0xff] }
 0x8a2   :  { %7126 = vmatprep.subr.bf16.mxu0 %v7125_v15  ;;  %v7149_v4 = vpack.c.bf16 %v5876_v3, %v5875_v46 }
 0x8a5   :  { %7128 = vmatpush3.bf16.msra.mxu0 %v7125_v15  ;;  %v5881_v15 = vld [vmem:[%s8845_s0 + $0x80] sm:$0xff] }
 0x8a6   :  { %v7153_v7 = vpack.c.bf16 %v5882_v6, %v5881_v15  ;;  %v5903_v6 = vld [vmem:[%s8845_s0 + $0xb0] sm:$0xff] }
 0x92c   :  { %v1645_v56 = vpop.xlane.xlu1 %1644 }
 0x92d   :  { %v1648_v57 = vmul.f32 0.03125, %v1645_v56  ;;  %v1642_v58 = vpop.xlane.xlu0 %1641 }
 0x92e   :  { %v1647_v59 = vmul.f32 0.03125, %v1642_v58 }
 0x92f   :  { %v1650_v62 = vsub.f32 %v1637_v45, %v1648_v57 }
 0x930   :  { %v1649_v63 = vsub.f32 %v1636_v51, %v1647_v59 }
 0x931   :  { %v1652_v0 = vmul.f32 %v1650_v62, %v1650_v62 }
 0x932   :  { %v1651_v1 = vmul.f32 %v1649_v63, %v1649_v63 }
 0x933   :  { %v1656_v2 = vsel %vm102_vm0, %v1652_v0, 0.0 }
 0x934   :  { %1657 = vadd.xlane.f32.xlu1 %v1656_v2  ;;  %v1653_v19 = vsel %vm102_vm0, %v1651_v1, 0.0 }
 0x935   :  { %1654 = vadd.xlane.f32.xlu0 %v1653_v19  ;;  %v5873_v19 = vld [vmem:[%s8819_s5 + $0x20] sm:$0xff] }
 0x936   :  { %v7145_v13 = vpack.c.bf16 %v5874_v5, %v5873_v19 }
 0x938   :  { %7146 = vmatprep.subr.bf16.mxu0 %v7145_v13 }
 0x9c1   :  { %v1658_v16 = vpop.xlane.xlu1 %1657 }
 0x9c2   :  { %v1660_v20 = vmul.f32 0.03125, %v1658_v16  ;;  %v1655_v21 = vpop.xlane.xlu0 %1654  ;;  %v5871_v16 = vld [vmem:[%s8829_s15] ss:$0 sm:$0xff] }
 0x9c3   :  { %v1659_v22 = vmul.f32 0.03125, %v1655_v21 }
 0x9c4   :  { %v1662_v23 = vadd.f32 1e-05, %v1660_v20 }
 0x9c5   :  { %v1661_v24 = vadd.f32 1e-05, %v1659_v22 }
 0x9c6   :  { %7521 = vrsqrt.f32 %v1662_v23  ;;  %v5872_v23 = vld [vmem:[%s8830_s16] ss:$0 sm:$0xff] }
 0x9c7   :  { %7523 = vrsqrt.f32 %v1661_v24 }
 0x9d0   :  { %v7522_v25 = vpop.eup %7521 }
 0x9d1   :  { %v7524_v27 = vpop.eup %7523  ;;  %v1666_v38 = vmul.f32 %v7522_v25, %v1650_v62 }
 0x9d2   :  { %v1665_v28 = vmul.f32 %v7524_v27, %v1649_v63  ;;  %v5884_v27 = vld [vmem:[%s8845_s0 + $0x98] sm:$0xff] }
 0x9d3   :  { %v1674_v30 = vmul.f32 %v5863_v26, %v1666_v38 }
 0x9d4   :  { %v1673_v31 = vmul.f32 %v5863_v26, %v1665_v28  ;;  %v5883_v26 = vld [vmem:[%s8845_s0 + $0x90] sm:$0xff] }
 0x9d5   :  { %v1682_v33 = vadd.f32 %v5864_v29, %v1674_v30  ;;  %v5893_v30 = vld [vmem:[%s8821_s7 + $0x80] sm:$0xff] }
 0x9d6   :  { %v1681_v32 = vadd.f32 %v5864_v29, %v1673_v31  ;;  %v7157_v29 = vpack.c.bf16 %v5884_v27, %v5883_v26  ;;  %v5894_v31 = vld [vmem:[%s8821_s7 + $0x88] sm:$0xff] }
 0x9d8   :  { %6595 = vmatprep.mubr.msk.f32.mxu0 %vm102_vm0, %v1681_v32 }
 0x9d9   :  { %6596 = vmatmul.mubr.msk.f32.vlgmr.msra.gmra.mrb[20].mxu0 %vm102_vm0, %v1682_v33 }
 0x9da   :  { %7148 = vmatpush3.bf16.msra.mxu0 %v7145_v13 }
 0x9db   :  { %7150 = vmatprep.subr.bf16.mxu0 %v7149_v4 }
 0x9de   :  { %7152 = vmatpush3.bf16.msra.mxu0 %v7149_v4 }
 0x9df   :  { %7154 = vmatprep.subr.bf16.mxu0 %v7153_v7 }
 0xaac   :  { %v6597_v37 = vpop.f32.mrb[20].mxu0 }
 0xaad   :  { %v1772_v39 = vadd.f32 %v6597_v37, %v5865_v35  ;;  %v1766_v40 = vpop.f32.mrb[21].mxu0 }
 0xaae   :  { %v1767_v41 = vadd.f32 %v5865_v35, %v1766_v40 }
 0xaaf   :  { %v1776_v17 = vmax.f32 %v1772_v39, 0.0 }
 0xab0   :  { %v1775_v42 = vmax.f32 %v1767_v41, 0.0 }
 0xab2   :  { %6614 = vmatprep.mubr.msk.f32.mxu1 %vm1792_vm6, %v1775_v42 }
 0xab3   :  { %6615 = vmatmul.mubr.msk.f32.vlgmr.msra.gmra.mrb[14].mxu1 %vm1792_vm6, %v1776_v17  ;;  %v5886_v17 = vld [vmem:[%s8847_s25 + $0x4] ss:$0 sm:$0xff] }
 0xb86   :  { %v6616_v60 = vpop.f32.mrb[14].mxu1 }
 0xb87   :  { %v1871_v44 = vadd.f32 %v6616_v60, %v5868_v43  ;;  %v1865_v47 = vpop.f32.mrb[15].mxu1 }
 0xb88   :  { %v1866_v49 = vadd.f32 %v5868_v43, %v1865_v47 }
 0xb89   :  { %v1875_v50 = vadd.f32 %v1871_v44, %v1682_v33  ;;  %v5895_v33 = vld [vmem:[%s8821_s7 + $0x90] sm:$0xff] }
 0xb8a   :  { %v1874_v45 = vadd.f32 %v1866_v49, %v1681_v32  ;;  %v7167_v32 = vpack.c.bf16 %v5894_v31, %v5893_v30  ;;  %v7171_v18 = vpack.c.bf16 %v5896_v34, %v5895_v33 }
 0xb8b   :  { %v1881_v51 = vsel %vm102_vm0, %v1875_v50, 0.0 }
 0xb8c   :  { %1882 = vadd.xlane.f32.xlu1 %v1881_v51  ;;  %v1878_v52 = vsel %vm102_vm0, %v1874_v45, 0.0 }
 0xb8d   :  { %1879 = vadd.xlane.f32.xlu0 %v1878_v52 }
 0xc19   :  { %v1883_v54 = vpop.xlane.xlu1 %1882 }
 0xc1a   :  { %v1885_v56 = vmul.f32 0.03125, %v1883_v54  ;;  %v1880_v57 = vpop.xlane.xlu0 %1879 }
 0xc1b   :  { %v1884_v58 = vmul.f32 0.03125, %v1880_v57 }
 0xc1c   :  { %v1887_v59 = vsub.f32 %v1875_v50, %v1885_v56 }
 0xc1d   :  { %v1886_v62 = vsub.f32 %v1874_v45, %v1884_v58 }
 0xc1e   :  { %v1889_v63 = vmul.f32 %v1887_v59, %v1887_v59 }
 0xc1f   :  { %v1888_v0 = vmul.f32 %v1886_v62, %v1886_v62 }
 0xc20   :  { %v1893_v1 = vsel %vm102_vm0, %v1889_v63, 0.0 }
 0xc21   :  { %1894 = vadd.xlane.f32.xlu1 %v1893_v1  ;;  %v1890_v2 = vsel %vm102_vm0, %v1888_v0, 0.0 }
 0xc22   :  { %1891 = vadd.xlane.f32.xlu0 %v1890_v2 }
 0xcae   :  { %v1895_v8 = vpop.xlane.xlu1 %1894 }
 0xcaf   :  { %v1897_v48 = vmul.f32 0.03125, %v1895_v8  ;;  %v1892_v9 = vpop.xlane.xlu0 %1891 }
 0xcb0   :  { %v1896_v10 = vmul.f32 0.03125, %v1892_v9 }
 0xcb1   :  { %v1899_v11 = vadd.f32 1e-05, %v1897_v48 }
 0xcb2   :  { %v1898_v12 = vadd.f32 1e-05, %v1896_v10  ;;  %v5913_v10 = vld [vmem:[%s8821_s7 + $0xa0] sm:$0xff] }
 0xcb3   :  { %7525 = vrsqrt.f32 %v1899_v11  ;;  %v5914_v11 = vld [vmem:[%s8821_s7 + $0xa8] sm:$0xff] }
 0xcb4   :  { %7527 = vrsqrt.f32 %v1898_v12  ;;  %v7193_v12 = vpack.c.bf16 %v5914_v11, %v5913_v10 }
 0xcbd   :  { %v7526_v14 = vpop.eup %7525 }
 0xcbe   :  { %v7528_v20 = vpop.eup %7527  ;;  %v1903_v21 = vmul.f32 %v7526_v14, %v1887_v59  ;;  %v5901_v59 = vld [vmem:[%s8845_s0 + $0xa0] sm:$0xff]  ;;  %v5915_v14 = vld [vmem:[%s8821_s7 + $0xb0] sm:$0xff] }
 0xcbf   :  { %v1902_v22 = vmul.f32 %v7528_v20, %v1886_v62  ;;  %v5902_v62 = vld [vmem:[%s8845_s0 + $0xa8] sm:$0xff] }
 0xcc0   :  { %v1911_v24 = vmul.f32 %v5871_v16, %v1903_v21  ;;  %v7179_v63 = vpack.c.bf16 %v5902_v62, %v5901_v59  ;;  %v5933_v59 = vld [vmem:[%s8821_s7 + $0xc0] sm:$0xff]  ;;  %v5934_v62 = vld [vmem:[%s8821_s7 + $0xc8] sm:$0xff] }
 0xcc1   :  { %v1910_v25 = vmul.f32 %v5871_v16, %v1902_v22  ;;  %v5916_v16 = vld [vmem:[%s8821_s7 + $0xb8] sm:$0xff] }
 0xcc2   :  { %v8129_v28 = vadd.f32 %v5872_v23, %v1911_v24  ;;  %v7197_v20 = vpack.c.bf16 %v5916_v16, %v5915_v14 }
 0xcc3   :  { %v8127_v38 = vadd.f32 %v5872_v23, %v1910_v25  ;;  %v5906_v23 = vld [vmem:[%s8847_s25 + $0x5] ss:$0 sm:$0xff] }
 0xcc5   :  { %6625 = vmatprep.mubr.msk.f32.mxu0 %vm102_vm0, %v8127_v38 }
 0xcc6   :  { %6626 = vmatmul.mubr.msk.f32.vlgmr.msra.gmra.mrb[22].mxu0 %vm102_vm0, %v8129_v28 }
 0xcc7   :  { %7156 = vmatpush3.bf16.msra.mxu0 %v7153_v7  ;;  %6636 = vmatprep.mubr.msk.f32.mxu0 %vm102_vm0, %v8127_v38  ;;  %v5904_v7 = vld [vmem:[%s8845_s0 + $0xb8] sm:$0xff] }
 0xcc8   :  { %7158 = vmatprep.subr.bf16.mxu0 %v7157_v29  ;;  %v7183_v48 = vpack.c.bf16 %v5904_v7, %v5903_v6 }
 0xccb   :  { %7160 = vmatpush3.bf16.msra.mxu0 %v7157_v29 }
 0xccc   :  { %7168 = vmatprep.subr.bf16.mxu0 %v7167_v32 }
 0xcce   :  { %6637 = vmatmul.mubr.msk.f32.vlgmr.msra.gmra.mrb[24].mxu0 %vm102_vm0, %v8129_v28 }
 0xccf   :  { %7170 = vmatpush3.bf16.msra.mxu0 %v7167_v32  ;;  %6654 = vmatprep.mubr.msk.f32.mxu0 %vm102_vm0, %v8127_v38 }
 0xcd0   :  { %7172 = vmatprep.subr.bf16.mxu0 %v7171_v18 }
 0xcd3   :  { %7174 = vmatpush3.bf16.msra.mxu0 %v7171_v18 }
 0xcd6   :  { %6655 = vmatmul.mubr.msk.f32.vlgmr.msra.gmra.mrb[26].mxu0 %vm102_vm0, %v8129_v28 }
 0xd99   :  { %v6627_v35 = vpop.f32.mrb[22].mxu0 }
 0xd9a   :  { %v2011_v37 = vadd.f32 %v6627_v35, %v5878_v61  ;;  %v2005_v39 = vpop.f32.mrb[23].mxu0 }
 0xd9b   :  { %v2006_v40 = vadd.f32 %v5878_v61, %v2005_v39  ;;  %v5922_v39 = vld [vmem:[%s8845_s0 + $0xc8] sm:$0xff] }
 0xd9d   :  { %v7161_v41 = vpack.c.bf16 %v2011_v37, %v2006_v40  ;;  %v8158_v42 = vpack.i.bf16 %v2011_v37, %v2006_v40  ;;  %v5921_v37 = vld [vmem:[%s8845_s0 + $0xc0] sm:$0xff] }
 0xd9e   :  { %v7205_v40 = vpack.c.bf16 %v5922_v39, %v5921_v37 }
 0xd9f   :  { %7163 = vmatprep.subr.msk.bf16.mxu1 %vm7832_vm2, %v7161_v41 }
 0xda0   :  { %7166 = vmatpush3.bf16.xpose.msk.msra.mxu1 %vm7832_vm2, %v7161_v41 }
 0xda1   :  { %v6638_v43 = vpop.f32.mrb[24].mxu0 }
 0xda2   :  { %v2093_v60 = vpop.f32.mrb[25].mxu0  ;;  %v2099_v47 = vadd.f32 %v6638_v43, %v5886_v17 }
 0xda3   :  { %v2094_v44 = vadd.f32 %v5886_v17, %v2093_v60 }
 0xda5   :  { %6643 = vmatprep.mubr.msk.f32.mxu1 %vm270_vm1, %v2094_v44 }
 0xda7   :  { %6644 = vmatmul.mubr.msk.f32.vlgmr.msra.gmra.mrb[16].mxu1 %vm270_vm1, %v2099_v47 }
 0xda9   :  { %v6656_v49 = vpop.f32.mrb[26].mxu0 }
 0xdaa   :  { %v2278_v50 = vpop.f32.mrb[27].mxu0 }
 0xdab   :  { %v7175_v45 = vpack.c.bf16 %v6656_v49, %v2278_v50 }
 0xdad   :  { %7176 = vmatprep.subr.bf16.mxu1 %v7175_v45 }
 0xdae   :  { %7178 = vmatpush3.bf16.msra.mxu1 %v7175_v45 }
 0xdaf   :  { %7180 = vmatprep.subr.bf16.mxu1 %v7179_v63 }
 0xe7a   :  { %v6645_v51 = vpop.f32.mrb[16].mxu1 }
 0xe7b   :  { %v2186_v52 = vadd.f32 %v6645_v51, %v7857_v55  ;;  %v2180_v54 = vpop.f32.mrb[17].mxu1 }
 0xe7c   :  { %v2181_v56 = vadd.f32 %v2180_v54, %v7855_v53  ;;  %v5923_v54 = vld [vmem:[%s8845_s0 + $0xd0] sm:$0xff] }
 0xe7d   :  { %v2192_v57 = vsel %vm358_vm5, %v2186_v52, -inf }
 0xe7e   :  { %2193 = vmax.xlane.f32.xlu1 %v2192_v57  ;;  %v2189_v58 = vsel %vm358_vm5, %v2181_v56, -inf }
 0xe7f   :  { %2190 = vmax.xlane.f32.xlu0 %v2189_v58 }
 0xe95   :  { %7460 = vrot.lane.b32.xlu0 %v8158_v42, %s7634_s3 }
 0xf0b   :  { %v2194_v0 = vpop.xlane.xlu1 %2193 }
 0xf0c   :  { %v2196_v1 = vsub.f32 %v2186_v52, %v2194_v0  ;;  %v2191_v2 = vpop.xlane.xlu0 %2190  ;;  %v5935_v0 = vld [vmem:[%s8821_s7 + $0xd0] sm:$0xff] }
 0xf0d   :  { %v2195_v19 = vsub.f32 %v2181_v56, %v2191_v2  ;;  %v5924_v56 = vld [vmem:[%s8845_s0 + $0xd8] sm:$0xff] }
 0xf0e   :  { %v2199_v5 = vmul.f32 1.442695, %v2196_v1  ;;  %v7209_v57 = vpack.c.bf16 %v5924_v56, %v5923_v54  ;;  %v5936_v1 = vld [vmem:[%s8821_s7 + $0xd8] sm:$0xff] }
 0xf0f   :  { %v2197_v13 = vmul.f32 1.442695, %v2195_v19  ;;  %v7223_v2 = vpack.c.bf16 %v5936_v1, %v5935_v0 }
 0xf10   :  { %v7461_v46 = vpop.permute.xlu0 %7460 }
 0xf11   :  { %7529 = vpow2.f32 %v2197_v13  ;;  %v7463_v3 = vunpack.i.h.bf16 %v7461_v46  ;;  %v7462_v4 = vunpack.i.l.bf16 %v7461_v46  ;;  %v5926_v13 = vld [vmem:[%s8847_s25 + $0x6] ss:$0 sm:$0xff] }
 0xf12   :  { %7531 = vpow2.f32 %v2199_v5 }
 0xf13   :  { %v7187_v15 = vpack.c.bf16 %v7463_v3, %v7462_v4 }
 0xf15   :  { %7189 = vmatprep.subr.msk.bf16.mxu0 %vm7832_vm2, %v7187_v15 }
 0xf16   :  { %7192 = vmatpush3.bf16.xpose.msk.msra.mxu0 %vm7832_vm2, %v7187_v15 }
 0xf1b   :  { %v8191_v8 = vpop.eup %7529 }
 0xf1c   :  { %v8193_v9 = vpop.eup %7531  ;;  %6661 = vmatprep.mubr.msk.f32.mxu1 %vm358_vm5, %v8191_v8 }
 0xf1d   :  { %6662 = vmatmul.mubr.msk.f32.vlgmr.msra.gmra.mrb[18].mxu1 %vm358_vm5, %v8193_v9 }
 0xf1e   :  { %7182 = vmatpush3.bf16.msra.mxu1 %v7179_v63  ;;  %6672 = vmatprep.mubr.msk.f32.mxu1 %vm102_vm0, %v8127_v38  ;;  %v7219_v63 = vpack.c.bf16 %v5934_v62, %v5933_v59 }
 0xf1f   :  { %7184 = vmatprep.subr.bf16.mxu1 %v7183_v48 }
 0xf22   :  { %7186 = vmatpush3.bf16.msra.mxu1 %v7183_v48 }
 0xf23   :  { %7194 = vmatprep.subr.bf16.mxu1 %v7193_v12 }
 0xf25   :  { %6673 = vmatmul.mubr.msk.f32.vlgmr.msra.gmra.mrb[20].mxu1 %vm102_vm0, %v8129_v28 }
 0xf26   :  { %7196 = vmatpush3.bf16.msra.mxu1 %v7193_v12  ;;  %6690 = vmatprep.mubr.msk.f32.mxu1 %vm102_vm0, %v8127_v38 }
 0xf27   :  { %7198 = vmatprep.subr.bf16.mxu1 %v7197_v20 }
 0xf2a   :  { %7200 = vmatpush3.bf16.msra.mxu1 %v7197_v20 }
 0xf2d   :  { %6691 = vmatmul.mubr.msk.f32.vlgmr.msra.gmra.mrb[22].mxu1 %vm102_vm0, %v8129_v28 }
 0xff0   :  { %v8219_v21 = vpop.f32.mrb[18].mxu1 }
 0xff1   :  { %v8221_v22 = vpop.f32.mrb[19].mxu1 }
 0xff8   :  { %v6674_v24 = vpop.f32.mrb[20].mxu1 }
 0xff9   :  { %v2451_v25 = vpop.f32.mrb[21].mxu1  ;;  %v2457_v27 = vadd.f32 %v6674_v24, %v5906_v23  ;;  %v5942_v24 = vld [vmem:[%s8845_s0 + $0xe8] sm:$0xff] }
 0xffa   :  { %v2452_v26 = vadd.f32 %v5906_v23, %v2451_v25  ;;  %v5941_v23 = vld [vmem:[%s8845_s0 + $0xe0] sm:$0xff] }
 0xffb   :  { %v7231_v25 = vpack.c.bf16 %v5942_v24, %v5941_v23 }
 0xffc   :  { %6679 = vmatprep.mubr.msk.f32.mxu0 %vm270_vm1, %v2452_v26  ;;  %v2204_v26 = vsel %vm358_vm5, %v8193_v9, 0.0  ;;  %v5943_v9 = vld [vmem:[%s8845_s0 + $0xf0] sm:$0xff] }
 0xffd   :  { %6680 = vmatmul.mubr.msk.f32.vlgmr.msra.gmra.mrb[28].mxu0 %vm270_vm1, %v2457_v27 }
0x1000   :  { %v6692_v29 = vpop.f32.mrb[22].mxu1 }
0x1001   :  { %v2638_v30 = vpop.f32.mrb[23].mxu1 }
0x1002   :  { %v7201_v31 = vpack.c.bf16 %v6692_v29, %v2638_v30 }
0x1004   :  { %7202 = vmatprep.subr.bf16.mxu0 %v7201_v31 }
0x1005   :  { %7204 = vmatpush3.bf16.msra.mxu0 %v7201_v31 }
0x1006   :  { %7206 = vmatprep.subr.bf16.mxu0 %v7205_v40 }
0x10d0   :  { %v6681_v32 = vpop.f32.mrb[28].mxu0 }
0x10d1   :  { %v2540_v33 = vpop.f32.mrb[29].mxu0  ;;  %v2546_v18 = vadd.f32 %v6681_v32, %v7857_v55 }
0x10d2   :  { %v2541_v34 = vadd.f32 %v2540_v33, %v7855_v53 }
0x10d3   :  { %v2552_v35 = vsel %vm358_vm5, %v2546_v18, -inf }
0x10d4   :  { %v2549_v61 = vsel %vm358_vm5, %v2541_v34, -inf }
0x10d5   :  { %2550 = vmax.xlane.f32.xlu1 %v2549_v61 }
0x10d9   :  { %2553 = vmax.xlane.f32.xlu1 %v2552_v35  ;;  %v5944_v35 = vld [vmem:[%s8845_s0 + $0xf8] sm:$0xff] }
0x10da   :  { %v7235_v39 = vpack.c.bf16 %v5944_v35, %v5943_v9 }
0x10ea   :  { %7465 = vrot.lane.b32.xlu1 %v8158_v42, %s7636_s26 }
0x1162   :  { %v2551_v41 = vpop.xlane.xlu1 %2550 }
0x1163   :  { %v2555_v17 = vsub.f32 %v2541_v34, %v2551_v41  ;;  %v5953_v41 = vld [vmem:[%s8821_s7 + $0xe0] sm:$0xff] }
0x1165   :  { %v2557_v43 = vmul.f32 1.442695, %v2555_v17  ;;  %v5954_v17 = vld [vmem:[%s8821_s7 + $0xe8] sm:$0xff] }
0x1166   :  { %v2554_v60 = vpop.xlane.xlu1 %2553 }
0x1167   :  { %7533 = vpow2.f32 %v2557_v43  ;;  %v2556_v44 = vsub.f32 %v2546_v18, %v2554_v60  ;;  %v7245_v43 = vpack.c.bf16 %v5954_v17, %v5953_v41  ;;  %v5955_v60 = vld [vmem:[%s8821_s7 + $0xf0] sm:$0xff] }
0x1169   :  { %v2559_v47 = vmul.f32 1.442695, %v2556_v44  ;;  %v5956_v44 = vld [vmem:[%s8821_s7 + $0xf8] sm:$0xff] }
0x116a   :  { %v7466_v49 = vpop.permute.xlu1 %7465 }
0x116b   :  { %7535 = vpow2.f32 %v2559_v47  ;;  %v7468_v50 = vunpack.i.h.bf16 %v7466_v49  ;;  %v7467_v45 = vunpack.i.l.bf16 %v7466_v49  ;;  %v7249_v47 = vpack.c.bf16 %v5956_v44, %v5955_v60 }
0x116d   :  { %v7213_v51 = vpack.c.bf16 %v7468_v50, %v7467_v45  ;;  %v5946_v45 = vld [vmem:[%s8847_s25 + $0x7] ss:$0 sm:$0xff] }
0x116f   :  { %7215 = vmatprep.subr.msk.bf16.mxu1 %vm7832_vm2, %v7213_v51 }
0x1170   :  { %7218 = vmatpush3.bf16.xpose.msk.msra.mxu1 %vm7832_vm2, %v7213_v51 }
0x1171   :  { %v8244_v52 = vpop.eup %7533 }
0x1172   :  { %6697 = vmatprep.mubr.msk.f32.mxu0 %vm358_vm5, %v8244_v52 }
0x1175   :  { %v8254_v58 = vpop.eup %7535 }
0x1176   :  { %6698 = vmatmul.mubr.msk.f32.vlgmr.msra.gmra.mrb[30].mxu0 %vm358_vm5, %v8254_v58 }
0x1177   :  { %7208 = vmatpush3.bf16.msra.mxu0 %v7205_v40  ;;  %6708 = vmatprep.mubr.msk.f32.mxu0 %vm102_vm0, %v8127_v38 }
0x1178   :  { %7210 = vmatprep.subr.bf16.mxu0 %v7209_v57 }
0x117b   :  { %7212 = vmatpush3.bf16.msra.mxu0 %v7209_v57 }
0x117c   :  { %7220 = vmatprep.subr.bf16.mxu0 %v7219_v63 }
0x117e   :  { %6709 = vmatmul.mubr.msk.f32.vlgmr.msra.gmra.mrb[32].mxu0 %vm102_vm0, %v8129_v28 }
0x117f   :  { %7222 = vmatpush3.bf16.msra.mxu0 %v7219_v63  ;;  %6726 = vmatprep.mubr.msk.f32.mxu0 %vm102_vm0, %v8127_v38 }
0x1180   :  { %7224 = vmatprep.subr.bf16.mxu0 %v7223_v2 }
0x1183   :  { %7226 = vmatpush3.bf16.msra.mxu0 %v7223_v2 }
0x1186   :  { %6727 = vmatmul.mubr.msk.f32.vlgmr.msra.gmra.mrb[34].mxu0 %vm102_vm0, %v8129_v28 }
0x1249   :  { %v8278_v19 = vpop.f32.mrb[30].mxu0 }
0x124a   :  { %v8280_v5 = vpop.f32.mrb[31].mxu0 }
0x1251   :  { %v6710_v46 = vpop.f32.mrb[32].mxu0 }
0x1252   :  { %v2813_v3 = vpop.f32.mrb[33].mxu0  ;;  %v2819_v15 = vadd.f32 %v6710_v46, %v5926_v13 }
0x1253   :  { %v2814_v4 = vadd.f32 %v5926_v13, %v2813_v3 }
0x1255   :  { %6715 = vmatprep.mubr.msk.f32.mxu1 %vm270_vm1, %v2814_v4  ;;  %v2201_v4 = vsel %vm358_vm5, %v8191_v8, 0.0 }
0x1256   :  { %6716 = vmatmul.mubr.msk.f32.vlgmr.msra.gmra.mrb[24].mxu1 %vm270_vm1, %v2819_v15  ;;  %v2561_v15 = vsel %vm358_vm5, %v8244_v52, 0.0 }
0x1259   :  { %v6728_v6 = vpop.f32.mrb[34].mxu0 }
0x125a   :  { %v3000_v7 = vpop.f32.mrb[35].mxu0 }
0x125b   :  { %v7227_v48 = vpack.c.bf16 %v6728_v6, %v3000_v7  ;;  %v2564_v6 = vsel %vm358_vm5, %v8254_v58, 0.0 }
0x125d   :  { %7228 = vmatprep.subr.bf16.mxu1 %v7227_v48 }
0x125e   :  { %7230 = vmatpush3.bf16.msra.mxu1 %v7227_v48 }
0x125f   :  { %7232 = vmatprep.subr.bf16.mxu1 %v7231_v25 }
0x1329   :  { %v6717_v10 = vpop.f32.mrb[24].mxu1 }
0x132a   :  { %v2908_v11 = vadd.f32 %v6717_v10, %v7857_v55  ;;  %v2902_v12 = vpop.f32.mrb[25].mxu1 }
0x132b   :  { %v2903_v14 = vadd.f32 %v2902_v12, %v7855_v53 }
0x132c   :  { %v2914_v16 = vsel %vm358_vm5, %v2908_v11, -inf }
0x132d   :  { %2915 = vmax.xlane.f32.xlu1 %v2914_v16  ;;  %v2911_v20 = vsel %vm358_vm5, %v2903_v14, -inf }
0x132e   :  { %2912 = vmax.xlane.f32.xlu0 %v2911_v20 }
0x1344   :  { %7470 = vrot.lane.b32.xlu0 %v8158_v42, %s7637_s21 }
0x1363   :  { %2205 = vadd.xlane.f32.xlu0 %v2204_v26 }
0x13ba   :  { %v2916_v27 = vpop.xlane.xlu1 %2915 }
0x13bb   :  { %v2918_v29 = vsub.f32 %v2908_v11, %v2916_v27  ;;  %v2913_v30 = vpop.xlane.xlu0 %2912 }
0x13bc   :  { %v2917_v31 = vsub.f32 %v2903_v14, %v2913_v30 }
0x13bd   :  { %v2921_v32 = vmul.f32 1.442695, %v2918_v29 }
0x13be   :  { %v2919_v42 = vmul.f32 1.442695, %v2917_v31 }
0x13bf   :  { %v7471_v33 = vpop.permute.xlu0 %7470 }
0x13c0   :  { %7537 = vpow2.f32 %v2919_v42  ;;  %v7473_v34 = vunpack.i.h.bf16 %v7471_v33  ;;  %v7472_v18 = vunpack.i.l.bf16 %v7471_v33 }
0x13c1   :  { %7539 = vpow2.f32 %v2921_v32 }
0x13c2   :  { %v7239_v61 = vpack.c.bf16 %v7473_v34, %v7472_v18 }
0x13c4   :  { %7241 = vmatprep.subr.msk.bf16.mxu0 %vm7832_vm2, %v7239_v61 }
0x13c5   :  { %7244 = vmatpush3.bf16.xpose.msk.msra.mxu0 %vm7832_vm2, %v7239_v61 }
0x13ca   :  { %v7538_v37 = vpop.eup %7537 }
0x13cb   :  { %v7540_v40 = vpop.eup %7539  ;;  %6733 = vmatprep.mubr.msk.f32.mxu1 %vm358_vm5, %v7538_v37  ;;  %v2923_v7 = vsel %vm358_vm5, %v7538_v37, 0.0 }
0x13cc   :  { %6734 = vmatmul.mubr.msk.f32.vlgmr.msra.gmra.mrb[26].mxu1 %vm358_vm5, %v7540_v40  ;;  %v2926_v48 = vsel %vm358_vm5, %v7540_v40, 0.0 }
0x13cd   :  { %7234 = vmatpush3.bf16.msra.mxu1 %v7231_v25  ;;  %6744 = vmatprep.mubr.msk.f32.mxu1 %vm102_vm0, %v8127_v38 }
0x13ce   :  { %7236 = vmatprep.subr.bf16.mxu1 %v7235_v39 }
0x13d1   :  { %7238 = vmatpush3.bf16.msra.mxu1 %v7235_v39 }
0x13d2   :  { %7246 = vmatprep.subr.bf16.mxu1 %v7245_v43 }
0x13d4   :  { %6745 = vmatmul.mubr.msk.f32.vlgmr.msra.gmra.mrb[28].mxu1 %vm102_vm0, %v8129_v28 }
0x13d5   :  { %7248 = vmatpush3.bf16.msra.mxu1 %v7245_v43  ;;  %6762 = vmatprep.mubr.msk.f32.mxu1 %vm102_vm0, %v8127_v38 }
0x13d6   :  { %7250 = vmatprep.subr.bf16.mxu1 %v7249_v47 }
0x13d9   :  { %7252 = vmatpush3.bf16.msra.mxu1 %v7249_v47 }
0x13dc   :  { %6763 = vmatmul.mubr.msk.f32.vlgmr.msra.gmra.mrb[30].mxu1 %vm102_vm0, %v8129_v28 }
0x13f0   :  { %v2206_v52 = vpop.xlane.xlu0 %2205 }
0x149f   :  { %v8333_v49 = vpop.f32.mrb[26].mxu1 }
0x14a0   :  { %v8335_v50 = vpop.f32.mrb[27].mxu1 }
0x14a7   :  { %v6746_v51 = vpop.f32.mrb[28].mxu1 }
0x14a8   :  { %v3175_v54 = vpop.f32.mrb[29].mxu1  ;;  %v3181_v57 = vadd.f32 %v6746_v51, %v5946_v45 }
0x14a9   :  { %v3176_v56 = vadd.f32 %v5946_v45, %v3175_v54 }
0x14ab   :  { %6751 = vmatprep.mubr.msk.f32.mxu0 %vm270_vm1, %v3176_v56 }
0x14ac   :  { %6752 = vmatmul.mubr.msk.f32.vlgmr.msra.gmra.mrb[36].mxu0 %vm270_vm1, %v3181_v57 }
0x14af   :  { %v6764_v59 = vpop.f32.mrb[30].mxu1 }
0x14b0   :  { %v3362_v62 = vpop.f32.mrb[31].mxu1 }
0x14b1   :  { %v7253_v63 = vpack.c.bf16 %v6764_v59, %v3362_v62 }
0x14b3   :  { %7254 = vmatprep.subr.bf16.mxu0 %v7253_v63 }
0x14b4   :  { %7256 = vmatpush3.bf16.msra.mxu0 %v7253_v63 }
0x157f   :  { %v6753_v0 = vpop.f32.mrb[36].mxu0 }
0x1580   :  { %v3264_v1 = vpop.f32.mrb[37].mxu0  ;;  %v3270_v13 = vadd.f32 %v6753_v0, %v7857_v55 }
0x1581   :  { %v3265_v2 = vadd.f32 %v3264_v1, %v7855_v53 }
0x1582   :  { %v3276_v3 = vsel %vm358_vm5, %v3270_v13, -inf }
0x1583   :  { %v3273_v46 = vsel %vm358_vm5, %v3265_v2, -inf }
0x1584   :  { %3274 = vmax.xlane.f32.xlu1 %v3273_v46 }
0x1588   :  { %3277 = vmax.xlane.f32.xlu1 %v3276_v3 }
0x158c   :  { %2202 = vadd.xlane.f32.xlu1 %v2201_v4 }
0x1590   :  { %2562 = vadd.xlane.f32.xlu1 %v2561_v15 }
0x1594   :  { %2565 = vadd.xlane.f32.xlu1 %v2564_v6 }
0x1598   :  { %2924 = vadd.xlane.f32.xlu1 %v2923_v7 }
0x159c   :  { %2927 = vadd.xlane.f32.xlu1 %v2926_v48 }
0x1611   :  { %v3275_v10 = vpop.xlane.xlu1 %3274 }
0x1612   :  { %v3279_v11 = vsub.f32 %v3265_v2, %v3275_v10  ;;  %v5967_v10 = vld [vmem:[%s8823_s9 + $0x20] sm:$0xff] }
0x1614   :  { %v3281_v12 = vmul.f32 1.442695, %v3279_v11  ;;  %v5968_v11 = vld [vmem:[%s8823_s9 + $0x28] sm:$0xff] }
0x1615   :  { %v3278_v14 = vpop.xlane.xlu1 %3277 }
0x1616   :  { %7541 = vpow2.f32 %v3281_v12  ;;  %v3280_v8 = vsub.f32 %v3270_v13, %v3278_v14  ;;  %v7257_v12 = vpack.c.bf16 %v5968_v11, %v5967_v10  ;;  %v5969_v14 = vld [vmem:[%s8823_s9 + $0x30] sm:$0xff] }
0x1618   :  { %v3283_v16 = vmul.f32 1.442695, %v3280_v8  ;;  %7258 = vmatprep.subr.bf16.mxu0 %v7257_v12  ;;  %v5970_v8 = vld [vmem:[%s8823_s9 + $0x38] sm:$0xff] }
0x1619   :  { %v2203_v20 = vpop.xlane.xlu1 %2202 }
0x161a   :  { %7543 = vpow2.f32 %v3283_v16  ;;  %v7261_v16 = vpack.c.bf16 %v5970_v8, %v5969_v14 }
0x161b   :  { %7545 = vrcp.f32 %v2203_v20  ;;  %v3762_v20 = vld [vmem:[%s8832_s18] sm:$0xff] }
0x161d   :  { %v2563_v23 = vpop.xlane.xlu1 %2562 }
0x161e   :  { %7547 = vrcp.f32 %v2563_v23 }
0x161f   :  { %7549 = vrcp.f32 %v2206_v52  ;;  %v3763_v52 = vld [vmem:[%s8832_s18 + $0x8] sm:$0xff] }
0x1620   :  { %v7542_v58 = vpop.eup %7541  ;;  %v7281_v23 = vpack.c.bf16 %v3763_v52, %v3762_v20  ;;  %v3759_v20 = vld [vmem:[%s8831_s17 + $0x8] sm:$0xff] }
0x1621   :  { %6769 = vmatprep.mubr.msk.f32.mxu0 %vm358_vm5, %v7542_v58  ;;  %v2566_v24 = vpop.xlane.xlu1 %2565  ;;  %v3285_v25 = vsel %vm358_vm5, %v7542_v58, 0.0  ;;  %v5975_v58 = vld [vmem:[%s8825_s11 + $0x40] sm:$0xff] }
0x1622   :  { %7551 = vrcp.f32 %v2566_v24  ;;  %3286 = vadd.xlane.f32.xlu1 %v3285_v25  ;;  %v5976_v24 = vld [vmem:[%s8825_s11 + $0x48] sm:$0xff]  ;;  %v5977_v25 = vld [vmem:[%s8825_s11 + $0x50] sm:$0xff] }
0x1624   :  { %v7544_v26 = vpop.eup %7543 }
0x1625   :  { %6770 = vmatmul.mubr.msk.f32.vlgmr.msra.gmra.mrb[38].mxu0 %vm358_vm5, %v7544_v26  ;;  %v2925_v27 = vpop.xlane.xlu1 %2924  ;;  %v3288_v29 = vsel %vm358_vm5, %v7544_v26, 0.0  ;;  %v7546_v30 = vpop.eup %7545  ;;  %v7265_v26 = vpack.c.bf16 %v5976_v24, %v5975_v58  ;;  %v3761_v58 = vld [vmem:[%s8831_s17 + $0x18] sm:$0xff] }
0x1626   :  { %7553 = vrcp.f32 %v2925_v27  ;;  %3289 = vadd.xlane.f32.xlu1 %v3288_v29  ;;  %v2370_v42 = vmul.f32 %v7546_v30, %v8221_v22  ;;  %7260 = vmatpush3.bf16.msra.mxu0 %v7257_v12  ;;  %v5978_v27 = vld [vmem:[%s8825_s11 + $0x58] sm:$0xff]  ;;  %v5979_v30 = vld [vmem:[%s8825_s11 + $0x60] sm:$0xff] }
0x1627   :  { %7262 = vmatprep.subr.bf16.mxu0 %v7261_v16  ;;  %v7269_v29 = vpack.c.bf16 %v5978_v27, %v5977_v25  ;;  %7266 = vmatprep.subr.bf16.mxu1 %v7265_v26  ;;  %v6004_v25 = vld [vmem:[%s8845_s0 + $0x100] sm:$0xff] }
0x1628   :  { %v7548_v31 = vpop.eup %7547  ;;  %7268 = vmatpush3.bf16.msra.mxu1 %v7265_v26  ;;  %v6005_v26 = vld [vmem:[%s8845_s0 + $0x108] sm:$0xff]  ;;  %v5996_v27 = vld [vmem:[%s8819_s5 + $0x40] sm:$0xff] }
0x1629   :  { %v2928_v32 = vpop.xlane.xlu1 %2927  ;;  %v2730_v33 = vmul.f32 %v7548_v31, %v8280_v5  ;;  %v7550_v34 = vpop.eup %7549  ;;  %v5980_v31 = vld [vmem:[%s8825_s11 + $0x68] sm:$0xff]  ;;  %7270 = vmatprep.subr.bf16.mxu1 %v7269_v29 }
0x162a   :  { %7555 = vrcp.f32 %v2928_v32  ;;  %v2371_v9 = vmul.f32 %v7550_v34, %v8219_v21  ;;  %7264 = vmatpush3.bf16.msra.mxu0 %v7261_v16  ;;  %v7273_v32 = vpack.c.bf16 %v5980_v31, %v5979_v30  ;;  %v3758_v16 = vld [vmem:[%s8831_s17] sm:$0xff]  ;;  %v5997_v30 = vld [vmem:[%s8819_s5 + $0x48] sm:$0xff] }
0x162b   :  { %v2732_v18 = vadd.f32 %v2730_v33, %v2370_v42  ;;  %7282 = vmatprep.subr.bf16.mxu0 %v7281_v23  ;;  %v7289_v52 = vpack.c.bf16 %v3759_v20, %v3758_v16  ;;  %v7297_v31 = vpack.c.bf16 %v5997_v30, %v5996_v27 }
0x162c   :  { %v7552_v61 = vpop.eup %7551  ;;  %7272 = vmatpush3.bf16.msra.mxu1 %v7269_v29  ;;  %v7305_v29 = vpack.c.bf16 %v6005_v26, %v6004_v25  ;;  %v6025_v25 = vld [vmem:[%s8845_s0 + $0x128] sm:$0xff] }
0x162d   :  { %v2731_v35 = vmul.f32 %v7552_v61, %v8278_v19  ;;  %7274 = vmatprep.subr.bf16.mxu1 %v7273_v32 }
0x162f   :  { %v2733_v37 = vadd.f32 %v2731_v35, %v2371_v9 }
0x1630   :  { %v7554_v39 = vpop.eup %7553  ;;  %7276 = vmatpush3.bf16.msra.mxu1 %v7273_v32 }
0x1631   :  { %v3092_v40 = vmul.f32 %v7554_v39, %v8335_v50  ;;  %v5962_v50 = vld [vmem:[%s8822_s8 + $0x1] ss:$0 sm:$0xff] }
0x1633   :  { %v3094_v41 = vadd.f32 %v3092_v40, %v2732_v18  ;;  %v5966_v40 = vld [vmem:[%s8828_s14 + $0x1] ss:$0 sm:$0xff] }
0x1634   :  { %v7556_v17 = vpop.eup %7555 }
0x1635   :  { %v3093_v43 = vmul.f32 %v7556_v17, %v8333_v49 }
0x1637   :  { %v3095_v60 = vadd.f32 %v3093_v43, %v2733_v37  ;;  %v5965_v37 = vld [vmem:[%s8827_s13 + $0x1] ss:$0 sm:$0xff] }
0x16af   :  { %v3287_v22 = vpop.xlane.xlu1 %3286 }
0x16b3   :  { %v3290_v44 = vpop.xlane.xlu1 %3289 }
0x16b4   :  { %7557 = vrcp.f32 %v3290_v44  ;;  %v3765_v44 = vld [vmem:[%s8832_s18 + $0x18] sm:$0xff] }
0x16b5   :  { %7559 = vrcp.f32 %v3287_v22  ;;  %v3764_v22 = vld [vmem:[%s8832_s18 + $0x10] sm:$0xff] }
0x16be   :  { %v7558_v5 = vpop.eup %7557 }
0x16bf   :  { %v7560_v45 = vpop.eup %7559 }
0x16f8   :  { %v6771_v47 = vpop.f32.mrb[38].mxu0 }
0x16f9   :  { %v3455_v51 = vmul.f32 %v7558_v5, %v6771_v47  ;;  %v3443_v21 = vpop.f32.mrb[39].mxu0 }
0x16fa   :  { %v3454_v54 = vmul.f32 %v7560_v45, %v3443_v21  ;;  %v7285_v45 = vpack.c.bf16 %v3765_v44, %v3764_v22  ;;  %v5982_v21 = vld [vmem:[%s8825_s11 + $0x78] sm:$0xff]  ;;  %v6006_v44 = vld [vmem:[%s8845_s0 + $0x110] sm:$0xff] }
0x16fb   :  { %v3457_v19 = vadd.f32 %v3455_v51, %v3095_v60  ;;  %v5981_v51 = vld [vmem:[%s8825_s11 + $0x70] sm:$0xff] }
0x16fc   :  { %v3456_v56 = vadd.f32 %v3454_v54, %v3094_v41  ;;  %v7277_v54 = vpack.c.bf16 %v5982_v21, %v5981_v51  ;;  %v5999_v51 = vld [vmem:[%s8819_s5 + $0x58] sm:$0xff] }
0x16fd   :  { %v3467_v59 = vadd.f32 %v5962_v50, %v3457_v19 }
0x16fe   :  { %v3466_v57 = vadd.f32 %v5962_v50, %v3456_v56  ;;  %7278 = vmatprep.subr.bf16.mxu1 %v7277_v54 }
0x16ff   :  { %v3469_v63 = vadd.f32 %v3467_v59, %v8129_v28  ;;  %7280 = vmatpush3.bf16.msra.mxu1 %v7277_v54  ;;  %v6016_v54 = vld [vmem:[%s8821_s7 + $0x100] sm:$0xff] }
0x1700   :  { %v3468_v49 = vadd.f32 %v3466_v57, %v8127_v38  ;;  %7298 = vmatprep.subr.bf16.mxu1 %v7297_v31 }
0x1701   :  { %v3477_v0 = vsel %vm102_vm0, %v3469_v63, 0.0 }
0x1702   :  { %v3474_v62 = vsel %vm102_vm0, %v3468_v49, 0.0 }
0x1703   :  { %3475 = vadd.xlane.f32.xlu1 %v3474_v62 }
0x1707   :  { %3478 = vadd.xlane.f32.xlu1 %v3477_v0 }
0x1790   :  { %v3476_v1 = vpop.xlane.xlu1 %3475 }
0x1791   :  { %v3480_v2 = vmul.f32 0.03125, %v3476_v1 }
0x1793   :  { %v3482_v13 = vsub.f32 %v3468_v49, %v3480_v2  ;;  %v5984_v49 = vld [vmem:[%s8826_s12 + $0x1] ss:$0 sm:$0xff] }
0x1794   :  { %v3479_v46 = vpop.xlane.xlu1 %3478 }
0x1795   :  { %v3481_v3 = vmul.f32 0.03125, %v3479_v46  ;;  %v3484_v4 = vmul.f32 %v3482_v13, %v3482_v13 }
0x1797   :  { %v3483_v15 = vsub.f32 %v3469_v63, %v3481_v3  ;;  %v3486_v6 = vsel %vm102_vm0, %v3484_v4, 0.0 }
0x1798   :  { %3487 = vadd.xlane.f32.xlu0 %v3486_v6 }
0x1799   :  { %v3485_v7 = vmul.f32 %v3483_v15, %v3483_v15 }
0x179b   :  { %v3489_v48 = vsel %vm102_vm0, %v3485_v7, 0.0 }
0x179c   :  { %3490 = vadd.xlane.f32.xlu1 %v3489_v48 }
0x1825   :  { %v3488_v42 = vpop.xlane.xlu0 %3487 }
0x1826   :  { %v3492_v33 = vmul.f32 0.03125, %v3488_v42 }
0x1828   :  { %v3494_v34 = vadd.f32 1e-05, %v3492_v33 }
0x1829   :  { %v3491_v18 = vpop.xlane.xlu1 %3490 }
0x182a   :  { %7561 = vrsqrt.f32 %v3494_v34  ;;  %v3493_v61 = vmul.f32 0.03125, %v3491_v18 }
0x182c   :  { %v3495_v9 = vadd.f32 1e-05, %v3493_v61 }
0x182e   :  { %7563 = vrsqrt.f32 %v3495_v9 }
0x1834   :  { %v7562_v35 = vpop.eup %7561 }
0x1835   :  { %v3498_v39 = vmul.f32 %v7562_v35, %v3482_v13  ;;  %v5989_v35 = vld [vmem:[%s8829_s15 + $0x1] ss:$0 sm:$0xff] }
0x1837   :  { %v3506_v41 = vmul.f32 %v5965_v37, %v3498_v39 }
0x1838   :  { %v7564_v17 = vpop.eup %7563 }
0x1839   :  { %v3499_v43 = vmul.f32 %v7564_v17, %v3483_v15  ;;  %v3514_v60 = vadd.f32 %v5966_v40, %v3506_v41  ;;  %v5990_v41 = vld [vmem:[%s8830_s16 + $0x1] ss:$0 sm:$0xff] }
0x183b   :  { %v3507_v5 = vmul.f32 %v5965_v37, %v3499_v43  ;;  %6780 = vmatprep.mubr.msk.f32.mxu0 %vm102_vm0, %v3514_v60 }
0x183d   :  { %v3515_v47 = vadd.f32 %v5966_v40, %v3507_v5  ;;  %v6007_v5 = vld [vmem:[%s8845_s0 + $0x118] sm:$0xff] }
0x183f   :  { %6781 = vmatmul.mubr.msk.f32.vlgmr.msra.gmra.mrb[40].mxu0 %vm102_vm0, %v3515_v47 }
0x1840   :  { %7284 = vmatpush3.bf16.msra.mxu0 %v7281_v23  ;;  %6810 = vmatprep.mubr.msk.f32.mxu0 %vm102_vm0, %v8127_v38  ;;  %v5972_v38 = vld [vmem:[%s8824_s10 + $0x1] ss:$0 sm:$0xff]  ;;  %v3760_v23 = vld [vmem:[%s8831_s17 + $0x10] sm:$0xff] }
0x1841   :  { %7286 = vmatprep.subr.bf16.mxu0 %v7285_v45  ;;  %v7293_v24 = vpack.c.bf16 %v3761_v58, %v3760_v23 }
0x1844   :  { %7288 = vmatpush3.bf16.msra.mxu0 %v7285_v45  ;;  %v5998_v45 = vld [vmem:[%s8819_s5 + $0x50] sm:$0xff]  ;;  %s5776_s5 = sshll.u32 %s7638_s30, 4  ;;  %s5777_s5 = int_to_ptr.vmem [resolvable:$true] %s5776_s5 }
0x1845   :  { %7290 = vmatprep.subr.bf16.mxu0 %v7289_v52  ;;  %v7301_v21 = vpack.c.bf16 %v5999_v51, %v5998_v45  ;;  %v6029_v45 = vld [vmem:[%s8847_s25 + $0x9] ss:$0 sm:$0xff]  ;;  %s7609_s1 = scalar_lea.vmem %s5777_s5, 256  ;;  %p7614_p1 = scmp.lt.s32.totalorder %s5777_s5, %s5777_s5 }
0x1846   :  { %p7610_p0 = scmp.ne.s32.totalorder %s5777_s5, %s7609_s1  ;;  %p7615_p2 = scmp.lt.s32.totalorder %s7609_s1, %s7609_s1 }
0x1847   :  { %6811 = vmatmul.mubr.msk.f32.vlgmr.msra.gmra.mrb[42].mxu0 %vm102_vm0, %v8129_v28 }
0x1848   :  { %7292 = vmatpush3.bf16.msra.mxu0 %v7289_v52  ;;  %p7616_p3 = por %p7615_p2, %p7614_p1 }
0x1849   :  { %7294 = vmatprep.subr.bf16.mxu0 %v7293_v24 }
0x184a   :  { %p7617_p4 = pnand %p7616_p3, %p7610_p0 }
0x184c   :  { %7296 = vmatpush3.bf16.msra.mxu0 %v7293_v24  ;;  %v6024_v24 = vld [vmem:[%s8845_s0 + $0x120] sm:$0xff] }
0x184d   :  { %7306 = vmatprep.subr.bf16.mxu0 %v7305_v29  ;;  %v7331_v26 = vpack.c.bf16 %v6025_v25, %v6024_v24  ;;  %v6056_v24 = vld [vmem:[%s8821_s7 + $0x140] sm:$0xff]  ;;  %v6057_v25 = vld [vmem:[%s8821_s7 + $0x148] sm:$0xff] }
0x1912   :  { %v6782_v19 = vpop.f32.mrb[40].mxu0 }
0x1913   :  { %v3607_v50 = vadd.f32 %v6782_v19, %v5972_v38  ;;  %v3601_v56 = vpop.f32.mrb[41].mxu0 }
0x1914   :  { %v3602_v57 = vadd.f32 %v5972_v38, %v3601_v56  ;;  %v6017_v38 = vld [vmem:[%s8821_s7 + $0x108] sm:$0xff] }
0x1915   :  { %v3611_v59 = vmax.f32 %v3607_v50, 0.0  ;;  %v7319_v19 = vpack.c.bf16 %v6017_v38, %v6016_v54  ;;  %v5995_v50 = vld [vmem:[%s8833_s19] ss:$0 sm:$0xff] }
0x1916   :  { %v3610_v28 = vmax.f32 %v3602_v57, 0.0  ;;  %v6018_v57 = vld [vmem:[%s8821_s7 + $0x110] sm:$0xff] }
0x1918   :  { %6799 = vmatprep.mubr.msk.f32.mxu1 %vm1792_vm6, %v3610_v28  ;;  %v6019_v28 = vld [vmem:[%s8821_s7 + $0x118] sm:$0xff] }
0x1919   :  { %6800 = vmatmul.mubr.msk.f32.vlgmr.msra.gmra.mrb[32].mxu1 %vm1792_vm6, %v3611_v59 }
0x191a   :  { %7300 = vmatpush3.bf16.msra.mxu1 %v7297_v31 }
0x191b   :  { %7302 = vmatprep.subr.bf16.mxu1 %v7301_v21 }
0x191e   :  { %7304 = vmatpush3.bf16.msra.mxu1 %v7301_v21 }
0x19ec   :  { %v6801_v62 = vpop.f32.mrb[32].mxu1 }
0x19ed   :  { %v3707_v63 = vadd.f32 %v6801_v62, %v5984_v49  ;;  %v3701_v0 = vpop.f32.mrb[33].mxu1 }
0x19ee   :  { %v3702_v1 = vadd.f32 %v5984_v49, %v3701_v0  ;;  %v6001_v0 = vld [vmem:[%s8820_s6 + $0x2] ss:$0 sm:$0xff] }
0x19ef   :  { %v3711_v2 = vadd.f32 %v3707_v63, %v3515_v47  ;;  %v7309_v47 = vpack.c.bf16 %v6007_v5, %v6006_v44  ;;  %v7323_v63 = vpack.c.bf16 %v6019_v28, %v6018_v57 }
0x19f0   :  { %v3710_v13 = vadd.f32 %v3702_v1, %v3514_v60  ;;  %v6009_v1 = vld [vmem:[%s8847_s25 + $0x8] ss:$0 sm:$0xff] }
0x19f1   :  { %v3719_v46 = vsel %vm102_vm0, %v3711_v2, 0.0 }
0x19f2   :  { %3720 = vadd.xlane.f32.xlu1 %v3719_v46  ;;  %v3716_v3 = vsel %vm102_vm0, %v3710_v13, 0.0 }
0x19f3   :  { %3717 = vadd.xlane.f32.xlu0 %v3716_v3 }
0x1a7f   :  { %v3721_v4 = vpop.xlane.xlu1 %3720 }
0x1a80   :  { %v3723_v15 = vmul.f32 0.03125, %v3721_v4  ;;  %v3718_v6 = vpop.xlane.xlu0 %3717 }
0x1a81   :  { %v3722_v7 = vmul.f32 0.03125, %v3718_v6 }
0x1a82   :  { %v3725_v48 = vsub.f32 %v3711_v2, %v3723_v15 }
0x1a83   :  { %v3724_v10 = vsub.f32 %v3710_v13, %v3722_v7 }
0x1a84   :  { %v3727_v11 = vmul.f32 %v3725_v48, %v3725_v48 }
0x1a85   :  { %v3726_v12 = vmul.f32 %v3724_v10, %v3724_v10 }
0x1a86   :  { %v3731_v14 = vsel %vm102_vm0, %v3727_v11, 0.0 }
0x1a87   :  { %3732 = vadd.xlane.f32.xlu1 %v3731_v14  ;;  %v3728_v8 = vsel %vm102_vm0, %v3726_v12, 0.0 }
0x1a88   :  { %3729 = vadd.xlane.f32.xlu0 %v3728_v8 }
0x1b14   :  { %v3733_v32 = vpop.xlane.xlu1 %3732 }
0x1b15   :  { %v3735_v42 = vmul.f32 0.03125, %v3733_v32  ;;  %v3730_v33 = vpop.xlane.xlu0 %3729 }
0x1b16   :  { %v3734_v34 = vmul.f32 0.03125, %v3730_v33 }
0x1b17   :  { %v3737_v18 = vadd.f32 1e-05, %v3735_v42 }
0x1b18   :  { %v3736_v61 = vadd.f32 1e-05, %v3734_v34 }
0x1b19   :  { %7565 = vrsqrt.f32 %v3737_v18 }
0x1b1a   :  { %7567 = vrsqrt.f32 %v3736_v61 }
0x1b23   :  { %v7566_v9 = vpop.eup %7565 }
0x1b24   :  { %v7568_v37 = vpop.eup %7567  ;;  %v3741_v39 = vmul.f32 %v7566_v9, %v3725_v48  ;;  %v6026_v9 = vld [vmem:[%s8845_s0 + $0x130] sm:$0xff] }
0x1b25   :  { %v3740_v40 = vmul.f32 %v7568_v37, %v3724_v10 }
0x1b26   :  { %v3749_v17 = vmul.f32 %v5989_v35, %v3741_v39 }
0x1b27   :  { %v3748_v43 = vmul.f32 %v5989_v35, %v3740_v40  ;;  %v6027_v35 = vld [vmem:[%s8845_s0 + $0x138] sm:$0xff] }
0x1b28   :  { %v3757_v22 = vadd.f32 %v5990_v41, %v3749_v17  ;;  %v7335_v39 = vpack.c.bf16 %v6027_v35, %v6026_v9  ;;  %v6037_v17 = vld [vmem:[%s8821_s7 + $0x128] sm:$0xff] }
0x1b29   :  { %v3756_v60 = vadd.f32 %v5990_v41, %v3748_v43  ;;  %v6036_v41 = vld [vmem:[%s8821_s7 + $0x120] sm:$0xff] }
0x1b2a   :  { %v7345_v43 = vpack.c.bf16 %v6037_v17, %v6036_v41 }
0x1b2b   :  { %6821 = vmatprep.mubr.msk.f32.mxu0 %vm102_vm0, %v3756_v60  ;;  %v6038_v60 = vld [vmem:[%s8821_s7 + $0x130] sm:$0xff] }
0x1b2c   :  { %6822 = vmatmul.mubr.msk.f32.vlgmr.msra.gmra.mrb[42].mxu0 %vm102_vm0, %v3757_v22  ;;  %v6039_v22 = vld [vmem:[%s8821_s7 + $0x138] sm:$0xff] }
0x1b2d   :  { %7308 = vmatpush3.bf16.msra.mxu0 %v7305_v29  ;;  %v7349_v44 = vpack.c.bf16 %v6039_v22, %v6038_v60 }
0x1b2e   :  { %7310 = vmatprep.subr.bf16.mxu0 %v7309_v47 }
0x1b31   :  { %7312 = vmatpush3.bf16.msra.mxu0 %v7309_v47 }
0x1b32   :  { %7320 = vmatprep.subr.bf16.mxu0 %v7319_v19 }
0x1bff   :  { %v6823_v56 = vpop.f32.mrb[42].mxu0 }
0x1c00   :  { %v3913_v59 = vpop.f32.mrb[43].mxu0  ;;  %v8506_v62 = vadd.f32 %v6823_v56, %v5995_v50 }
0x1c01   :  { %v8504_v49 = vadd.f32 %v5995_v50, %v3913_v59 }
0x1c03   :  { %6832 = vmatprep.mubr.msk.f32.mxu1 %vm102_vm0, %v8504_v49  ;;  %6843 = vmatprep.mubr.msk.f32.mxu0 %vm102_vm0, %v8504_v49 }
0x1c04   :  { %6833 = vmatmul.mubr.msk.f32.vlgmr.msra.gmra.mrb[34].mxu1 %vm102_vm0, %v8506_v62  ;;  %6844 = vmatmul.mubr.msk.f32.vlgmr.msra.gmra.mrb[44].mxu0 %vm102_vm0, %v8506_v62 }
0x1c05   :  { %7322 = vmatpush3.bf16.msra.mxu0 %v7319_v19  ;;  %6861 = vmatprep.mubr.msk.f32.mxu0 %vm102_vm0, %v8504_v49 }
0x1c06   :  { %7324 = vmatprep.subr.bf16.mxu0 %v7323_v63 }
0x1c09   :  { %7326 = vmatpush3.bf16.msra.mxu0 %v7323_v63 }
0x1c0c   :  { %6862 = vmatmul.mubr.msk.f32.vlgmr.msra.gmra.mrb[46].mxu0 %vm102_vm0, %v8506_v62 }
0x1cd7   :  { %v6834_v2 = vpop.f32.mrb[34].mxu1  ;;  %v6845_v13 = vpop.f32.mrb[44].mxu0 }
0x1cd8   :  { %v4022_v46 = vadd.f32 %v6834_v2, %v6001_v0  ;;  %v4016_v3 = vpop.f32.mrb[35].mxu1  ;;  %v4104_v4 = vpop.f32.mrb[45].mxu0  ;;  %v4110_v14 = vadd.f32 %v6845_v13, %v6009_v1  ;;  %v6044_v2 = vld [vmem:[%s8845_s0 + $0x140] sm:$0xff]  ;;  %v6045_v13 = vld [vmem:[%s8845_s0 + $0x148] sm:$0xff] }
0x1cd9   :  { %v4017_v15 = vadd.f32 %v6001_v0, %v4016_v3  ;;  %v4105_v6 = vadd.f32 %v6009_v1, %v4104_v4 }
0x1cdb   :  { %6850 = vmatprep.mubr.msk.f32.mxu1 %vm270_vm1, %v4105_v6  ;;  %v7313_v7 = vpack.c.bf16 %v4022_v46, %v4017_v15  ;;  %v8527_v48 = vpack.i.bf16 %v4022_v46, %v4017_v15  ;;  %v7357_v46 = vpack.c.bf16 %v6045_v13, %v6044_v2 }
0x1cdd   :  { %7315 = vmatprep.subr.msk.bf16.mxu1 %vm7832_vm2, %v7313_v7 }
0x1cde   :  { %7318 = vmatpush3.bf16.xpose.msk.msra.mxu1 %vm7832_vm2, %v7313_v7 }
0x1cdf   :  { %v6863_v10 = vpop.f32.mrb[46].mxu0 }
0x1ce0   :  { %v4289_v11 = vpop.f32.mrb[47].mxu0 }
0x1ce1   :  { %v7327_v12 = vpack.c.bf16 %v6863_v10, %v4289_v11 }
0x1ce3   :  { %7328 = vmatprep.subr.bf16.mxu1 %v7327_v12 }
0x1ce5   :  { %6851 = vmatmul.mubr.msk.f32.vlgmr.msra.gmra.mrb[36].mxu1 %vm270_vm1, %v4110_v14 }
0x1ce6   :  { %7330 = vmatpush3.bf16.msra.mxu1 %v7327_v12 }
0x1ce7   :  { %7332 = vmatprep.subr.bf16.mxu1 %v7331_v26 }
0x1db8   :  { %v6852_v8 = vpop.f32.mrb[36].mxu1 }
0x1db9   :  { %v4197_v16 = vadd.f32 %v6852_v8, %v7857_v55  ;;  %v4191_v20 = vpop.f32.mrb[37].mxu1 }
0x1dba   :  { %v4192_v52 = vadd.f32 %v4191_v20, %v7855_v53  ;;  %v6046_v20 = vld [vmem:[%s8845_s0 + $0x150] sm:$0xff] }
0x1dbb   :  { %v4203_v23 = vsel %vm358_vm5, %v4197_v16, -inf }
0x1dbc   :  { %4204 = vmax.xlane.f32.xlu1 %v4203_v23  ;;  %v4200_v58 = vsel %vm358_vm5, %v4192_v52, -inf }
0x1dbd   :  { %4201 = vmax.xlane.f32.xlu0 %v4200_v58 }
0x1dd3   :  { %7475 = vrot.lane.b32.xlu0 %v8527_v48, %s7634_s3 }
0x1e49   :  { %v4205_v27 = vpop.xlane.xlu1 %4204 }
0x1e4a   :  { %v4207_v29 = vsub.f32 %v4197_v16, %v4205_v27  ;;  %v4202_v30 = vpop.xlane.xlu0 %4201  ;;  %v6058_v27 = vld [vmem:[%s8821_s7 + $0x150] sm:$0xff] }
0x1e4b   :  { %v4206_v31 = vsub.f32 %v4192_v52, %v4202_v30  ;;  %v6047_v52 = vld [vmem:[%s8845_s0 + $0x158] sm:$0xff] }
0x1e4c   :  { %v4210_v32 = vmul.f32 1.442695, %v4207_v29  ;;  %v7361_v23 = vpack.c.bf16 %v6047_v52, %v6046_v20  ;;  %v6059_v29 = vld [vmem:[%s8821_s7 + $0x158] sm:$0xff] }
0x1e4d   :  { %v4208_v42 = vmul.f32 1.442695, %v4206_v31  ;;  %v7375_v30 = vpack.c.bf16 %v6059_v29, %v6058_v27 }
0x1e4e   :  { %v7476_v33 = vpop.permute.xlu0 %7475 }
0x1e4f   :  { %7569 = vpow2.f32 %v4208_v42  ;;  %v7478_v34 = vunpack.i.h.bf16 %v7476_v33  ;;  %v7477_v18 = vunpack.i.l.bf16 %v7476_v33  ;;  %v6049_v42 = vld [vmem:[%s8847_s25 + $0xa] ss:$0 sm:$0xff] }
0x1e50   :  { %7571 = vpow2.f32 %v4210_v32 }
0x1e51   :  { %v7339_v61 = vpack.c.bf16 %v7478_v34, %v7477_v18 }
0x1e53   :  { %7341 = vmatprep.subr.msk.bf16.mxu0 %vm7832_vm2, %v7339_v61 }
0x1e54   :  { %7344 = vmatpush3.bf16.xpose.msk.msra.mxu0 %vm7832_vm2, %v7339_v61 }
0x1e59   :  { %v8556_v37 = vpop.eup %7569 }
0x1e5a   :  { %v8558_v40 = vpop.eup %7571  ;;  %6868 = vmatprep.mubr.msk.f32.mxu1 %vm358_vm5, %v8556_v37 }
0x1e5b   :  { %6869 = vmatmul.mubr.msk.f32.vlgmr.msra.gmra.mrb[38].mxu1 %vm358_vm5, %v8558_v40 }
0x1e5c   :  { %7334 = vmatpush3.bf16.msra.mxu1 %v7331_v26  ;;  %6879 = vmatprep.mubr.msk.f32.mxu1 %vm102_vm0, %v8504_v49  ;;  %v7371_v26 = vpack.c.bf16 %v6057_v25, %v6056_v24 }
0x1e5d   :  { %7336 = vmatprep.subr.bf16.mxu1 %v7335_v39 }
0x1e60   :  { %7338 = vmatpush3.bf16.msra.mxu1 %v7335_v39 }
0x1e61   :  { %7346 = vmatprep.subr.bf16.mxu1 %v7345_v43 }
0x1e63   :  { %6880 = vmatmul.mubr.msk.f32.vlgmr.msra.gmra.mrb[40].mxu1 %vm102_vm0, %v8506_v62 }
0x1e64   :  { %7348 = vmatpush3.bf16.msra.mxu1 %v7345_v43  ;;  %6897 = vmatprep.mubr.msk.f32.mxu1 %vm102_vm0, %v8504_v49 }
0x1e65   :  { %7350 = vmatprep.subr.bf16.mxu1 %v7349_v44 }
0x1e68   :  { %7352 = vmatpush3.bf16.msra.mxu1 %v7349_v44 }
0x1e6b   :  { %6898 = vmatmul.mubr.msk.f32.vlgmr.msra.gmra.mrb[42].mxu1 %vm102_vm0, %v8506_v62 }
0x1f2e   :  { %v8584_v5 = vpop.f32.mrb[38].mxu1 }
0x1f2f   :  { %v8586_v47 = vpop.f32.mrb[39].mxu1 }
0x1f36   :  { %v6881_v51 = vpop.f32.mrb[40].mxu1 }
0x1f37   :  { %v4462_v21 = vpop.f32.mrb[41].mxu1  ;;  %v4468_v38 = vadd.f32 %v6881_v51, %v6029_v45  ;;  %v6065_v51 = vld [vmem:[%s8845_s0 + $0x168] sm:$0xff] }
0x1f38   :  { %v4463_v54 = vadd.f32 %v6029_v45, %v4462_v21  ;;  %v6064_v45 = vld [vmem:[%s8845_s0 + $0x160] sm:$0xff] }
0x1f39   :  { %v7383_v21 = vpack.c.bf16 %v6065_v51, %v6064_v45 }
0x1f3a   :  { %6886 = vmatprep.mubr.msk.f32.mxu0 %vm270_vm1, %v4463_v54  ;;  %v4215_v54 = vsel %vm358_vm5, %v8558_v40, 0.0  ;;  %v6066_v40 = vld [vmem:[%s8845_s0 + $0x170] sm:$0xff] }
0x1f3b   :  { %6887 = vmatmul.mubr.msk.f32.vlgmr.msra.gmra.mrb[48].mxu0 %vm270_vm1, %v4468_v38 }
0x1f3e   :  { %v6899_v19 = vpop.f32.mrb[42].mxu1 }
0x1f3f   :  { %v4649_v50 = vpop.f32.mrb[43].mxu1 }
0x1f40   :  { %v7353_v56 = vpack.c.bf16 %v6899_v19, %v4649_v50 }
0x1f42   :  { %7354 = vmatprep.subr.bf16.mxu0 %v7353_v56 }
0x1f43   :  { %7356 = vmatpush3.bf16.msra.mxu0 %v7353_v56 }
0x1f44   :  { %7358 = vmatprep.subr.bf16.mxu0 %v7357_v46 }
0x200e   :  { %v6888_v57 = vpop.f32.mrb[48].mxu0 }
0x200f   :  { %v4551_v28 = vpop.f32.mrb[49].mxu0  ;;  %v4557_v63 = vadd.f32 %v6888_v57, %v7857_v55 }
0x2010   :  { %v4552_v59 = vadd.f32 %v4551_v28, %v7855_v53 }
0x2011   :  { %v4563_v1 = vsel %vm358_vm5, %v4557_v63, -inf }
0x2012   :  { %v4560_v0 = vsel %vm358_vm5, %v4552_v59, -inf }
0x2013   :  { %4561 = vmax.xlane.f32.xlu1 %v4560_v0 }
0x2017   :  { %4564 = vmax.xlane.f32.xlu1 %v4563_v1  ;;  %v6067_v1 = vld [vmem:[%s8845_s0 + $0x178] sm:$0xff] }
0x2018   :  { %v7387_v13 = vpack.c.bf16 %v6067_v1, %v6066_v40 }
0x2028   :  { %7480 = vrot.lane.b32.xlu1 %v8527_v48, %s7636_s26 }
0x20a0   :  { %v4562_v3 = vpop.xlane.xlu1 %4561 }
0x20a1   :  { %v4566_v4 = vsub.f32 %v4552_v59, %v4562_v3  ;;  %v6076_v3 = vld [vmem:[%s8821_s7 + $0x160] sm:$0xff] }
0x20a3   :  { %v4568_v15 = vmul.f32 1.442695, %v4566_v4  ;;  %v7397_v4 = vpack.c.bf16 %v6077_v36, %v6076_v3 }
0x20a4   :  { %v4565_v6 = vpop.xlane.xlu1 %4564 }
0x20a5   :  { %7573 = vpow2.f32 %v4568_v15  ;;  %v4567_v7 = vsub.f32 %v4557_v63, %v4565_v6  ;;  %v6078_v15 = vld [vmem:[%s8821_s7 + $0x170] sm:$0xff]  ;;  %v6079_v6 = vld [vmem:[%s8821_s7 + $0x178] sm:$0xff] }
0x20a7   :  { %v4570_v10 = vmul.f32 1.442695, %v4567_v7  ;;  %v7401_v7 = vpack.c.bf16 %v6079_v6, %v6078_v15 }
0x20a8   :  { %v7481_v11 = vpop.permute.xlu1 %7480 }
0x20a9   :  { %7575 = vpow2.f32 %v4570_v10  ;;  %v7483_v12 = vunpack.i.h.bf16 %v7481_v11  ;;  %v7482_v14 = vunpack.i.l.bf16 %v7481_v11 }
0x20ab   :  { %v7365_v8 = vpack.c.bf16 %v7483_v12, %v7482_v14  ;;  %v6069_v12 = vld [vmem:[%s8847_s25 + $0xb] ss:$0 sm:$0xff] }
0x20ad   :  { %7367 = vmatprep.subr.msk.bf16.mxu1 %vm7832_vm2, %v7365_v8 }
0x20ae   :  { %7370 = vmatpush3.bf16.xpose.msk.msra.mxu1 %vm7832_vm2, %v7365_v8 }
0x20af   :  { %v8609_v16 = vpop.eup %7573 }
0x20b0   :  { %6904 = vmatprep.mubr.msk.f32.mxu0 %vm358_vm5, %v8609_v16 }
0x20b3   :  { %v8619_v58 = vpop.eup %7575 }
0x20b4   :  { %6905 = vmatmul.mubr.msk.f32.vlgmr.msra.gmra.mrb[50].mxu0 %vm358_vm5, %v8619_v58 }
0x20b5   :  { %7360 = vmatpush3.bf16.msra.mxu0 %v7357_v46  ;;  %6915 = vmatprep.mubr.msk.f32.mxu0 %vm102_vm0, %v8504_v49 }
0x20b6   :  { %7362 = vmatprep.subr.bf16.mxu0 %v7361_v23 }
0x20b9   :  { %7364 = vmatpush3.bf16.msra.mxu0 %v7361_v23 }
0x20ba   :  { %7372 = vmatprep.subr.bf16.mxu0 %v7371_v26 }
0x20bc   :  { %6916 = vmatmul.mubr.msk.f32.vlgmr.msra.gmra.mrb[52].mxu0 %vm102_vm0, %v8506_v62 }
0x20bd   :  { %7374 = vmatpush3.bf16.msra.mxu0 %v7371_v26  ;;  %6933 = vmatprep.mubr.msk.f32.mxu0 %vm102_vm0, %v8504_v49 }
0x20be   :  { %7376 = vmatprep.subr.bf16.mxu0 %v7375_v30 }
0x20c1   :  { %7378 = vmatpush3.bf16.msra.mxu0 %v7375_v30 }
0x20c4   :  { %6934 = vmatmul.mubr.msk.f32.vlgmr.msra.gmra.mrb[54].mxu0 %vm102_vm0, %v8506_v62 }
0x2187   :  { %v8643_v31 = vpop.f32.mrb[50].mxu0 }
0x2188   :  { %v8645_v32 = vpop.f32.mrb[51].mxu0 }
0x218f   :  { %v6917_v33 = vpop.f32.mrb[52].mxu0 }
0x2190   :  { %v4824_v34 = vpop.f32.mrb[53].mxu0  ;;  %v4830_v61 = vadd.f32 %v6917_v33, %v6049_v42 }
0x2191   :  { %v4825_v18 = vadd.f32 %v6049_v42, %v4824_v34  ;;  %v4212_v34 = vsel %vm358_vm5, %v8556_v37, 0.0 }
0x2193   :  { %6922 = vmatprep.mubr.msk.f32.mxu1 %vm270_vm1, %v4825_v18  ;;  %v4572_v18 = vsel %vm358_vm5, %v8609_v16, 0.0 }
0x2194   :  { %6923 = vmatmul.mubr.msk.f32.vlgmr.msra.gmra.mrb[44].mxu1 %vm270_vm1, %v4830_v61  ;;  %v4575_v61 = vsel %vm358_vm5, %v8619_v58, 0.0 }
0x2197   :  { %v6935_v9 = vpop.f32.mrb[54].mxu0 }
0x2198   :  { %v5011_v35 = vpop.f32.mrb[55].mxu0 }
0x2199   :  { %v7379_v39 = vpack.c.bf16 %v6935_v9, %v5011_v35 }
0x219b   :  { %7380 = vmatprep.subr.bf16.mxu1 %v7379_v39 }
0x219c   :  { %7382 = vmatpush3.bf16.msra.mxu1 %v7379_v39 }
0x219d   :  { %7384 = vmatprep.subr.bf16.mxu1 %v7383_v21 }
0x2267   :  { %v6924_v41 = vpop.f32.mrb[44].mxu1 }
0x2268   :  { %v4919_v17 = vadd.f32 %v6924_v41, %v7857_v55  ;;  %v4913_v43 = vpop.f32.mrb[45].mxu1 }
0x2269   :  { %v4914_v60 = vadd.f32 %v4913_v43, %v7855_v53 }
0x226a   :  { %v4925_v22 = vsel %vm358_vm5, %v4919_v17, -inf }
0x226b   :  { %4926 = vmax.xlane.f32.xlu1 %v4925_v22  ;;  %v4922_v44 = vsel %vm358_vm5, %v4914_v60, -inf }
0x226c   :  { %4923 = vmax.xlane.f32.xlu0 %v4922_v44 }
0x2282   :  { %7485 = vrot.lane.b32.xlu0 %v8527_v48, %s7637_s21 }
0x22a1   :  { %4216 = vadd.xlane.f32.xlu0 %v4215_v54 }
0x22f8   :  { %v4927_v38 = vpop.xlane.xlu1 %4926 }
0x22f9   :  { %v4929_v19 = vsub.f32 %v4919_v17, %v4927_v38  ;;  %v4924_v50 = vpop.xlane.xlu0 %4923 }
0x22fa   :  { %v4928_v56 = vsub.f32 %v4914_v60, %v4924_v50 }
0x22fb   :  { %v4932_v57 = vmul.f32 1.442695, %v4929_v19 }
0x22fc   :  { %v4930_v48 = vmul.f32 1.442695, %v4928_v56 }
0x22fd   :  { %v7486_v28 = vpop.permute.xlu0 %7485 }
0x22fe   :  { %7577 = vpow2.f32 %v4930_v48  ;;  %v7488_v59 = vunpack.i.h.bf16 %v7486_v28  ;;  %v7487_v63 = vunpack.i.l.bf16 %v7486_v28 }
0x22ff   :  { %7579 = vpow2.f32 %v4932_v57 }
0x2300   :  { %v7391_v0 = vpack.c.bf16 %v7488_v59, %v7487_v63 }
0x2302   :  { %7393 = vmatprep.subr.msk.bf16.mxu0 %vm7832_vm2, %v7391_v0 }
0x2303   :  { %7396 = vmatpush3.bf16.xpose.msk.msra.mxu0 %vm7832_vm2, %v7391_v0 }
0x2308   :  { %v7578_v2 = vpop.eup %7577 }
0x2309   :  { %v7580_v46 = vpop.eup %7579  ;;  %6940 = vmatprep.mubr.msk.f32.mxu1 %vm358_vm5, %v7578_v2 }
0x230a   :  { %6941 = vmatmul.mubr.msk.f32.vlgmr.msra.gmra.mrb[46].mxu1 %vm358_vm5, %v7580_v46 }
0x230b   :  { %7386 = vmatpush3.bf16.msra.mxu1 %v7383_v21  ;;  %6951 = vmatprep.mubr.msk.f32.mxu1 %vm102_vm0, %v8504_v49 }
0x230c   :  { %7388 = vmatprep.subr.bf16.mxu1 %v7387_v13 }
0x230f   :  { %7390 = vmatpush3.bf16.msra.mxu1 %v7387_v13 }
0x2310   :  { %7398 = vmatprep.subr.bf16.mxu1 %v7397_v4 }
0x2312   :  { %6952 = vmatmul.mubr.msk.f32.vlgmr.msra.gmra.mrb[48].mxu1 %vm102_vm0, %v8506_v62 }
0x2313   :  { %7400 = vmatpush3.bf16.msra.mxu1 %v7397_v4  ;;  %6969 = vmatprep.mubr.msk.f32.mxu1 %vm102_vm0, %v8504_v49 }
0x2314   :  { %7402 = vmatprep.subr.bf16.mxu1 %v7401_v7 }
0x2317   :  { %7404 = vmatpush3.bf16.msra.mxu1 %v7401_v7 }
0x231a   :  { %6970 = vmatmul.mubr.msk.f32.vlgmr.msra.gmra.mrb[50].mxu1 %vm102_vm0, %v8506_v62 }
0x232e   :  { %v4217_v16 = vpop.xlane.xlu0 %4216 }
0x23dd   :  { %v8698_v10 = vpop.f32.mrb[46].mxu1 }
0x23de   :  { %v8700_v11 = vpop.f32.mrb[47].mxu1 }
0x23e5   :  { %v6953_v14 = vpop.f32.mrb[48].mxu1 }
0x23e6   :  { %v5186_v8 = vpop.f32.mrb[49].mxu1  ;;  %v5192_v52 = vadd.f32 %v6953_v14, %v6069_v12 }
0x23e7   :  { %v5187_v20 = vadd.f32 %v6069_v12, %v5186_v8 }
0x23e9   :  { %6958 = vmatprep.mubr.msk.f32.mxu0 %vm270_vm1, %v5187_v20 }
0x23ea   :  { %6959 = vmatmul.mubr.msk.f32.vlgmr.msra.gmra.mrb[56].mxu0 %vm270_vm1, %v5192_v52 }
0x23ed   :  { %v6971_v23 = vpop.f32.mrb[50].mxu1 }
0x23ee   :  { %v5373_v24 = vpop.f32.mrb[51].mxu1 }
0x23ef   :  { %v7405_v25 = vpack.c.bf16 %v6971_v23, %v5373_v24 }
0x23f1   :  { %7406 = vmatprep.subr.bf16.mxu0 %v7405_v25 }
0x23f2   :  { %7408 = vmatpush3.bf16.msra.mxu0 %v7405_v25 }
0x24bd   :  { %v6960_v26 = vpop.f32.mrb[56].mxu0 }
0x24be   :  { %v5275_v27 = vpop.f32.mrb[57].mxu0  ;;  %v5281_v30 = vadd.f32 %v6960_v26, %v7857_v55  ;;  %v4937_v55 = vsel %vm358_vm5, %v7580_v46, 0.0 }
0x24bf   :  { %v5276_v29 = vadd.f32 %v5275_v27, %v7855_v53  ;;  %v4934_v53 = vsel %vm358_vm5, %v7578_v2, 0.0 }
0x24c0   :  { %v5287_v33 = vsel %vm358_vm5, %v5281_v30, -inf }
0x24c1   :  { %v5284_v42 = vsel %vm358_vm5, %v5276_v29, -inf }
0x24c2   :  { %5285 = vmax.xlane.f32.xlu1 %v5284_v42 }
0x24c6   :  { %5288 = vmax.xlane.f32.xlu1 %v5287_v33 }
0x24ca   :  { %4213 = vadd.xlane.f32.xlu1 %v4212_v34 }
0x24ce   :  { %4573 = vadd.xlane.f32.xlu1 %v4572_v18  ;;  %v6091_v18 = vld [vmem:[%s8823_s9 + $0x48] sm:$0xff] }
0x24d2   :  { %4576 = vadd.xlane.f32.xlu1 %v4575_v61 }
0x24d6   :  { %4935 = vadd.xlane.f32.xlu1 %v4934_v53  ;;  %v6092_v53 = vld [vmem:[%s8823_s9 + $0x50] sm:$0xff] }
0x24da   :  { %4938 = vadd.xlane.f32.xlu1 %v4937_v55  ;;  %v6093_v55 = vld [vmem:[%s8823_s9 + $0x58] sm:$0xff] }
0x254f   :  { %v5286_v9 = vpop.xlane.xlu1 %5285 }
0x2550   :  { %v5290_v35 = vsub.f32 %v5276_v29, %v5286_v9  ;;  %v7413_v9 = vpack.c.bf16 %v6093_v55, %v6092_v53  ;;  %v6112_v53 = vld [vmem:[%s8829_s15 + $0x2] ss:$0 sm:$0xff] }
0x2552   :  { %v5292_v39 = vmul.f32 1.442695, %v5290_v35  ;;  %v6098_v35 = vld [vmem:[%s8825_s11 + $0x80] sm:$0xff] }
0x2553   :  { %v5289_v41 = vpop.xlane.xlu1 %5288 }
0x2554   :  { %7581 = vpow2.f32 %v5292_v39  ;;  %v5291_v37 = vsub.f32 %v5281_v30, %v5289_v41  ;;  %v6099_v39 = vld [vmem:[%s8825_s11 + $0x88] sm:$0xff]  ;;  %v6100_v41 = vld [vmem:[%s8825_s11 + $0x90] sm:$0xff] }
0x2556   :  { %v5294_v17 = vmul.f32 1.442695, %v5291_v37  ;;  %v7417_v37 = vpack.c.bf16 %v6099_v39, %v6098_v35  ;;  %v6113_v39 = vld [vmem:[%s8830_s16 + $0x2] ss:$0 sm:$0xff] }
0x2557   :  { %v4214_v43 = vpop.xlane.xlu1 %4213 }
0x2558   :  { %7583 = vpow2.f32 %v5294_v17  ;;  %v6101_v17 = vld [vmem:[%s8825_s11 + $0x98] sm:$0xff]  ;;  %7418 = vmatprep.subr.bf16.mxu1 %v7417_v37 }
0x2559   :  { %7585 = vrcp.f32 %v4214_v43  ;;  %v7421_v43 = vpack.c.bf16 %v6101_v17, %v6100_v41  ;;  %7420 = vmatpush3.bf16.msra.mxu1 %v7417_v37 }
0x255b   :  { %v4574_v60 = vpop.xlane.xlu1 %4573  ;;  %7422 = vmatprep.subr.bf16.mxu1 %v7421_v43 }
0x255c   :  { %7587 = vrcp.f32 %v4574_v60  ;;  %v6103_v60 = vld [vmem:[%s8825_s11 + $0xa8] sm:$0xff] }
0x255d   :  { %7589 = vrcp.f32 %v4217_v16  ;;  %v6102_v16 = vld [vmem:[%s8825_s11 + $0xa0] sm:$0xff]  ;;  %7424 = vmatpush3.bf16.msra.mxu1 %v7421_v43 }
0x255e   :  { %v7582_v58 = vpop.eup %7581 }
0x255f   :  { %6976 = vmatprep.mubr.msk.f32.mxu0 %vm358_vm5, %v7582_v58  ;;  %v4577_v22 = vpop.xlane.xlu1 %4576  ;;  %v5296_v44 = vsel %vm358_vm5, %v7582_v58, 0.0  ;;  %v7425_v58 = vpack.c.bf16 %v6103_v60, %v6102_v16 }
0x2560   :  { %7591 = vrcp.f32 %v4577_v22  ;;  %5297 = vadd.xlane.f32.xlu1 %v5296_v44 }
0x2561   :  { %7426 = vmatprep.subr.bf16.mxu1 %v7425_v58 }
0x2562   :  { %v7584_v45 = vpop.eup %7583  ;;  %7428 = vmatpush3.bf16.msra.mxu1 %v7425_v58 }
0x2563   :  { %6977 = vmatmul.mubr.msk.f32.vlgmr.msra.gmra.mrb[58].mxu0 %vm358_vm5, %v7584_v45  ;;  %v4936_v51 = vpop.xlane.xlu1 %4935  ;;  %v5299_v21 = vsel %vm358_vm5, %v7584_v45, 0.0  ;;  %v7586_v54 = vpop.eup %7585 }
0x2564   :  { %7593 = vrcp.f32 %v4936_v51  ;;  %5300 = vadd.xlane.f32.xlu1 %v5299_v21  ;;  %v4381_v50 = vmul.f32 %v7586_v54, %v8586_v47 }
0x2566   :  { %v7588_v38 = vpop.eup %7587 }
0x2567   :  { %v4939_v19 = vpop.xlane.xlu1 %4938  ;;  %v4741_v56 = vmul.f32 %v7588_v38, %v8645_v32  ;;  %v7590_v57 = vpop.eup %7589 }
0x2568   :  { %7595 = vrcp.f32 %v4939_v19  ;;  %v4382_v59 = vmul.f32 %v7590_v57, %v8584_v5  ;;  %v6088_v19 = vld [vmem:[%s8827_s13 + $0x2] ss:$0 sm:$0xff] }
0x2569   :  { %v4743_v48 = vadd.f32 %v4741_v56, %v4381_v50  ;;  %v6089_v56 = vld [vmem:[%s8828_s14 + $0x2] ss:$0 sm:$0xff] }
0x256a   :  { %v7592_v28 = vpop.eup %7591 }
0x256b   :  { %v4742_v63 = vmul.f32 %v7592_v28, %v8643_v31 }
0x256d   :  { %v4744_v0 = vadd.f32 %v4742_v63, %v4382_v59 }
0x256e   :  { %v7594_v40 = vpop.eup %7593 }
0x256f   :  { %v5103_v1 = vmul.f32 %v7594_v40, %v8700_v11  ;;  %v6085_v11 = vld [vmem:[%s8822_s8 + $0x2] ss:$0 sm:$0xff]  ;;  %v6104_v40 = vld [vmem:[%s8825_s11 + $0xb0] sm:$0xff] }
0x2571   :  { %v5105_v2 = vadd.f32 %v5103_v1, %v4743_v48  ;;  %v6105_v1 = vld [vmem:[%s8825_s11 + $0xb8] sm:$0xff] }
0x2572   :  { %v7596_v13 = vpop.eup %7595 }
0x2573   :  { %v5104_v46 = vmul.f32 %v7596_v13, %v8698_v10  ;;  %v6095_v13 = vld [vmem:[%s8824_s10 + $0x2] ss:$0 sm:$0xff] }
0x2575   :  { %v5106_v3 = vadd.f32 %v5104_v46, %v4744_v0 }
0x25ed   :  { %v5298_v47 = vpop.xlane.xlu1 %5297 }
0x25f1   :  { %v5301_v36 = vpop.xlane.xlu1 %5300 }
0x25f2   :  { %7597 = vrcp.f32 %v5301_v36 }
0x25f3   :  { %7599 = vrcp.f32 %v5298_v47 }
0x25fc   :  { %v7598_v32 = vpop.eup %7597 }
0x25fd   :  { %v7600_v15 = vpop.eup %7599 }
0x2636   :  { %v6978_v4 = vpop.f32.mrb[58].mxu0 }
0x2637   :  { %v5466_v6 = vmul.f32 %v7598_v32, %v6978_v4  ;;  %v5454_v5 = vpop.f32.mrb[59].mxu0 }
0x2638   :  { %v5465_v7 = vmul.f32 %v7600_v15, %v5454_v5  ;;  %v6107_v15 = vld [vmem:[%s8826_s12 + $0x2] ss:$0 sm:$0xff] }
0x2639   :  { %v5468_v31 = vadd.f32 %v5466_v6, %v5106_v3 }
0x263a   :  { %v5467_v12 = vadd.f32 %v5465_v7, %v5105_v2  ;;  %v7429_v2 = vpack.c.bf16 %v6105_v1, %v6104_v40 }
0x263b   :  { %v5478_v14 = vadd.f32 %v6085_v11, %v5468_v31 }
0x263c   :  { %v5477_v8 = vadd.f32 %v6085_v11, %v5467_v12  ;;  %7430 = vmatprep.subr.bf16.mxu1 %v7429_v2 }
0x263d   :  { %v5480_v52 = vadd.f32 %v5478_v14, %v8506_v62  ;;  %v6090_v62 = vld [vmem:[%s8823_s9 + $0x40] sm:$0xff]  ;;  %7432 = vmatpush3.bf16.msra.mxu1 %v7429_v2 }
0x263e   :  { %v5479_v10 = vadd.f32 %v5477_v8, %v8504_v49  ;;  %v7409_v61 = vpack.c.bf16 %v6091_v18, %v6090_v62 }
0x263f   :  { %v5488_v23 = vsel %vm102_vm0, %v5480_v52, 0.0 }
0x2640   :  { %v5485_v20 = vsel %vm102_vm0, %v5479_v10, 0.0  ;;  %7410 = vmatprep.subr.bf16.mxu0 %v7409_v61 }
0x2641   :  { %5486 = vadd.xlane.f32.xlu1 %v5485_v20  ;;  %7412 = vmatpush3.bf16.msra.mxu0 %v7409_v61 }
0x2642   :  { %7414 = vmatprep.subr.bf16.mxu0 %v7413_v9 }
0x2645   :  { %5489 = vadd.xlane.f32.xlu1 %v5488_v23  ;;  %7416 = vmatpush3.bf16.msra.mxu0 %v7413_v9 }
0x26ce   :  { %v5487_v24 = vpop.xlane.xlu1 %5486 }
0x26cf   :  { %v5491_v25 = vmul.f32 0.03125, %v5487_v24 }
0x26d1   :  { %v5493_v26 = vsub.f32 %v5479_v10, %v5491_v25 }
0x26d2   :  { %v5490_v27 = vpop.xlane.xlu1 %5489 }
0x26d3   :  { %v5492_v29 = vmul.f32 0.03125, %v5490_v27  ;;  %v5495_v30 = vmul.f32 %v5493_v26, %v5493_v26 }
0x26d5   :  { %v5494_v42 = vsub.f32 %v5480_v52, %v5492_v29  ;;  %v5497_v33 = vsel %vm102_vm0, %v5495_v30, 0.0 }
0x26d6   :  { %5498 = vadd.xlane.f32.xlu1 %v5497_v33 }
0x26d7   :  { %v5496_v34 = vmul.f32 %v5494_v42, %v5494_v42 }
0x26d9   :  { %v5500_v49 = vsel %vm102_vm0, %v5496_v34, 0.0 }
0x26da   :  { %5501 = vadd.xlane.f32.xlu0 %v5500_v49 }
0x2763   :  { %v5499_v22 = vpop.xlane.xlu1 %5498 }
0x2764   :  { %v5503_v44 = vmul.f32 0.03125, %v5499_v22 }
0x2766   :  { %v5505_v45 = vadd.f32 1e-05, %v5503_v44 }
0x2767   :  { %v5502_v51 = vpop.xlane.xlu0 %5501 }
0x2768   :  { %7601 = vrsqrt.f32 %v5505_v45  ;;  %v5504_v21 = vmul.f32 0.03125, %v5502_v51 }
0x276a   :  { %v5506_v54 = vadd.f32 1e-05, %v5504_v21 }
0x276c   :  { %7603 = vrsqrt.f32 %v5506_v54 }
0x2772   :  { %v7602_v38 = vpop.eup %7601 }
0x2773   :  { %v5509_v50 = vmul.f32 %v7602_v38, %v5493_v26 }
0x2775   :  { %v5517_v57 = vmul.f32 %v6088_v19, %v5509_v50 }
0x2776   :  { %v7604_v48 = vpop.eup %7603 }
0x2777   :  { %v5510_v28 = vmul.f32 %v7604_v48, %v5494_v42  ;;  %v5525_v59 = vadd.f32 %v6089_v56, %v5517_v57 }
0x2779   :  { %v5518_v63 = vmul.f32 %v6088_v19, %v5510_v28  ;;  %6987 = vmatprep.mubr.msk.f32.mxu0 %vm102_vm0, %v5525_v59 }
0x277b   :  { %v5526_v0 = vadd.f32 %v6089_v56, %v5518_v63 }
0x277d   :  { %6988 = vmatmul.mubr.msk.f32.vlgmr.msra.gmra.mrb[60].mxu0 %vm102_vm0, %v5526_v0 }
0x2850   :  { %v6989_v46 = vpop.f32.mrb[60].mxu0 }
0x2851   :  { %v5618_v3 = vadd.f32 %v6989_v46, %v6095_v13  ;;  %v5612_v47 = vpop.f32.mrb[61].mxu0 }
0x2852   :  { %v5613_v36 = vadd.f32 %v6095_v13, %v5612_v47 }
0x2853   :  { %v5622_v4 = vmax.f32 %v5618_v3, 0.0 }
0x2854   :  { %v5621_v32 = vmax.f32 %v5613_v36, 0.0 }
0x2856   :  { %7006 = vmatprep.mubr.msk.f32.mxu1 %vm1792_vm6, %v5621_v32 }
0x2857   :  { %7007 = vmatmul.mubr.msk.f32.vlgmr.msra.gmra.mrb[52].mxu1 %vm1792_vm6, %v5622_v4 }
0x292a   :  { %v7008_v6 = vpop.f32.mrb[52].mxu1 }
0x292b   :  { %v5718_v5 = vadd.f32 %v7008_v6, %v6107_v15  ;;  %v5712_v7 = vpop.f32.mrb[53].mxu1 }
0x292c   :  { %v5713_v31 = vadd.f32 %v6107_v15, %v5712_v7 }
0x292d   :  { %v5722_v11 = vadd.f32 %v5718_v5, %v5526_v0 }
0x292e   :  { %v5721_v12 = vadd.f32 %v5713_v31, %v5525_v59 }
0x292f   :  { %v5730_v14 = vsel %vm102_vm0, %v5722_v11, 0.0 }
0x2930   :  { %5731 = vadd.xlane.f32.xlu0 %v5730_v14  ;;  %v5727_v8 = vsel %vm102_vm0, %v5721_v12, 0.0 }
0x2931   :  { %5728 = vadd.xlane.f32.xlu1 %v5727_v8 }
0x29bd   :  { %v5732_v10 = vpop.xlane.xlu0 %5731 }
0x29be   :  { %v5734_v20 = vmul.f32 0.03125, %v5732_v10  ;;  %v5729_v52 = vpop.xlane.xlu1 %5728 }
0x29bf   :  { %v5733_v23 = vmul.f32 0.03125, %v5729_v52 }
0x29c0   :  { %v5736_v24 = vsub.f32 %v5722_v11, %v5734_v20 }
0x29c1   :  { %v5735_v25 = vsub.f32 %v5721_v12, %v5733_v23 }
0x29c2   :  { %v5738_v26 = vmul.f32 %v5736_v24, %v5736_v24 }
0x29c3   :  { %v5737_v27 = vmul.f32 %v5735_v25, %v5735_v25 }
0x29c4   :  { %v5742_v29 = vsel %vm102_vm0, %v5738_v26, 0.0 }
0x29c5   :  { %5743 = vadd.xlane.f32.xlu0 %v5742_v29  ;;  %v5739_v30 = vsel %vm102_vm0, %v5737_v27, 0.0 }
0x29c6   :  { %5740 = vadd.xlane.f32.xlu1 %v5739_v30 }
0x2a52   :  { %v5744_v42 = vpop.xlane.xlu0 %5743 }
0x2a53   :  { %v5746_v33 = vmul.f32 0.03125, %v5744_v42  ;;  %v5741_v34 = vpop.xlane.xlu1 %5740 }
0x2a54   :  { %v5745_v49 = vmul.f32 0.03125, %v5741_v34 }
0x2a55   :  { %v5748_v62 = vadd.f32 1e-05, %v5746_v33 }
0x2a56   :  { %v5747_v18 = vadd.f32 1e-05, %v5745_v49 }
0x2a57   :  { %7605 = vrsqrt.f32 %v5748_v62 }
0x2a58   :  { %7607 = vrsqrt.f32 %v5747_v18 }
0x2a61   :  { %v7606_v61 = vpop.eup %7605 }
0x2a62   :  { %v7608_v55 = vpop.eup %7607  ;;  %v5752_v9 = vmul.f32 %v7606_v61, %v5736_v24 }
0x2a63   :  { %v5751_v35 = vmul.f32 %v7608_v55, %v5735_v25 }
0x2a64   :  { %v5760_v41 = vmul.f32 %v6112_v53, %v5752_v9 }
0x2a65   :  { %v5759_v37 = vmul.f32 %v6112_v53, %v5751_v35 }
0x2a66   :  { %v5768_v17 = vadd.f32 %v6113_v39, %v5760_v41 }
0x2a67   :  { %v5767_v43 = vadd.f32 %v6113_v39, %v5759_v37 }
0x2a68   :  { %5770 = vst.msk [vmem:[#allocation2 + $0x8] sm:$0xff] %vm102_vm0, %v5768_v17 }
0x2a69   :  { %5769 = vst.msk [vmem:[#allocation2] sm:$0xff] %vm102_vm0, %v5767_v43 }
0x2a6a   :  { %7620 = shalt.err (!%p7617_p4)
}
0x2a6b   :  { %s7621_s22 = scalar_lea.hbm %s8834_s20, 256 }
0x2a6c   :  { %p7622_p5 = scmp.ne.s32.totalorder %s8834_s20, %s7621_s22  ;;  %p7625_p6 = scmp.lt.u32.totalorder %s7621_s22, %s8834_s20 }
0x2a6e   :  { %p7627_p7 = pnand %p7625_p6, %p7622_p5 }
0x2a70   :  { %7630 = shalt.err (!%p7627_p7)
}
0x2a71   :  { %s7639_s9 = smov 128   ;;  %s7640_s2 = smov 8  }
0x2a72   :  { %5782 = dma.vmem_to_hbm [thread:$0]  %s5777_s5, 256, %s8834_s20, [#allocation3], %s7639_s9, %s7639_s9, %s7640_s2  }
0x2a73   :  { %7631 = dma.done.wait [#allocation3], 256  }
0x2a74   :  { %7632 = vsyncadd [#allocation3], 4294967040 }
0x2a75   :  { %5786 = vsyncpa [#allocation3], 1 }

</bundles_post_ra>
